<compile_context>
chip_gen: v6e
topology: v6e:2x2x1
jax: 0.10.0
libtpu: 0.0.40
codegen_flags: <defaults>
</compile_context>

<pallas_src>
import functools

import jax
import jax.numpy as jnp
from jax.experimental import pallas as pl
from jax.experimental.pallas import tpu as pltpu

hidden_dim = 128
_LANES = 128


def _round_up(n, m):
    return ((n + m - 1) // m) * m


def _next_pow2(n):
    p = 1
    while p < n:
        p *= 2
    return p


def _value_net_kernel(x_ref, w1_ref, b1_ref, w2_ref, b2_ref, o_ref):
    # fc1 on the packed layout: (tile_p, PACK*S_pad) @ (PACK*S_pad, PACK*H).
    # K = 128 on the MXU, f32 accumulation; bias + ReLU on the VPU.
    h = jnp.dot(x_ref[...], w1_ref[...], preferred_element_type=jnp.float32)
    h = jnp.maximum(h + b1_ref[...], 0.0)
    # fc2 as a block-diagonal reduction: (tile_p, PACK*H) @ (PACK*H, PACK).
    # This keeps the per-tile output as full 128-byte rows (contiguous writeback)
    # instead of a (tb, 1) column of masked stores.
    v = jnp.dot(h.astype(w2_ref.dtype), w2_ref[...],
                preferred_element_type=jnp.float32)
    o_ref[...] = (v + b2_ref[0, 0]).astype(o_ref.dtype)


@functools.partial(jax.jit, static_argnames=("block_b",))
def value_net_forward(x, w1, b1, w2, b2, *, block_b=4096):
    """x: (B, S); w1: (S, H); b1: (H,); w2: (H, 1); b2: (1,). Returns (B, 1) f32."""
    B, S = x.shape
    H = w1.shape[1]
    cdtype = x.dtype  # compute dtype follows the input; no standalone x cast.

    # ---- packing geometry: PACK batch rows per packed row, lane width 128 ----
    if S >= _LANES:
        s_pad = _round_up(S, _LANES)
        pack = 1
    else:
        s_pad = _next_pow2(S)          # divides 128
        pack = _LANES // s_pad
    packw = pack * s_pad               # 128 for S < 128

    # ---- tile selection --------------------------------------------------
    sub = 16 if jnp.dtype(cdtype).itemsize == 2 else 8   # sublane packing granule
    total_p = pl.cdiv(B, pack)                           # packed rows of real data
    max_tile_p = max(sub, (max(block_b, pack) // pack) // sub * sub)
    # Aim for >=2 grid steps when there is enough work (feeds both TCs on v7x);
    # tiny batches fall back to a single step (pure-overhead regime).
    half_p = _round_up(pl.cdiv(total_p, 2), sub)
    tile_p = min(max_tile_p, max(sub, half_p))
    bp_packed = _round_up(total_p, tile_p)
    bp = bp_packed * pack
    grid = (bp_packed // tile_p,)

    # ---- data prep (the x reshape is a free, contiguous row-major reshape) ---
    if bp != B or s_pad != S:
        x = jnp.pad(x, ((0, bp - B), (0, s_pad - S)))
    x_packed = x.reshape(bp_packed, packw)

    # Block-diagonal weights (tiny; ~2 MiB f32 for S=4, H=128).  These could be
    # precomputed once per parameter update outside this function if desired.
    eye = jnp.eye(pack, dtype=cdtype)
    w1p = w1.astype(cdtype)
    if s_pad != S:
        w1p = jnp.pad(w1p, ((0, s_pad - S), (0, 0)))
    w1_bd = jnp.kron(eye, w1p)                                  # (packw, pack*H)
    b1_bd = jnp.tile(b1.astype(jnp.float32), pack).reshape(1, pack * H)
    w2_bd = jnp.kron(eye, w2.astype(cdtype))                    # (pack*H, pack)
    b2_2d = b2.reshape(1, 1).astype(jnp.float32)

    out = pl.pallas_call(
        _value_net_kernel,
        out_shape=jax.ShapeDtypeStruct((bp_packed, pack), jnp.float32),
        grid=grid,
        in_specs=[
            pl.BlockSpec((tile_p, packw), lambda i: (i, 0)),     # streamed x tiles
            pl.BlockSpec((packw, pack * H), lambda i: (0, 0)),   # resident weights
            pl.BlockSpec((1, pack * H), lambda i: (0, 0)),
            pl.BlockSpec((pack * H, pack), lambda i: (0, 0)),
            pl.BlockSpec((1, 1), lambda i: (0, 0)),
        ],
        out_specs=pl.BlockSpec((tile_p, pack), lambda i: (i, 0)),
        compiler_params=pltpu.CompilerParams(
            dimension_semantics=("parallel",),          # megacore sharding on v7x
            vmem_limit_bytes=32 * 1024 * 1024,          # covers v5e's 16 MiB default
        ),
    )(x_packed, w1_bd, b1_bd, w2_bd, b2_2d)

    # Free contiguous reshape back to a column, then drop padded rows.
    return out.reshape(bp, 1)[:B]


def init_value_net_params(key, state_dim, hidden):
    """Deterministic init mimicking torch.nn.Linear (uniform +-1/sqrt(fan_in))."""
    k1, k2, k3, k4 = jax.random.split(key, 4)
    bound1 = 1.0 / jnp.sqrt(jnp.float32(state_dim))
    bound2 = 1.0 / jnp.sqrt(jnp.float32(hidden))
    # stored transposed relative to PyTorch's (out, in) convention
    w1 = jax.random.uniform(k1, (state_dim, hidden), jnp.float32, -bound1, bound1)
    b1 = jax.random.uniform(k2, (hidden,), jnp.float32, -bound1, bound1)
    w2 = jax.random.uniform(k3, (hidden, 1), jnp.float32, -bound2, bound2)
    b2 = jax.random.uniform(k4, (1,), jnp.float32, -bound2, bound2)
    return w1, b1, w2, b2


def _ref_forward(x, w1, b1, w2, b2):
    return jnp.maximum(x @ w1 + b1, 0.0) @ w2 + b2


if __name__ == "__main__":
    key = jax.random.PRNGKey(0)
    k_x, k_p, k_x2, k_p3 = jax.random.split(key, 4)

    # --- case 1: typical small batch, state_dim=4, single grid step ---------
    batch, state_dim = 200, 4
    x = jax.random.normal(k_x, (batch, state_dim), dtype=jnp.float32)
    w1, b1, w2, b2 = init_value_net_params(k_p, state_dim, hidden_dim)
    out = jax.block_until_ready(value_net_forward(x, w1, b1, w2, b2))
    ref = _ref_forward(x, w1, b1, w2, b2)
    assert out.shape == (batch, 1)
    assert jnp.allclose(out, ref, atol=1e-4, rtol=1e-4)

    # --- case 2: multi-tile path (several parallel grid steps + batch pad) ---
    batch2 = 600
    x2 = jax.random.normal(k_x2, (batch2, state_dim), dtype=jnp.float32)
    out2 = jax.block_until_ready(
        value_net_forward(x2, w1, b1, w2, b2, block_b=256))
    ref2 = _ref_forward(x2, w1, b1, w2, b2)
    assert out2.shape == (batch2, 1)
    assert jnp.allclose(out2, ref2, atol=1e-4, rtol=1e-4)

    # --- case 3: Pendulum-like state_dim=3 (feature padding) + tiny batch ----
    batch3, state_dim3 = 7, 3
    x3 = jax.random.normal(k_x, (batch3, state_dim3), dtype=jnp.float32)
    p3 = init_value_net_params(k_p3, state_dim3, hidden_dim)
    out3 = jax.block_until_ready(value_net_forward(x3, *p3))
    ref3 = _ref_forward(x3, *p3)
    assert out3.shape == (batch3, 1)
    assert jnp.allclose(out3, ref3, atol=1e-4, rtol=1e-4)

    print("KERNEL_OK")
</pallas_src>

<mosaic_0001>
module attributes {stable_mosaic.version = 11 : i64} {
  func.func @_value_net_kernel(%arg0: i32, %arg1: memref<8x128xf32, #tpu.memory_space<vmem>>, %arg2: memref<128x4096xf32, #tpu.memory_space<vmem>>, %arg3: memref<1x4096xf32, #tpu.memory_space<vmem>>, %arg4: memref<4096x32xf32, #tpu.memory_space<vmem>>, %arg5: memref<1x1xf32, #tpu.memory_space<vmem>>, %arg6: memref<8x32xf32, #tpu.memory_space<vmem>>) attributes {dimension_semantics = [#tpu.dimension_semantics<parallel>], iteration_bounds = array<i64: 1>, scalar_prefetch = 0 : i64, scratch_operands = 0 : i64, tpu.core_type = #tpu.core_type<tc>, window_params = [{transform_indices = @transform_0, window_bounds = array<i64: 8, 128>}, {pipeline_mode = #tpu.pipeline_mode<synchronous>, transform_indices = @transform_1, window_bounds = array<i64: 128, 4096>}, {pipeline_mode = #tpu.pipeline_mode<synchronous>, transform_indices = @transform_2, window_bounds = array<i64: 1, 4096>}, {pipeline_mode = #tpu.pipeline_mode<synchronous>, transform_indices = @transform_3, window_bounds = array<i64: 4096, 32>}, {pipeline_mode = #tpu.pipeline_mode<synchronous>, transform_indices = @transform_4, window_bounds = array<i64: 1, 1>}, {transform_indices = @transform_5, window_bounds = array<i64: 8, 32>}]} {
    %c0 = arith.constant 0 : index
    %c0_0 = arith.constant 0 : index
    %0 = vector.load %arg1[%c0, %c0_0] : memref<8x128xf32, #tpu.memory_space<vmem>>, vector<8x128xf32>
    %c0_1 = arith.constant 0 : index
    %c0_2 = arith.constant 0 : index
    %1 = vector.load %arg2[%c0_1, %c0_2] : memref<128x4096xf32, #tpu.memory_space<vmem>>, vector<128x4096xf32>
    %cst = arith.constant dense<0.000000e+00> : vector<8x4096xf32>
    %2 = tpu.matmul %0, %1, %cst {dimension_numbers = #tpu.dot_dimension_numbers<[1], [0], [0], [1], [0, 0, 1, 1], [], []>} : vector<8x128xf32>, vector<128x4096xf32>, vector<8x4096xf32> -> vector<8x4096xf32>
    %c0_3 = arith.constant 0 : index
    %c0_4 = arith.constant 0 : index
    %3 = vector.load %arg3[%c0_3, %c0_4] : memref<1x4096xf32, #tpu.memory_space<vmem>>, vector<1x4096xf32>
    %4 = vector.broadcast %3 : vector<1x4096xf32> to vector<8x4096xf32>
    %5 = arith.addf %2, %4 : vector<8x4096xf32>
    %cst_5 = arith.constant 0.000000e+00 : f32
    %6 = vector.broadcast %cst_5 : f32 to vector<8x4096xf32>
    %7 = arith.maximumf %5, %6 : vector<8x4096xf32>
    %c0_6 = arith.constant 0 : index
    %c0_7 = arith.constant 0 : index
    %8 = vector.load %arg4[%c0_6, %c0_7] : memref<4096x32xf32, #tpu.memory_space<vmem>>, vector<4096x32xf32>
    %cst_8 = arith.constant dense<0.000000e+00> : vector<8x32xf32>
    %9 = tpu.matmul %7, %8, %cst_8 {dimension_numbers = #tpu.dot_dimension_numbers<[1], [0], [0], [1], [0, 0, 1, 1], [], []>} : vector<8x4096xf32>, vector<4096x32xf32>, vector<8x32xf32> -> vector<8x32xf32>
    %c0_9 = arith.constant 0 : index
    %c0_10 = arith.constant 0 : index
    %10 = vector.load %arg5[%c0_9, %c0_10] : memref<1x1xf32, #tpu.memory_space<vmem>>, vector<1x1xf32>
    %11 = vector.extract %10[0, 0] : f32 from vector<1x1xf32>
    %12 = vector.broadcast %11 : f32 to vector<8x32xf32>
    %13 = arith.addf %9, %12 : vector<8x32xf32>
    %c0_11 = arith.constant 0 : index
    %c0_12 = arith.constant 0 : index
    %14 = vector.load %arg6[%c0_11, %c0_12] : memref<8x32xf32, #tpu.memory_space<vmem>>, vector<8x32xf32>
    tpu.vector_store %arg6[%c0_11, %c0_12], %13 {strides = array<i32>} : memref<8x32xf32, #tpu.memory_space<vmem>>, vector<8x32xf32>,
    return
  }
  func.func @transform_0(%arg0: i32) -> (i32, i32) {
    %c0_i32 = arith.constant 0 : i32
    %c0_i32_0 = arith.constant 0 : i32
    return %arg0, %c0_i32 : i32, i32
  }
  func.func @transform_1(%arg0: i32) -> (i32, i32) {
    %c0_i32 = arith.constant 0 : i32
    %c0_i32_0 = arith.constant 0 : i32
    %c0_i32_1 = arith.constant 0 : i32
    return %c0_i32, %c0_i32_0 : i32, i32
  }
  func.func @transform_2(%arg0: i32) -> (i32, i32) {
    %c0_i32 = arith.constant 0 : i32
    %c0_i32_0 = arith.constant 0 : i32
    %c0_i32_1 = arith.constant 0 : i32
    return %c0_i32, %c0_i32_0 : i32, i32
  }
  func.func @transform_3(%arg0: i32) -> (i32, i32) {
    %c0_i32 = arith.constant 0 : i32
    %c0_i32_0 = arith.constant 0 : i32
    %c0_i32_1 = arith.constant 0 : i32
    return %c0_i32, %c0_i32_0 : i32, i32
  }
  func.func @transform_4(%arg0: i32) -> (i32, i32) {
    %c0_i32 = arith.constant 0 : i32
    %c0_i32_0 = arith.constant 0 : i32
    %c0_i32_1 = arith.constant 0 : i32
    return %c0_i32, %c0_i32_0 : i32, i32
  }
  func.func @transform_5(%arg0: i32) -> (i32, i32) {
    %c0_i32 = arith.constant 0 : i32
    %c0_i32_0 = arith.constant 0 : i32
    return %arg0, %c0_i32 : i32, i32
  }
}

</mosaic_0001>

<bundles_post_ra>
// kernel: tile.8
= control target key start
LH: loop header
LB: loop body
LE: loop exit
PB: predicated region body
PF: predicated region fallthrough
CT: control target
= control target key end

     0   :  { %s40_s0 = inlined_call_operand.vmem [shape: f32[128], index: 0, kind: input, shape index: {}]   ;;  %s41_s1 = inlined_call_operand.vmem [shape: f32[32,128], index: 1, kind: output, shape index: {}]  }
   0x1   :  { %v4_v0 = vld [vmem:[%s40_s0] ss:$0 sm:$0xff] }
   0x2   :  { %5 = vst [vmem:[%s41_s1] sm:$0xff] %v4_v0  ;;  %12 = vst [vmem:[%s41_s1 + $0x8] sm:$0xff] %v4_v0 }
   0x3   :  { %13 = vst [vmem:[%s41_s1 + $0x10] sm:$0xff] %v4_v0  ;;  %14 = vst [vmem:[%s41_s1 + $0x18] sm:$0xff] %v4_v0 }

// kernel: value_net_forward.1
= control target key start
LH: loop header
LB: loop body
LE: loop exit
PB: predicated region body
PF: predicated region fallthrough
CT: control target
= control target key end

     0   :  { %v4076_v3 = vmov 0.0   ;;  %vm3506_vm0 = vcmask 261120   ;;  %s7385_s1 = inlined_call_operand.vmem [shape: f32[128,4096], index: 1, kind: input, shape index: {}]   ;;  %s7386_s0 = inlined_call_operand.vmem [shape: f32[8,128], index: 0, kind: input, shape index: {}]   ;;  %s7387_s2 = inlined_call_operand.vmem [shape: f32[1,4096], index: 2, kind: input, shape index: {}]   ;;  %s7388_s3 = inlined_call_operand.vmem [shape: f32[4096,32], index: 3, kind: input, shape index: {}]   ;;  %s7389_s4 = inlined_call_operand.<no memory space> [shape: f32[1,1], index: 4, kind: input, shape index: {}]   ;;  %s7390_s5 = inlined_call_operand.vmem [shape: f32[8,32], index: 5, kind: output, shape index: {}]  }
   0x1   :  { %v504_v0 = vld [vmem:[%s7385_s1 + $0xf08] sm:$0xff]  ;;  %v506_v1 = vld [vmem:[%s7385_s1 + $0xf18] sm:$0xff]  ;;  %v503_v2 = vld [vmem:[%s7385_s1 + $0xf00] sm:$0xff]  ;;  %767 = vmatprep.mubr.f32.mxu0 %v4076_v3  ;;  %838 = vmatprep.mubr.f32.mxu1 %v4076_v3 }
   0x2   :  { %703 = vmatprep.subr.mxu0 %v504_v0  ;;  %774 = vmatprep.subr.mxu1 %v506_v1  ;;  %v505_v4 = vld [vmem:[%s7385_s1 + $0xf10] sm:$0xff]  ;;  %v472_v5 = vld [vmem:[%s7385_s1 + $0xe08] sm:$0xff]  ;;  %v474_v6 = vld [vmem:[%s7385_s1 + $0xe18] sm:$0xff] }
   0x3   :  { %704 = vmatpush1.msra.mxu0 %v503_v2  ;;  %775 = vmatpush1.msra.mxu1 %v505_v4  ;;  %v471_v7 = vld [vmem:[%s7385_s1 + $0xe00] sm:$0xff]  ;;  %v473_v8 = vld [vmem:[%s7385_s1 + $0xe10] sm:$0xff]  ;;  %v440_v9 = vld [vmem:[%s7385_s1 + $0xd08] sm:$0xff] }
   0x4   :  { %705 = vmatprep.subr.mxu0 %v472_v5  ;;  %776 = vmatprep.subr.mxu1 %v474_v6  ;;  %v442_v10 = vld [vmem:[%s7385_s1 + $0xd18] sm:$0xff]  ;;  %v439_v11 = vld [vmem:[%s7385_s1 + $0xd00] sm:$0xff]  ;;  %v441_v12 = vld [vmem:[%s7385_s1 + $0xd10] sm:$0xff] }
   0x5   :  { %706 = vmatpush1.msra.mxu0 %v471_v7  ;;  %777 = vmatpush1.msra.mxu1 %v473_v8  ;;  %v408_v13 = vld [vmem:[%s7385_s1 + $0xc08] sm:$0xff]  ;;  %v410_v14 = vld [vmem:[%s7385_s1 + $0xc18] sm:$0xff]  ;;  %v407_v15 = vld [vmem:[%s7385_s1 + $0xc00] sm:$0xff] }
   0x6   :  { %707 = vmatprep.subr.mxu0 %v440_v9  ;;  %778 = vmatprep.subr.mxu1 %v442_v10  ;;  %v409_v16 = vld [vmem:[%s7385_s1 + $0xc10] sm:$0xff]  ;;  %v376_v17 = vld [vmem:[%s7385_s1 + $0xb08] sm:$0xff]  ;;  %v378_v18 = vld [vmem:[%s7385_s1 + $0xb18] sm:$0xff] }
   0x7   :  { %708 = vmatpush1.msra.mxu0 %v439_v11  ;;  %779 = vmatpush1.msra.mxu1 %v441_v12  ;;  %v375_v19 = vld [vmem:[%s7385_s1 + $0xb00] sm:$0xff]  ;;  %v377_v20 = vld [vmem:[%s7385_s1 + $0xb10] sm:$0xff]  ;;  %v344_v21 = vld [vmem:[%s7385_s1 + $0xa08] sm:$0xff] }
   0x8   :  { %709 = vmatprep.subr.mxu0 %v408_v13  ;;  %780 = vmatprep.subr.mxu1 %v410_v14  ;;  %v346_v22 = vld [vmem:[%s7385_s1 + $0xa18] sm:$0xff]  ;;  %v343_v23 = vld [vmem:[%s7385_s1 + $0xa00] sm:$0xff]  ;;  %v345_v24 = vld [vmem:[%s7385_s1 + $0xa10] sm:$0xff] }
   0x9   :  { %710 = vmatpush1.msra.mxu0 %v407_v15  ;;  %781 = vmatpush1.msra.mxu1 %v409_v16  ;;  %v312_v25 = vld [vmem:[%s7385_s1 + $0x908] sm:$0xff]  ;;  %v314_v26 = vld [vmem:[%s7385_s1 + $0x918] sm:$0xff]  ;;  %v311_v27 = vld [vmem:[%s7385_s1 + $0x900] sm:$0xff] }
   0xa   :  { %711 = vmatprep.subr.mxu0 %v376_v17  ;;  %782 = vmatprep.subr.mxu1 %v378_v18  ;;  %v313_v28 = vld [vmem:[%s7385_s1 + $0x910] sm:$0xff]  ;;  %v280_v29 = vld [vmem:[%s7385_s1 + $0x808] sm:$0xff]  ;;  %v282_v30 = vld [vmem:[%s7385_s1 + $0x818] sm:$0xff] }
   0xb   :  { %712 = vmatpush1.msra.mxu0 %v375_v19  ;;  %783 = vmatpush1.msra.mxu1 %v377_v20  ;;  %v279_v31 = vld [vmem:[%s7385_s1 + $0x800] sm:$0xff]  ;;  %v281_v32 = vld [vmem:[%s7385_s1 + $0x810] sm:$0xff]  ;;  %v248_v33 = vld [vmem:[%s7385_s1 + $0x708] sm:$0xff] }
   0xc   :  { %713 = vmatprep.subr.mxu0 %v344_v21  ;;  %784 = vmatprep.subr.mxu1 %v346_v22  ;;  %v250_v34 = vld [vmem:[%s7385_s1 + $0x718] sm:$0xff]  ;;  %v247_v35 = vld [vmem:[%s7385_s1 + $0x700] sm:$0xff]  ;;  %v249_v36 = vld [vmem:[%s7385_s1 + $0x710] sm:$0xff] }
   0xd   :  { %714 = vmatpush1.msra.mxu0 %v343_v23  ;;  %785 = vmatpush1.msra.mxu1 %v345_v24  ;;  %v216_v37 = vld [vmem:[%s7385_s1 + $0x608] sm:$0xff]  ;;  %v218_v38 = vld [vmem:[%s7385_s1 + $0x618] sm:$0xff]  ;;  %v215_v39 = vld [vmem:[%s7385_s1 + $0x600] sm:$0xff] }
   0xe   :  { %715 = vmatprep.subr.mxu0 %v312_v25  ;;  %786 = vmatprep.subr.mxu1 %v314_v26  ;;  %v217_v40 = vld [vmem:[%s7385_s1 + $0x610] sm:$0xff]  ;;  %v184_v41 = vld [vmem:[%s7385_s1 + $0x508] sm:$0xff]  ;;  %v186_v42 = vld [vmem:[%s7385_s1 + $0x518] sm:$0xff] }
   0xf   :  { %716 = vmatpush1.msra.mxu0 %v311_v27  ;;  %787 = vmatpush1.msra.mxu1 %v313_v28  ;;  %v183_v43 = vld [vmem:[%s7385_s1 + $0x500] sm:$0xff]  ;;  %v185_v44 = vld [vmem:[%s7385_s1 + $0x510] sm:$0xff]  ;;  %v152_v45 = vld [vmem:[%s7385_s1 + $0x408] sm:$0xff] }
  0x10   :  { %717 = vmatprep.subr.mxu0 %v280_v29  ;;  %788 = vmatprep.subr.mxu1 %v282_v30  ;;  %v154_v46 = vld [vmem:[%s7385_s1 + $0x418] sm:$0xff]  ;;  %v151_v47 = vld [vmem:[%s7385_s1 + $0x400] sm:$0xff]  ;;  %v153_v48 = vld [vmem:[%s7385_s1 + $0x410] sm:$0xff] }
  0x11   :  { %718 = vmatpush1.msra.mxu0 %v279_v31  ;;  %789 = vmatpush1.msra.mxu1 %v281_v32  ;;  %v120_v49 = vld [vmem:[%s7385_s1 + $0x308] sm:$0xff]  ;;  %v122_v50 = vld [vmem:[%s7385_s1 + $0x318] sm:$0xff]  ;;  %v119_v51 = vld [vmem:[%s7385_s1 + $0x300] sm:$0xff] }
  0x12   :  { %719 = vmatprep.subr.mxu0 %v248_v33  ;;  %790 = vmatprep.subr.mxu1 %v250_v34  ;;  %v121_v52 = vld [vmem:[%s7385_s1 + $0x310] sm:$0xff]  ;;  %v88_v53 = vld [vmem:[%s7385_s1 + $0x208] sm:$0xff]  ;;  %v90_v54 = vld [vmem:[%s7385_s1 + $0x218] sm:$0xff] }
  0x13   :  { %720 = vmatpush1.msra.mxu0 %v247_v35  ;;  %791 = vmatpush1.msra.mxu1 %v249_v36  ;;  %v87_v55 = vld [vmem:[%s7385_s1 + $0x200] sm:$0xff]  ;;  %v89_v56 = vld [vmem:[%s7385_s1 + $0x210] sm:$0xff]  ;;  %v56_v57 = vld [vmem:[%s7385_s1 + $0x108] sm:$0xff] }
  0x14   :  { %721 = vmatprep.subr.mxu0 %v216_v37  ;;  %792 = vmatprep.subr.mxu1 %v218_v38  ;;  %v58_v58 = vld [vmem:[%s7385_s1 + $0x118] sm:$0xff]  ;;  %v55_v59 = vld [vmem:[%s7385_s1 + $0x100] sm:$0xff]  ;;  %v57_v60 = vld [vmem:[%s7385_s1 + $0x110] sm:$0xff] }
  0x15   :  { %722 = vmatpush1.msra.mxu0 %v215_v39  ;;  %793 = vmatpush1.msra.mxu1 %v217_v40  ;;  %v24_v61 = vld [vmem:[%s7385_s1 + $0x8] sm:$0xff]  ;;  %v26_v62 = vld [vmem:[%s7385_s1 + $0x18] sm:$0xff]  ;;  %v23_v63 = vld [vmem:[%s7385_s1] sm:$0xff] }
  0x16   :  { %723 = vmatprep.subr.mxu0 %v184_v41  ;;  %794 = vmatprep.subr.mxu1 %v186_v42  ;;  %v25_v0 = vld [vmem:[%s7385_s1 + $0x10] sm:$0xff]  ;;  %v4304_v1 = vld [vmem:[%s7386_s0] sm:$0xff]  ;;  %v508_v2 = vld [vmem:[%s7385_s1 + $0xf28] sm:$0xff] }
  0x17   :  { %724 = vmatpush1.msra.mxu0 %v183_v43  ;;  %795 = vmatpush1.msra.mxu1 %v185_v44  ;;  %v510_v4 = vld [vmem:[%s7385_s1 + $0xf38] sm:$0xff]  ;;  %v507_v5 = vld [vmem:[%s7385_s1 + $0xf20] sm:$0xff]  ;;  %v509_v6 = vld [vmem:[%s7385_s1 + $0xf30] sm:$0xff] }
  0x18   :  { %725 = vmatprep.subr.mxu0 %v152_v45  ;;  %796 = vmatprep.subr.mxu1 %v154_v46  ;;  %v476_v7 = vld [vmem:[%s7385_s1 + $0xe28] sm:$0xff]  ;;  %v478_v8 = vld [vmem:[%s7385_s1 + $0xe38] sm:$0xff]  ;;  %v475_v9 = vld [vmem:[%s7385_s1 + $0xe20] sm:$0xff] }
  0x19   :  { %726 = vmatpush1.msra.mxu0 %v151_v47  ;;  %797 = vmatpush1.msra.mxu1 %v153_v48  ;;  %v477_v10 = vld [vmem:[%s7385_s1 + $0xe30] sm:$0xff]  ;;  %v444_v11 = vld [vmem:[%s7385_s1 + $0xd28] sm:$0xff]  ;;  %v446_v12 = vld [vmem:[%s7385_s1 + $0xd38] sm:$0xff] }
  0x1a   :  { %727 = vmatprep.subr.mxu0 %v120_v49  ;;  %798 = vmatprep.subr.mxu1 %v122_v50  ;;  %v443_v13 = vld [vmem:[%s7385_s1 + $0xd20] sm:$0xff]  ;;  %v445_v14 = vld [vmem:[%s7385_s1 + $0xd30] sm:$0xff]  ;;  %v412_v15 = vld [vmem:[%s7385_s1 + $0xc28] sm:$0xff] }
  0x1b   :  { %728 = vmatpush1.msra.mxu0 %v119_v51  ;;  %799 = vmatpush1.msra.mxu1 %v121_v52  ;;  %v414_v16 = vld [vmem:[%s7385_s1 + $0xc38] sm:$0xff]  ;;  %v411_v17 = vld [vmem:[%s7385_s1 + $0xc20] sm:$0xff]  ;;  %v413_v18 = vld [vmem:[%s7385_s1 + $0xc30] sm:$0xff] }
  0x1c   :  { %729 = vmatprep.subr.mxu0 %v88_v53  ;;  %800 = vmatprep.subr.mxu1 %v90_v54  ;;  %v380_v19 = vld [vmem:[%s7385_s1 + $0xb28] sm:$0xff]  ;;  %v382_v20 = vld [vmem:[%s7385_s1 + $0xb38] sm:$0xff]  ;;  %v379_v21 = vld [vmem:[%s7385_s1 + $0xb20] sm:$0xff] }
  0x1d   :  { %730 = vmatpush1.msra.mxu0 %v87_v55  ;;  %801 = vmatpush1.msra.mxu1 %v89_v56  ;;  %v381_v22 = vld [vmem:[%s7385_s1 + $0xb30] sm:$0xff]  ;;  %v348_v23 = vld [vmem:[%s7385_s1 + $0xa28] sm:$0xff]  ;;  %v350_v24 = vld [vmem:[%s7385_s1 + $0xa38] sm:$0xff] }
  0x1e   :  { %731 = vmatprep.subr.mxu0 %v56_v57  ;;  %802 = vmatprep.subr.mxu1 %v58_v58  ;;  %v347_v25 = vld [vmem:[%s7385_s1 + $0xa20] sm:$0xff]  ;;  %v349_v26 = vld [vmem:[%s7385_s1 + $0xa30] sm:$0xff]  ;;  %v316_v27 = vld [vmem:[%s7385_s1 + $0x928] sm:$0xff] }
  0x1f   :  { %732 = vmatpush1.msra.mxu0 %v55_v59  ;;  %803 = vmatpush1.msra.mxu1 %v57_v60  ;;  %v318_v28 = vld [vmem:[%s7385_s1 + $0x938] sm:$0xff]  ;;  %v315_v29 = vld [vmem:[%s7385_s1 + $0x920] sm:$0xff]  ;;  %v317_v30 = vld [vmem:[%s7385_s1 + $0x930] sm:$0xff] }
  0x20   :  { %733 = vmatprep.subr.mxu0 %v24_v61  ;;  %804 = vmatprep.subr.mxu1 %v26_v62  ;;  %v284_v31 = vld [vmem:[%s7385_s1 + $0x828] sm:$0xff]  ;;  %v286_v32 = vld [vmem:[%s7385_s1 + $0x838] sm:$0xff]  ;;  %v283_v33 = vld [vmem:[%s7385_s1 + $0x820] sm:$0xff] }
  0x21   :  { %734 = vmatpush1.msra.mxu0 %v23_v63  ;;  %805 = vmatpush1.msra.mxu1 %v25_v0  ;;  %v285_v34 = vld [vmem:[%s7385_s1 + $0x830] sm:$0xff]  ;;  %v252_v35 = vld [vmem:[%s7385_s1 + $0x728] sm:$0xff]  ;;  %v254_v36 = vld [vmem:[%s7385_s1 + $0x738] sm:$0xff] }
  0x22   :  { %768 = vmatmul.mubr.f32.vlgmr.msra.gmra.mxu0 %v4304_v1  ;;  %845 = vmatprep.subr.mxu0 %v508_v2  ;;  %v251_v37 = vld [vmem:[%s7385_s1 + $0x720] sm:$0xff]  ;;  %v253_v38 = vld [vmem:[%s7385_s1 + $0x730] sm:$0xff]  ;;  %v220_v39 = vld [vmem:[%s7385_s1 + $0x628] sm:$0xff] }
  0x23   :  { %916 = vmatprep.subr.mxu1 %v510_v4  ;;  %839 = vmatmul.mubr.f32.vlgmr.msra.gmra.mxu1 %v4304_v1  ;;  %v222_v40 = vld [vmem:[%s7385_s1 + $0x638] sm:$0xff]  ;;  %v219_v41 = vld [vmem:[%s7385_s1 + $0x620] sm:$0xff]  ;;  %v221_v42 = vld [vmem:[%s7385_s1 + $0x630] sm:$0xff] }
  0x24   :  { %846 = vmatpush1.msra.mxu0 %v507_v5  ;;  %917 = vmatpush1.msra.mxu1 %v509_v6  ;;  %v188_v43 = vld [vmem:[%s7385_s1 + $0x528] sm:$0xff]  ;;  %v190_v44 = vld [vmem:[%s7385_s1 + $0x538] sm:$0xff]  ;;  %v187_v45 = vld [vmem:[%s7385_s1 + $0x520] sm:$0xff] }
  0x25   :  { %847 = vmatprep.subr.mxu0 %v476_v7  ;;  %918 = vmatprep.subr.mxu1 %v478_v8  ;;  %v189_v46 = vld [vmem:[%s7385_s1 + $0x530] sm:$0xff]  ;;  %v156_v47 = vld [vmem:[%s7385_s1 + $0x428] sm:$0xff]  ;;  %v158_v48 = vld [vmem:[%s7385_s1 + $0x438] sm:$0xff] }
  0x26   :  { %848 = vmatpush1.msra.mxu0 %v475_v9  ;;  %919 = vmatpush1.msra.mxu1 %v477_v10  ;;  %v155_v49 = vld [vmem:[%s7385_s1 + $0x420] sm:$0xff]  ;;  %v157_v50 = vld [vmem:[%s7385_s1 + $0x430] sm:$0xff]  ;;  %v124_v51 = vld [vmem:[%s7385_s1 + $0x328] sm:$0xff] }
  0x27   :  { %849 = vmatprep.subr.mxu0 %v444_v11  ;;  %920 = vmatprep.subr.mxu1 %v446_v12  ;;  %v126_v52 = vld [vmem:[%s7385_s1 + $0x338] sm:$0xff]  ;;  %v123_v53 = vld [vmem:[%s7385_s1 + $0x320] sm:$0xff]  ;;  %v125_v54 = vld [vmem:[%s7385_s1 + $0x330] sm:$0xff] }
  0x28   :  { %850 = vmatpush1.msra.mxu0 %v443_v13  ;;  %921 = vmatpush1.msra.mxu1 %v445_v14  ;;  %v92_v55 = vld [vmem:[%s7385_s1 + $0x228] sm:$0xff]  ;;  %v94_v56 = vld [vmem:[%s7385_s1 + $0x238] sm:$0xff]  ;;  %v91_v57 = vld [vmem:[%s7385_s1 + $0x220] sm:$0xff] }
  0x29   :  { %851 = vmatprep.subr.mxu0 %v412_v15  ;;  %922 = vmatprep.subr.mxu1 %v414_v16  ;;  %v93_v58 = vld [vmem:[%s7385_s1 + $0x230] sm:$0xff]  ;;  %v60_v59 = vld [vmem:[%s7385_s1 + $0x128] sm:$0xff]  ;;  %v62_v60 = vld [vmem:[%s7385_s1 + $0x138] sm:$0xff] }
  0x2a   :  { %852 = vmatpush1.msra.mxu0 %v411_v17  ;;  %923 = vmatpush1.msra.mxu1 %v413_v18  ;;  %v59_v61 = vld [vmem:[%s7385_s1 + $0x120] sm:$0xff]  ;;  %v61_v62 = vld [vmem:[%s7385_s1 + $0x130] sm:$0xff]  ;;  %v28_v63 = vld [vmem:[%s7385_s1 + $0x28] sm:$0xff] }
  0x2b   :  { %853 = vmatprep.subr.mxu0 %v380_v19  ;;  %924 = vmatprep.subr.mxu1 %v382_v20  ;;  %v30_v0 = vld [vmem:[%s7385_s1 + $0x38] sm:$0xff]  ;;  %v27_v2 = vld [vmem:[%s7385_s1 + $0x20] sm:$0xff]  ;;  %v29_v4 = vld [vmem:[%s7385_s1 + $0x30] sm:$0xff] }
  0x2c   :  { %854 = vmatpush1.msra.mxu0 %v379_v21  ;;  %925 = vmatpush1.msra.mxu1 %v381_v22  ;;  %v512_v5 = vld [vmem:[%s7385_s1 + $0xf48] sm:$0xff]  ;;  %v514_v6 = vld [vmem:[%s7385_s1 + $0xf58] sm:$0xff]  ;;  %v511_v7 = vld [vmem:[%s7385_s1 + $0xf40] sm:$0xff] }
  0x2d   :  { %855 = vmatprep.subr.mxu0 %v348_v23  ;;  %926 = vmatprep.subr.mxu1 %v350_v24  ;;  %v513_v8 = vld [vmem:[%s7385_s1 + $0xf50] sm:$0xff]  ;;  %v480_v9 = vld [vmem:[%s7385_s1 + $0xe48] sm:$0xff]  ;;  %v482_v10 = vld [vmem:[%s7385_s1 + $0xe58] sm:$0xff] }
  0x2e   :  { %856 = vmatpush1.msra.mxu0 %v347_v25  ;;  %927 = vmatpush1.msra.mxu1 %v349_v26  ;;  %v479_v11 = vld [vmem:[%s7385_s1 + $0xe40] sm:$0xff]  ;;  %v481_v12 = vld [vmem:[%s7385_s1 + $0xe50] sm:$0xff]  ;;  %v448_v13 = vld [vmem:[%s7385_s1 + $0xd48] sm:$0xff] }
  0x2f   :  { %857 = vmatprep.subr.mxu0 %v316_v27  ;;  %928 = vmatprep.subr.mxu1 %v318_v28  ;;  %v450_v14 = vld [vmem:[%s7385_s1 + $0xd58] sm:$0xff]  ;;  %v447_v15 = vld [vmem:[%s7385_s1 + $0xd40] sm:$0xff]  ;;  %v449_v16 = vld [vmem:[%s7385_s1 + $0xd50] sm:$0xff] }
  0x30   :  { %858 = vmatpush1.msra.mxu0 %v315_v29  ;;  %929 = vmatpush1.msra.mxu1 %v317_v30  ;;  %v416_v17 = vld [vmem:[%s7385_s1 + $0xc48] sm:$0xff]  ;;  %v418_v18 = vld [vmem:[%s7385_s1 + $0xc58] sm:$0xff]  ;;  %v415_v19 = vld [vmem:[%s7385_s1 + $0xc40] sm:$0xff] }
  0x31   :  { %859 = vmatprep.subr.mxu0 %v284_v31  ;;  %930 = vmatprep.subr.mxu1 %v286_v32  ;;  %v417_v20 = vld [vmem:[%s7385_s1 + $0xc50] sm:$0xff]  ;;  %v384_v21 = vld [vmem:[%s7385_s1 + $0xb48] sm:$0xff]  ;;  %v386_v22 = vld [vmem:[%s7385_s1 + $0xb58] sm:$0xff] }
  0x32   :  { %860 = vmatpush1.msra.mxu0 %v283_v33  ;;  %931 = vmatpush1.msra.mxu1 %v285_v34  ;;  %v383_v23 = vld [vmem:[%s7385_s1 + $0xb40] sm:$0xff]  ;;  %v385_v24 = vld [vmem:[%s7385_s1 + $0xb50] sm:$0xff]  ;;  %v352_v25 = vld [vmem:[%s7385_s1 + $0xa48] sm:$0xff] }
  0x33   :  { %861 = vmatprep.subr.mxu0 %v252_v35  ;;  %932 = vmatprep.subr.mxu1 %v254_v36  ;;  %v354_v26 = vld [vmem:[%s7385_s1 + $0xa58] sm:$0xff]  ;;  %v351_v27 = vld [vmem:[%s7385_s1 + $0xa40] sm:$0xff]  ;;  %v353_v28 = vld [vmem:[%s7385_s1 + $0xa50] sm:$0xff] }
  0x34   :  { %862 = vmatpush1.msra.mxu0 %v251_v37  ;;  %933 = vmatpush1.msra.mxu1 %v253_v38  ;;  %v320_v29 = vld [vmem:[%s7385_s1 + $0x948] sm:$0xff]  ;;  %v322_v30 = vld [vmem:[%s7385_s1 + $0x958] sm:$0xff]  ;;  %v319_v31 = vld [vmem:[%s7385_s1 + $0x940] sm:$0xff] }
  0x35   :  { %863 = vmatprep.subr.mxu0 %v220_v39  ;;  %934 = vmatprep.subr.mxu1 %v222_v40  ;;  %v321_v32 = vld [vmem:[%s7385_s1 + $0x950] sm:$0xff]  ;;  %v288_v33 = vld [vmem:[%s7385_s1 + $0x848] sm:$0xff]  ;;  %v290_v34 = vld [vmem:[%s7385_s1 + $0x858] sm:$0xff] }
  0x36   :  { %864 = vmatpush1.msra.mxu0 %v219_v41  ;;  %935 = vmatpush1.msra.mxu1 %v221_v42  ;;  %v287_v35 = vld [vmem:[%s7385_s1 + $0x840] sm:$0xff]  ;;  %v289_v36 = vld [vmem:[%s7385_s1 + $0x850] sm:$0xff]  ;;  %v256_v37 = vld [vmem:[%s7385_s1 + $0x748] sm:$0xff] }
  0x37   :  { %865 = vmatprep.subr.mxu0 %v188_v43  ;;  %936 = vmatprep.subr.mxu1 %v190_v44  ;;  %v258_v38 = vld [vmem:[%s7385_s1 + $0x758] sm:$0xff]  ;;  %v255_v39 = vld [vmem:[%s7385_s1 + $0x740] sm:$0xff]  ;;  %v257_v40 = vld [vmem:[%s7385_s1 + $0x750] sm:$0xff] }
  0x38   :  { %866 = vmatpush1.msra.mxu0 %v187_v45  ;;  %937 = vmatpush1.msra.mxu1 %v189_v46  ;;  %v224_v41 = vld [vmem:[%s7385_s1 + $0x648] sm:$0xff]  ;;  %v226_v42 = vld [vmem:[%s7385_s1 + $0x658] sm:$0xff]  ;;  %v223_v43 = vld [vmem:[%s7385_s1 + $0x640] sm:$0xff] }
  0x39   :  { %867 = vmatprep.subr.mxu0 %v156_v47  ;;  %938 = vmatprep.subr.mxu1 %v158_v48  ;;  %v225_v44 = vld [vmem:[%s7385_s1 + $0x650] sm:$0xff]  ;;  %v192_v45 = vld [vmem:[%s7385_s1 + $0x548] sm:$0xff]  ;;  %v194_v46 = vld [vmem:[%s7385_s1 + $0x558] sm:$0xff] }
  0x3a   :  { %868 = vmatpush1.msra.mxu0 %v155_v49  ;;  %939 = vmatpush1.msra.mxu1 %v157_v50  ;;  %v191_v47 = vld [vmem:[%s7385_s1 + $0x540] sm:$0xff]  ;;  %v193_v48 = vld [vmem:[%s7385_s1 + $0x550] sm:$0xff]  ;;  %v160_v49 = vld [vmem:[%s7385_s1 + $0x448] sm:$0xff] }
  0x3b   :  { %869 = vmatprep.subr.mxu0 %v124_v51  ;;  %940 = vmatprep.subr.mxu1 %v126_v52  ;;  %v162_v50 = vld [vmem:[%s7385_s1 + $0x458] sm:$0xff]  ;;  %v159_v51 = vld [vmem:[%s7385_s1 + $0x440] sm:$0xff]  ;;  %v161_v52 = vld [vmem:[%s7385_s1 + $0x450] sm:$0xff] }
  0x3c   :  { %870 = vmatpush1.msra.mxu0 %v123_v53  ;;  %941 = vmatpush1.msra.mxu1 %v125_v54  ;;  %v128_v53 = vld [vmem:[%s7385_s1 + $0x348] sm:$0xff]  ;;  %v130_v54 = vld [vmem:[%s7385_s1 + $0x358] sm:$0xff] }
  0x3d   :  { %871 = vmatprep.subr.mxu0 %v92_v55  ;;  %942 = vmatprep.subr.mxu1 %v94_v56  ;;  %v127_v55 = vld [vmem:[%s7385_s1 + $0x340] sm:$0xff]  ;;  %v129_v56 = vld [vmem:[%s7385_s1 + $0x350] sm:$0xff] }
  0x3e   :  { %872 = vmatpush1.msra.mxu0 %v91_v57  ;;  %943 = vmatpush1.msra.mxu1 %v93_v58  ;;  %v96_v57 = vld [vmem:[%s7385_s1 + $0x248] sm:$0xff]  ;;  %v98_v58 = vld [vmem:[%s7385_s1 + $0x258] sm:$0xff] }
  0x3f   :  { %873 = vmatprep.subr.mxu0 %v60_v59  ;;  %944 = vmatprep.subr.mxu1 %v62_v60  ;;  %v95_v59 = vld [vmem:[%s7385_s1 + $0x240] sm:$0xff]  ;;  %v97_v60 = vld [vmem:[%s7385_s1 + $0x250] sm:$0xff] }
  0x40   :  { %874 = vmatpush1.msra.mxu0 %v59_v61  ;;  %945 = vmatpush1.msra.mxu1 %v61_v62  ;;  %v64_v61 = vld [vmem:[%s7385_s1 + $0x148] sm:$0xff]  ;;  %v66_v62 = vld [vmem:[%s7385_s1 + $0x158] sm:$0xff] }
  0x41   :  { %875 = vmatprep.subr.mxu0 %v28_v63  ;;  %946 = vmatprep.subr.mxu1 %v30_v0  ;;  %v63_v63 = vld [vmem:[%s7385_s1 + $0x140] sm:$0xff]  ;;  %v65_v0 = vld [vmem:[%s7385_s1 + $0x150] sm:$0xff] }
  0x42   :  { %876 = vmatpush1.msra.mxu0 %v27_v2  ;;  %909 = vmatprep.mubr.f32.mxu0 %v4076_v3  ;;  %v32_v2 = vld [vmem:[%s7385_s1 + $0x48] sm:$0xff] }
  0x43   :  { %947 = vmatpush1.msra.mxu1 %v29_v4  ;;  %910 = vmatmul.mubr.f32.vlgmr.msra.gmra.mxu0 %v4304_v1  ;;  %v34_v4 = vld [vmem:[%s7385_s1 + $0x58] sm:$0xff] }
  0x44   :  { %980 = vmatprep.mubr.f32.mxu1 %v4076_v3  ;;  %987 = vmatprep.subr.mxu0 %v512_v5  ;;  %v31_v5 = vld [vmem:[%s7385_s1 + $0x40] sm:$0xff] }
  0x45   :  { %1058 = vmatprep.subr.mxu1 %v514_v6  ;;  %981 = vmatmul.mubr.f32.vlgmr.msra.gmra.mxu1 %v4304_v1  ;;  %v33_v6 = vld [vmem:[%s7385_s1 + $0x50] sm:$0xff] }
  0x46   :  { %988 = vmatpush1.msra.mxu0 %v511_v7  ;;  %1059 = vmatpush1.msra.mxu1 %v513_v8  ;;  %v516_v7 = vld [vmem:[%s7385_s1 + $0xf68] sm:$0xff]  ;;  %v518_v8 = vld [vmem:[%s7385_s1 + $0xf78] sm:$0xff] }
  0x47   :  { %989 = vmatprep.subr.mxu0 %v480_v9  ;;  %1060 = vmatprep.subr.mxu1 %v482_v10  ;;  %v515_v9 = vld [vmem:[%s7385_s1 + $0xf60] sm:$0xff]  ;;  %v517_v10 = vld [vmem:[%s7385_s1 + $0xf70] sm:$0xff] }
  0x48   :  { %990 = vmatpush1.msra.mxu0 %v479_v11  ;;  %1061 = vmatpush1.msra.mxu1 %v481_v12  ;;  %v484_v11 = vld [vmem:[%s7385_s1 + $0xe68] sm:$0xff]  ;;  %v486_v12 = vld [vmem:[%s7385_s1 + $0xe78] sm:$0xff] }
  0x49   :  { %991 = vmatprep.subr.mxu0 %v448_v13  ;;  %1062 = vmatprep.subr.mxu1 %v450_v14  ;;  %v483_v13 = vld [vmem:[%s7385_s1 + $0xe60] sm:$0xff]  ;;  %v485_v14 = vld [vmem:[%s7385_s1 + $0xe70] sm:$0xff] }
  0x4a   :  { %992 = vmatpush1.msra.mxu0 %v447_v15  ;;  %1063 = vmatpush1.msra.mxu1 %v449_v16  ;;  %v452_v15 = vld [vmem:[%s7385_s1 + $0xd68] sm:$0xff]  ;;  %v454_v16 = vld [vmem:[%s7385_s1 + $0xd78] sm:$0xff] }
  0x4b   :  { %993 = vmatprep.subr.mxu0 %v416_v17  ;;  %1064 = vmatprep.subr.mxu1 %v418_v18  ;;  %v451_v17 = vld [vmem:[%s7385_s1 + $0xd60] sm:$0xff]  ;;  %v453_v18 = vld [vmem:[%s7385_s1 + $0xd70] sm:$0xff] }
  0x4c   :  { %994 = vmatpush1.msra.mxu0 %v415_v19  ;;  %1065 = vmatpush1.msra.mxu1 %v417_v20  ;;  %v420_v19 = vld [vmem:[%s7385_s1 + $0xc68] sm:$0xff]  ;;  %v422_v20 = vld [vmem:[%s7385_s1 + $0xc78] sm:$0xff] }
  0x4d   :  { %995 = vmatprep.subr.mxu0 %v384_v21  ;;  %1066 = vmatprep.subr.mxu1 %v386_v22  ;;  %v419_v21 = vld [vmem:[%s7385_s1 + $0xc60] sm:$0xff]  ;;  %v421_v22 = vld [vmem:[%s7385_s1 + $0xc70] sm:$0xff] }
  0x4e   :  { %996 = vmatpush1.msra.mxu0 %v383_v23  ;;  %1067 = vmatpush1.msra.mxu1 %v385_v24  ;;  %v388_v23 = vld [vmem:[%s7385_s1 + $0xb68] sm:$0xff]  ;;  %v390_v24 = vld [vmem:[%s7385_s1 + $0xb78] sm:$0xff] }
  0x4f   :  { %997 = vmatprep.subr.mxu0 %v352_v25  ;;  %1068 = vmatprep.subr.mxu1 %v354_v26  ;;  %v387_v25 = vld [vmem:[%s7385_s1 + $0xb60] sm:$0xff]  ;;  %v389_v26 = vld [vmem:[%s7385_s1 + $0xb70] sm:$0xff] }
  0x50   :  { %998 = vmatpush1.msra.mxu0 %v351_v27  ;;  %1069 = vmatpush1.msra.mxu1 %v353_v28  ;;  %v356_v27 = vld [vmem:[%s7385_s1 + $0xa68] sm:$0xff]  ;;  %v358_v28 = vld [vmem:[%s7385_s1 + $0xa78] sm:$0xff] }
  0x51   :  { %999 = vmatprep.subr.mxu0 %v320_v29  ;;  %1070 = vmatprep.subr.mxu1 %v322_v30  ;;  %v355_v29 = vld [vmem:[%s7385_s1 + $0xa60] sm:$0xff]  ;;  %v357_v30 = vld [vmem:[%s7385_s1 + $0xa70] sm:$0xff] }
  0x52   :  { %1000 = vmatpush1.msra.mxu0 %v319_v31  ;;  %1071 = vmatpush1.msra.mxu1 %v321_v32  ;;  %v324_v31 = vld [vmem:[%s7385_s1 + $0x968] sm:$0xff]  ;;  %v326_v32 = vld [vmem:[%s7385_s1 + $0x978] sm:$0xff] }
  0x53   :  { %1001 = vmatprep.subr.mxu0 %v288_v33  ;;  %1072 = vmatprep.subr.mxu1 %v290_v34  ;;  %v323_v33 = vld [vmem:[%s7385_s1 + $0x960] sm:$0xff]  ;;  %v325_v34 = vld [vmem:[%s7385_s1 + $0x970] sm:$0xff] }
  0x54   :  { %1002 = vmatpush1.msra.mxu0 %v287_v35  ;;  %1073 = vmatpush1.msra.mxu1 %v289_v36  ;;  %v292_v35 = vld [vmem:[%s7385_s1 + $0x868] sm:$0xff]  ;;  %v294_v36 = vld [vmem:[%s7385_s1 + $0x878] sm:$0xff] }
  0x55   :  { %1003 = vmatprep.subr.mxu0 %v256_v37  ;;  %1074 = vmatprep.subr.mxu1 %v258_v38  ;;  %v291_v37 = vld [vmem:[%s7385_s1 + $0x860] sm:$0xff]  ;;  %v293_v38 = vld [vmem:[%s7385_s1 + $0x870] sm:$0xff] }
  0x56   :  { %1004 = vmatpush1.msra.mxu0 %v255_v39  ;;  %1075 = vmatpush1.msra.mxu1 %v257_v40  ;;  %v260_v39 = vld [vmem:[%s7385_s1 + $0x768] sm:$0xff]  ;;  %v262_v40 = vld [vmem:[%s7385_s1 + $0x778] sm:$0xff] }
  0x57   :  { %1005 = vmatprep.subr.mxu0 %v224_v41  ;;  %1076 = vmatprep.subr.mxu1 %v226_v42  ;;  %v259_v41 = vld [vmem:[%s7385_s1 + $0x760] sm:$0xff]  ;;  %v261_v42 = vld [vmem:[%s7385_s1 + $0x770] sm:$0xff] }
  0x58   :  { %1006 = vmatpush1.msra.mxu0 %v223_v43  ;;  %1077 = vmatpush1.msra.mxu1 %v225_v44  ;;  %v228_v43 = vld [vmem:[%s7385_s1 + $0x668] sm:$0xff]  ;;  %v230_v44 = vld [vmem:[%s7385_s1 + $0x678] sm:$0xff] }
  0x59   :  { %1007 = vmatprep.subr.mxu0 %v192_v45  ;;  %1078 = vmatprep.subr.mxu1 %v194_v46  ;;  %v227_v45 = vld [vmem:[%s7385_s1 + $0x660] sm:$0xff]  ;;  %v229_v46 = vld [vmem:[%s7385_s1 + $0x670] sm:$0xff] }
  0x5a   :  { %1008 = vmatpush1.msra.mxu0 %v191_v47  ;;  %1079 = vmatpush1.msra.mxu1 %v193_v48  ;;  %v196_v47 = vld [vmem:[%s7385_s1 + $0x568] sm:$0xff]  ;;  %v198_v48 = vld [vmem:[%s7385_s1 + $0x578] sm:$0xff] }
  0x5b   :  { %1009 = vmatprep.subr.mxu0 %v160_v49  ;;  %1080 = vmatprep.subr.mxu1 %v162_v50  ;;  %v195_v49 = vld [vmem:[%s7385_s1 + $0x560] sm:$0xff]  ;;  %v197_v50 = vld [vmem:[%s7385_s1 + $0x570] sm:$0xff] }
  0x5c   :  { %1010 = vmatpush1.msra.mxu0 %v159_v51  ;;  %1081 = vmatpush1.msra.mxu1 %v161_v52  ;;  %v164_v51 = vld [vmem:[%s7385_s1 + $0x468] sm:$0xff]  ;;  %v166_v52 = vld [vmem:[%s7385_s1 + $0x478] sm:$0xff] }
  0x5d   :  { %1011 = vmatprep.subr.mxu0 %v128_v53  ;;  %1082 = vmatprep.subr.mxu1 %v130_v54  ;;  %v163_v53 = vld [vmem:[%s7385_s1 + $0x460] sm:$0xff]  ;;  %v165_v54 = vld [vmem:[%s7385_s1 + $0x470] sm:$0xff] }
  0x5e   :  { %1012 = vmatpush1.msra.mxu0 %v127_v55  ;;  %1083 = vmatpush1.msra.mxu1 %v129_v56  ;;  %v132_v55 = vld [vmem:[%s7385_s1 + $0x368] sm:$0xff]  ;;  %v134_v56 = vld [vmem:[%s7385_s1 + $0x378] sm:$0xff] }
  0x5f   :  { %1013 = vmatprep.subr.mxu0 %v96_v57  ;;  %1084 = vmatprep.subr.mxu1 %v98_v58  ;;  %v131_v57 = vld [vmem:[%s7385_s1 + $0x360] sm:$0xff]  ;;  %v133_v58 = vld [vmem:[%s7385_s1 + $0x370] sm:$0xff] }
  0x60   :  { %1014 = vmatpush1.msra.mxu0 %v95_v59  ;;  %1085 = vmatpush1.msra.mxu1 %v97_v60  ;;  %v100_v59 = vld [vmem:[%s7385_s1 + $0x268] sm:$0xff]  ;;  %v102_v60 = vld [vmem:[%s7385_s1 + $0x278] sm:$0xff] }
  0x61   :  { %1015 = vmatprep.subr.mxu0 %v64_v61  ;;  %1086 = vmatprep.subr.mxu1 %v66_v62  ;;  %v99_v61 = vld [vmem:[%s7385_s1 + $0x260] sm:$0xff]  ;;  %v101_v62 = vld [vmem:[%s7385_s1 + $0x270] sm:$0xff] }
  0x62   :  { %1016 = vmatpush1.msra.mxu0 %v63_v63  ;;  %1087 = vmatpush1.msra.mxu1 %v65_v0  ;;  %v68_v63 = vld [vmem:[%s7385_s1 + $0x168] sm:$0xff]  ;;  %v70_v0 = vld [vmem:[%s7385_s1 + $0x178] sm:$0xff] }
  0x63   :  { %1017 = vmatprep.subr.mxu0 %v32_v2  ;;  %1088 = vmatprep.subr.mxu1 %v34_v4  ;;  %v67_v2 = vld [vmem:[%s7385_s1 + $0x160] sm:$0xff]  ;;  %v69_v4 = vld [vmem:[%s7385_s1 + $0x170] sm:$0xff] }
  0x64   :  { %1018 = vmatpush1.msra.mxu0 %v31_v5  ;;  %1051 = vmatprep.mubr.f32.mxu0 %v4076_v3  ;;  %v36_v5 = vld [vmem:[%s7385_s1 + $0x68] sm:$0xff] }
  0x65   :  { %1089 = vmatpush1.msra.mxu1 %v33_v6  ;;  %1052 = vmatmul.mubr.f32.vlgmr.msra.gmra.mxu0 %v4304_v1  ;;  %v38_v6 = vld [vmem:[%s7385_s1 + $0x78] sm:$0xff] }
  0x66   :  { %1122 = vmatprep.mubr.f32.mxu1 %v4076_v3  ;;  %1129 = vmatprep.subr.mxu0 %v516_v7  ;;  %v35_v7 = vld [vmem:[%s7385_s1 + $0x60] sm:$0xff] }
  0x67   :  { %1200 = vmatprep.subr.mxu1 %v518_v8  ;;  %1123 = vmatmul.mubr.f32.vlgmr.msra.gmra.mxu1 %v4304_v1  ;;  %v37_v8 = vld [vmem:[%s7385_s1 + $0x70] sm:$0xff] }
  0x68   :  { %1130 = vmatpush1.msra.mxu0 %v515_v9  ;;  %1201 = vmatpush1.msra.mxu1 %v517_v10  ;;  %v520_v9 = vld [vmem:[%s7385_s1 + $0xf88] sm:$0xff]  ;;  %v522_v10 = vld [vmem:[%s7385_s1 + $0xf98] sm:$0xff] }
  0x69   :  { %1131 = vmatprep.subr.mxu0 %v484_v11  ;;  %1202 = vmatprep.subr.mxu1 %v486_v12  ;;  %v519_v11 = vld [vmem:[%s7385_s1 + $0xf80] sm:$0xff]  ;;  %v521_v12 = vld [vmem:[%s7385_s1 + $0xf90] sm:$0xff] }
  0x6a   :  { %1132 = vmatpush1.msra.mxu0 %v483_v13  ;;  %1203 = vmatpush1.msra.mxu1 %v485_v14  ;;  %v488_v13 = vld [vmem:[%s7385_s1 + $0xe88] sm:$0xff]  ;;  %v490_v14 = vld [vmem:[%s7385_s1 + $0xe98] sm:$0xff] }
  0x6b   :  { %1133 = vmatprep.subr.mxu0 %v452_v15  ;;  %1204 = vmatprep.subr.mxu1 %v454_v16  ;;  %v487_v15 = vld [vmem:[%s7385_s1 + $0xe80] sm:$0xff]  ;;  %v489_v16 = vld [vmem:[%s7385_s1 + $0xe90] sm:$0xff] }
  0x6c   :  { %1134 = vmatpush1.msra.mxu0 %v451_v17  ;;  %1205 = vmatpush1.msra.mxu1 %v453_v18  ;;  %v456_v17 = vld [vmem:[%s7385_s1 + $0xd88] sm:$0xff]  ;;  %v458_v18 = vld [vmem:[%s7385_s1 + $0xd98] sm:$0xff] }
  0x6d   :  { %1135 = vmatprep.subr.mxu0 %v420_v19  ;;  %1206 = vmatprep.subr.mxu1 %v422_v20  ;;  %v457_v19 = vld [vmem:[%s7385_s1 + $0xd90] sm:$0xff]  ;;  %v424_v20 = vld [vmem:[%s7385_s1 + $0xc88] sm:$0xff] }
  0x6e   :  { %1136 = vmatpush1.msra.mxu0 %v419_v21  ;;  %1207 = vmatpush1.msra.mxu1 %v421_v22  ;;  %v426_v21 = vld [vmem:[%s7385_s1 + $0xc98] sm:$0xff]  ;;  %v423_v22 = vld [vmem:[%s7385_s1 + $0xc80] sm:$0xff] }
  0x6f   :  { %1137 = vmatprep.subr.mxu0 %v388_v23  ;;  %1208 = vmatprep.subr.mxu1 %v390_v24  ;;  %v425_v23 = vld [vmem:[%s7385_s1 + $0xc90] sm:$0xff]  ;;  %v392_v24 = vld [vmem:[%s7385_s1 + $0xb88] sm:$0xff] }
  0x70   :  { %1138 = vmatpush1.msra.mxu0 %v387_v25  ;;  %1209 = vmatpush1.msra.mxu1 %v389_v26  ;;  %v394_v25 = vld [vmem:[%s7385_s1 + $0xb98] sm:$0xff]  ;;  %v391_v26 = vld [vmem:[%s7385_s1 + $0xb80] sm:$0xff] }
  0x71   :  { %1139 = vmatprep.subr.mxu0 %v356_v27  ;;  %1210 = vmatprep.subr.mxu1 %v358_v28  ;;  %v393_v27 = vld [vmem:[%s7385_s1 + $0xb90] sm:$0xff]  ;;  %v360_v28 = vld [vmem:[%s7385_s1 + $0xa88] sm:$0xff] }
  0x72   :  { %1140 = vmatpush1.msra.mxu0 %v355_v29  ;;  %1211 = vmatpush1.msra.mxu1 %v357_v30  ;;  %v362_v29 = vld [vmem:[%s7385_s1 + $0xa98] sm:$0xff]  ;;  %v359_v30 = vld [vmem:[%s7385_s1 + $0xa80] sm:$0xff] }
  0x73   :  { %1141 = vmatprep.subr.mxu0 %v324_v31  ;;  %1212 = vmatprep.subr.mxu1 %v326_v32  ;;  %v361_v31 = vld [vmem:[%s7385_s1 + $0xa90] sm:$0xff]  ;;  %v328_v32 = vld [vmem:[%s7385_s1 + $0x988] sm:$0xff] }
  0x74   :  { %1142 = vmatpush1.msra.mxu0 %v323_v33  ;;  %1213 = vmatpush1.msra.mxu1 %v325_v34  ;;  %v330_v33 = vld [vmem:[%s7385_s1 + $0x998] sm:$0xff]  ;;  %v327_v34 = vld [vmem:[%s7385_s1 + $0x980] sm:$0xff] }
  0x75   :  { %1143 = vmatprep.subr.mxu0 %v292_v35  ;;  %1214 = vmatprep.subr.mxu1 %v294_v36  ;;  %v329_v35 = vld [vmem:[%s7385_s1 + $0x990] sm:$0xff]  ;;  %v296_v36 = vld [vmem:[%s7385_s1 + $0x888] sm:$0xff] }
  0x76   :  { %1144 = vmatpush1.msra.mxu0 %v291_v37  ;;  %1215 = vmatpush1.msra.mxu1 %v293_v38  ;;  %v298_v37 = vld [vmem:[%s7385_s1 + $0x898] sm:$0xff]  ;;  %v295_v38 = vld [vmem:[%s7385_s1 + $0x880] sm:$0xff] }
  0x77   :  { %1145 = vmatprep.subr.mxu0 %v260_v39  ;;  %1216 = vmatprep.subr.mxu1 %v262_v40  ;;  %v297_v39 = vld [vmem:[%s7385_s1 + $0x890] sm:$0xff]  ;;  %v264_v40 = vld [vmem:[%s7385_s1 + $0x788] sm:$0xff] }
  0x78   :  { %1146 = vmatpush1.msra.mxu0 %v259_v41  ;;  %1217 = vmatpush1.msra.mxu1 %v261_v42  ;;  %v266_v41 = vld [vmem:[%s7385_s1 + $0x798] sm:$0xff]  ;;  %v263_v42 = vld [vmem:[%s7385_s1 + $0x780] sm:$0xff] }
  0x79   :  { %1147 = vmatprep.subr.mxu0 %v228_v43  ;;  %1218 = vmatprep.subr.mxu1 %v230_v44  ;;  %v265_v43 = vld [vmem:[%s7385_s1 + $0x790] sm:$0xff]  ;;  %v232_v44 = vld [vmem:[%s7385_s1 + $0x688] sm:$0xff] }
  0x7a   :  { %1148 = vmatpush1.msra.mxu0 %v227_v45  ;;  %1219 = vmatpush1.msra.mxu1 %v229_v46  ;;  %v234_v45 = vld [vmem:[%s7385_s1 + $0x698] sm:$0xff]  ;;  %v231_v46 = vld [vmem:[%s7385_s1 + $0x680] sm:$0xff] }
  0x7b   :  { %1149 = vmatprep.subr.mxu0 %v196_v47  ;;  %1220 = vmatprep.subr.mxu1 %v198_v48  ;;  %v233_v47 = vld [vmem:[%s7385_s1 + $0x690] sm:$0xff]  ;;  %v200_v48 = vld [vmem:[%s7385_s1 + $0x588] sm:$0xff] }
  0x7c   :  { %1150 = vmatpush1.msra.mxu0 %v195_v49  ;;  %1221 = vmatpush1.msra.mxu1 %v197_v50  ;;  %v202_v49 = vld [vmem:[%s7385_s1 + $0x598] sm:$0xff]  ;;  %v199_v50 = vld [vmem:[%s7385_s1 + $0x580] sm:$0xff] }
  0x7d   :  { %1151 = vmatprep.subr.mxu0 %v164_v51  ;;  %1222 = vmatprep.subr.mxu1 %v166_v52  ;;  %v201_v51 = vld [vmem:[%s7385_s1 + $0x590] sm:$0xff]  ;;  %v168_v52 = vld [vmem:[%s7385_s1 + $0x488] sm:$0xff] }
  0x7e   :  { %1152 = vmatpush1.msra.mxu0 %v163_v53  ;;  %1223 = vmatpush1.msra.mxu1 %v165_v54  ;;  %v170_v53 = vld [vmem:[%s7385_s1 + $0x498] sm:$0xff]  ;;  %v167_v54 = vld [vmem:[%s7385_s1 + $0x480] sm:$0xff] }
  0x7f   :  { %1153 = vmatprep.subr.mxu0 %v132_v55  ;;  %1224 = vmatprep.subr.mxu1 %v134_v56  ;;  %v169_v55 = vld [vmem:[%s7385_s1 + $0x490] sm:$0xff]  ;;  %v136_v56 = vld [vmem:[%s7385_s1 + $0x388] sm:$0xff] }
  0x80   :  { %1154 = vmatpush1.msra.mxu0 %v131_v57  ;;  %1225 = vmatpush1.msra.mxu1 %v133_v58  ;;  %v138_v57 = vld [vmem:[%s7385_s1 + $0x398] sm:$0xff]  ;;  %v135_v58 = vld [vmem:[%s7385_s1 + $0x380] sm:$0xff] }
  0x81   :  { %1155 = vmatprep.subr.mxu0 %v100_v59  ;;  %1226 = vmatprep.subr.mxu1 %v102_v60  ;;  %v137_v59 = vld [vmem:[%s7385_s1 + $0x390] sm:$0xff]  ;;  %v104_v60 = vld [vmem:[%s7385_s1 + $0x288] sm:$0xff] }
  0x82   :  { %1156 = vmatpush1.msra.mxu0 %v99_v61  ;;  %1227 = vmatpush1.msra.mxu1 %v101_v62  ;;  %v106_v61 = vld [vmem:[%s7385_s1 + $0x298] sm:$0xff]  ;;  %v103_v62 = vld [vmem:[%s7385_s1 + $0x280] sm:$0xff] }
  0x83   :  { %1157 = vmatprep.subr.mxu0 %v68_v63  ;;  %1228 = vmatprep.subr.mxu1 %v70_v0  ;;  %v105_v63 = vld [vmem:[%s7385_s1 + $0x290] sm:$0xff]  ;;  %v72_v0 = vld [vmem:[%s7385_s1 + $0x188] sm:$0xff] }
  0x84   :  { %1158 = vmatpush1.msra.mxu0 %v67_v2  ;;  %1229 = vmatpush1.msra.mxu1 %v69_v4  ;;  %v74_v2 = vld [vmem:[%s7385_s1 + $0x198] sm:$0xff]  ;;  %v71_v4 = vld [vmem:[%s7385_s1 + $0x180] sm:$0xff] }
  0x85   :  { %1159 = vmatprep.subr.mxu0 %v36_v5  ;;  %1230 = vmatprep.subr.mxu1 %v38_v6  ;;  %v73_v5 = vld [vmem:[%s7385_s1 + $0x190] sm:$0xff]  ;;  %v40_v6 = vld [vmem:[%s7385_s1 + $0x88] sm:$0xff] }
  0x86   :  { %1160 = vmatpush1.msra.mxu0 %v35_v7  ;;  %1193 = vmatprep.mubr.f32.mxu0 %v4076_v3  ;;  %v42_v7 = vld [vmem:[%s7385_s1 + $0x98] sm:$0xff] }
  0x87   :  { %1231 = vmatpush1.msra.mxu1 %v37_v8  ;;  %1194 = vmatmul.mubr.f32.vlgmr.msra.gmra.mxu0 %v4304_v1  ;;  %v39_v8 = vld [vmem:[%s7385_s1 + $0x80] sm:$0xff] }
  0x88   :  { %1264 = vmatprep.mubr.f32.mxu1 %v4076_v3  ;;  %1271 = vmatprep.subr.mxu0 %v520_v9  ;;  %v41_v9 = vld [vmem:[%s7385_s1 + $0x90] sm:$0xff] }
  0x89   :  { %1342 = vmatprep.subr.mxu1 %v522_v10  ;;  %1265 = vmatmul.mubr.f32.vlgmr.msra.gmra.mxu1 %v4304_v1  ;;  %v455_v1 = vld [vmem:[%s7385_s1 + $0xd80] sm:$0xff]  ;;  %v524_v10 = vld [vmem:[%s7385_s1 + $0xfa8] sm:$0xff] }
  0x8a   :  { %1272 = vmatpush1.msra.mxu0 %v519_v11  ;;  %1343 = vmatpush1.msra.mxu1 %v521_v12  ;;  %v526_v11 = vld [vmem:[%s7385_s1 + $0xfb8] sm:$0xff]  ;;  %v5098_v12 = vld [vmem:[%s7386_s0] sm:$0xff] }
  0x8b   :  { %1273 = vmatprep.subr.mxu0 %v488_v13  ;;  %1344 = vmatprep.subr.mxu1 %v490_v14  ;;  %v523_v13 = vld [vmem:[%s7385_s1 + $0xfa0] sm:$0xff]  ;;  %v525_v14 = vld [vmem:[%s7385_s1 + $0xfb0] sm:$0xff] }
  0x8c   :  { %1274 = vmatpush1.msra.mxu0 %v487_v15  ;;  %1345 = vmatpush1.msra.mxu1 %v489_v16  ;;  %v492_v15 = vld [vmem:[%s7385_s1 + $0xea8] sm:$0xff]  ;;  %v494_v16 = vld [vmem:[%s7385_s1 + $0xeb8] sm:$0xff] }
  0x8d   :  { %1275 = vmatprep.subr.mxu0 %v456_v17  ;;  %1346 = vmatprep.subr.mxu1 %v458_v18  ;;  %v491_v17 = vld [vmem:[%s7385_s1 + $0xea0] sm:$0xff]  ;;  %v493_v18 = vld [vmem:[%s7385_s1 + $0xeb0] sm:$0xff] }
  0x8e   :  { %1276 = vmatpush1.msra.mxu0 %v455_v1  ;;  %1347 = vmatpush1.msra.mxu1 %v457_v19  ;;  %v460_v1 = vld [vmem:[%s7385_s1 + $0xda8] sm:$0xff]  ;;  %v462_v19 = vld [vmem:[%s7385_s1 + $0xdb8] sm:$0xff] }
  0x8f   :  { %1277 = vmatprep.subr.mxu0 %v424_v20  ;;  %1348 = vmatprep.subr.mxu1 %v426_v21  ;;  %v459_v20 = vld [vmem:[%s7385_s1 + $0xda0] sm:$0xff]  ;;  %v461_v21 = vld [vmem:[%s7385_s1 + $0xdb0] sm:$0xff] }
  0x90   :  { %1278 = vmatpush1.msra.mxu0 %v423_v22  ;;  %1349 = vmatpush1.msra.mxu1 %v425_v23  ;;  %v428_v22 = vld [vmem:[%s7385_s1 + $0xca8] sm:$0xff]  ;;  %v430_v23 = vld [vmem:[%s7385_s1 + $0xcb8] sm:$0xff] }
  0x91   :  { %1279 = vmatprep.subr.mxu0 %v392_v24  ;;  %1350 = vmatprep.subr.mxu1 %v394_v25  ;;  %v427_v24 = vld [vmem:[%s7385_s1 + $0xca0] sm:$0xff]  ;;  %v429_v25 = vld [vmem:[%s7385_s1 + $0xcb0] sm:$0xff] }
  0x92   :  { %1280 = vmatpush1.msra.mxu0 %v391_v26  ;;  %1351 = vmatpush1.msra.mxu1 %v393_v27  ;;  %v396_v26 = vld [vmem:[%s7385_s1 + $0xba8] sm:$0xff]  ;;  %v398_v27 = vld [vmem:[%s7385_s1 + $0xbb8] sm:$0xff] }
  0x93   :  { %1281 = vmatprep.subr.mxu0 %v360_v28  ;;  %1352 = vmatprep.subr.mxu1 %v362_v29  ;;  %v395_v28 = vld [vmem:[%s7385_s1 + $0xba0] sm:$0xff]  ;;  %v397_v29 = vld [vmem:[%s7385_s1 + $0xbb0] sm:$0xff] }
  0x94   :  { %1282 = vmatpush1.msra.mxu0 %v359_v30  ;;  %1353 = vmatpush1.msra.mxu1 %v361_v31  ;;  %v364_v30 = vld [vmem:[%s7385_s1 + $0xaa8] sm:$0xff]  ;;  %v366_v31 = vld [vmem:[%s7385_s1 + $0xab8] sm:$0xff] }
  0x95   :  { %1283 = vmatprep.subr.mxu0 %v328_v32  ;;  %1354 = vmatprep.subr.mxu1 %v330_v33  ;;  %v363_v32 = vld [vmem:[%s7385_s1 + $0xaa0] sm:$0xff]  ;;  %v365_v33 = vld [vmem:[%s7385_s1 + $0xab0] sm:$0xff] }
  0x96   :  { %1284 = vmatpush1.msra.mxu0 %v327_v34  ;;  %1355 = vmatpush1.msra.mxu1 %v329_v35  ;;  %v332_v34 = vld [vmem:[%s7385_s1 + $0x9a8] sm:$0xff]  ;;  %v334_v35 = vld [vmem:[%s7385_s1 + $0x9b8] sm:$0xff] }
  0x97   :  { %1285 = vmatprep.subr.mxu0 %v296_v36  ;;  %1356 = vmatprep.subr.mxu1 %v298_v37  ;;  %v331_v36 = vld [vmem:[%s7385_s1 + $0x9a0] sm:$0xff]  ;;  %v333_v37 = vld [vmem:[%s7385_s1 + $0x9b0] sm:$0xff] }
  0x98   :  { %1286 = vmatpush1.msra.mxu0 %v295_v38  ;;  %1357 = vmatpush1.msra.mxu1 %v297_v39  ;;  %v300_v38 = vld [vmem:[%s7385_s1 + $0x8a8] sm:$0xff]  ;;  %v302_v39 = vld [vmem:[%s7385_s1 + $0x8b8] sm:$0xff] }
  0x99   :  { %1287 = vmatprep.subr.mxu0 %v264_v40  ;;  %1358 = vmatprep.subr.mxu1 %v266_v41  ;;  %v299_v40 = vld [vmem:[%s7385_s1 + $0x8a0] sm:$0xff]  ;;  %v301_v41 = vld [vmem:[%s7385_s1 + $0x8b0] sm:$0xff] }
  0x9a   :  { %1288 = vmatpush1.msra.mxu0 %v263_v42  ;;  %1359 = vmatpush1.msra.mxu1 %v265_v43  ;;  %v268_v42 = vld [vmem:[%s7385_s1 + $0x7a8] sm:$0xff]  ;;  %v270_v43 = vld [vmem:[%s7385_s1 + $0x7b8] sm:$0xff] }
  0x9b   :  { %1289 = vmatprep.subr.mxu0 %v232_v44  ;;  %1360 = vmatprep.subr.mxu1 %v234_v45  ;;  %v267_v44 = vld [vmem:[%s7385_s1 + $0x7a0] sm:$0xff]  ;;  %v269_v45 = vld [vmem:[%s7385_s1 + $0x7b0] sm:$0xff] }
  0x9c   :  { %1290 = vmatpush1.msra.mxu0 %v231_v46  ;;  %1361 = vmatpush1.msra.mxu1 %v233_v47  ;;  %v236_v46 = vld [vmem:[%s7385_s1 + $0x6a8] sm:$0xff]  ;;  %v238_v47 = vld [vmem:[%s7385_s1 + $0x6b8] sm:$0xff] }
  0x9d   :  { %1291 = vmatprep.subr.mxu0 %v200_v48  ;;  %1362 = vmatprep.subr.mxu1 %v202_v49  ;;  %v235_v48 = vld [vmem:[%s7385_s1 + $0x6a0] sm:$0xff]  ;;  %v237_v49 = vld [vmem:[%s7385_s1 + $0x6b0] sm:$0xff] }
  0x9e   :  { %1292 = vmatpush1.msra.mxu0 %v199_v50  ;;  %1363 = vmatpush1.msra.mxu1 %v201_v51  ;;  %v204_v50 = vld [vmem:[%s7385_s1 + $0x5a8] sm:$0xff]  ;;  %v206_v51 = vld [vmem:[%s7385_s1 + $0x5b8] sm:$0xff] }
  0x9f   :  { %1293 = vmatprep.subr.mxu0 %v168_v52  ;;  %1364 = vmatprep.subr.mxu1 %v170_v53  ;;  %v203_v52 = vld [vmem:[%s7385_s1 + $0x5a0] sm:$0xff]  ;;  %v205_v53 = vld [vmem:[%s7385_s1 + $0x5b0] sm:$0xff] }
  0xa0   :  { %1294 = vmatpush1.msra.mxu0 %v167_v54  ;;  %1365 = vmatpush1.msra.mxu1 %v169_v55  ;;  %v172_v54 = vld [vmem:[%s7385_s1 + $0x4a8] sm:$0xff]  ;;  %v174_v55 = vld [vmem:[%s7385_s1 + $0x4b8] sm:$0xff] }
  0xa1   :  { %1295 = vmatprep.subr.mxu0 %v136_v56  ;;  %1366 = vmatprep.subr.mxu1 %v138_v57  ;;  %v171_v56 = vld [vmem:[%s7385_s1 + $0x4a0] sm:$0xff]  ;;  %v173_v57 = vld [vmem:[%s7385_s1 + $0x4b0] sm:$0xff] }
  0xa2   :  { %1296 = vmatpush1.msra.mxu0 %v135_v58  ;;  %1367 = vmatpush1.msra.mxu1 %v137_v59  ;;  %v140_v58 = vld [vmem:[%s7385_s1 + $0x3a8] sm:$0xff]  ;;  %v142_v59 = vld [vmem:[%s7385_s1 + $0x3b8] sm:$0xff] }
  0xa3   :  { %1297 = vmatprep.subr.mxu0 %v104_v60  ;;  %1368 = vmatprep.subr.mxu1 %v106_v61  ;;  %v139_v60 = vld [vmem:[%s7385_s1 + $0x3a0] sm:$0xff]  ;;  %v141_v61 = vld [vmem:[%s7385_s1 + $0x3b0] sm:$0xff] }
  0xa4   :  { %1298 = vmatpush1.msra.mxu0 %v103_v62  ;;  %1369 = vmatpush1.msra.mxu1 %v105_v63  ;;  %v108_v62 = vld [vmem:[%s7385_s1 + $0x2a8] sm:$0xff]  ;;  %v110_v63 = vld [vmem:[%s7385_s1 + $0x2b8] sm:$0xff] }
  0xa5   :  { %1299 = vmatprep.subr.mxu0 %v72_v0  ;;  %1370 = vmatprep.subr.mxu1 %v74_v2  ;;  %v107_v0 = vld [vmem:[%s7385_s1 + $0x2a0] sm:$0xff]  ;;  %v109_v2 = vld [vmem:[%s7385_s1 + $0x2b0] sm:$0xff] }
  0xa6   :  { %1300 = vmatpush1.msra.mxu0 %v71_v4  ;;  %1371 = vmatpush1.msra.mxu1 %v73_v5  ;;  %v76_v4 = vld [vmem:[%s7385_s1 + $0x1a8] sm:$0xff]  ;;  %v78_v5 = vld [vmem:[%s7385_s1 + $0x1b8] sm:$0xff] }
  0xa7   :  { %1301 = vmatprep.subr.mxu0 %v40_v6  ;;  %1372 = vmatprep.subr.mxu1 %v42_v7  ;;  %v75_v6 = vld [vmem:[%s7385_s1 + $0x1a0] sm:$0xff]  ;;  %v77_v7 = vld [vmem:[%s7385_s1 + $0x1b0] sm:$0xff] }
  0xa8   :  { %1302 = vmatpush1.msra.mxu0 %v39_v8  ;;  %1335 = vmatprep.mubr.f32.mxu0 %v4076_v3  ;;  %v44_v8 = vld [vmem:[%s7385_s1 + $0xa8] sm:$0xff] }
  0xa9   :  { %1373 = vmatpush1.msra.mxu1 %v41_v9  ;;  %1336 = vmatmul.mubr.f32.vlgmr.msra.gmra.mxu0 %v5098_v12  ;;  %v46_v9 = vld [vmem:[%s7385_s1 + $0xb8] sm:$0xff] }
  0xaa   :  { %1406 = vmatprep.mubr.f32.mxu1 %v4076_v3  ;;  %1413 = vmatprep.subr.mxu0 %v524_v10  ;;  %v43_v10 = vld [vmem:[%s7385_s1 + $0xa0] sm:$0xff] }
  0xab   :  { %1484 = vmatprep.subr.mxu1 %v526_v11  ;;  %1407 = vmatmul.mubr.f32.vlgmr.msra.gmra.mxu1 %v5098_v12  ;;  %v45_v11 = vld [vmem:[%s7385_s1 + $0xb0] sm:$0xff] }
  0xac   :  { %1414 = vmatpush1.msra.mxu0 %v523_v13  ;;  %1485 = vmatpush1.msra.mxu1 %v525_v14  ;;  %v528_v13 = vld [vmem:[%s7385_s1 + $0xfc8] sm:$0xff]  ;;  %v530_v14 = vld [vmem:[%s7385_s1 + $0xfd8] sm:$0xff] }
  0xad   :  { %1415 = vmatprep.subr.mxu0 %v492_v15  ;;  %1486 = vmatprep.subr.mxu1 %v494_v16  ;;  %v527_v15 = vld [vmem:[%s7385_s1 + $0xfc0] sm:$0xff]  ;;  %v529_v16 = vld [vmem:[%s7385_s1 + $0xfd0] sm:$0xff] }
  0xae   :  { %1416 = vmatpush1.msra.mxu0 %v491_v17  ;;  %1487 = vmatpush1.msra.mxu1 %v493_v18  ;;  %v496_v17 = vld [vmem:[%s7385_s1 + $0xec8] sm:$0xff]  ;;  %v498_v18 = vld [vmem:[%s7385_s1 + $0xed8] sm:$0xff] }
  0xaf   :  { %1417 = vmatprep.subr.mxu0 %v460_v1  ;;  %1488 = vmatprep.subr.mxu1 %v462_v19  ;;  %v495_v1 = vld [vmem:[%s7385_s1 + $0xec0] sm:$0xff]  ;;  %v497_v19 = vld [vmem:[%s7385_s1 + $0xed0] sm:$0xff] }
  0xb0   :  { %1418 = vmatpush1.msra.mxu0 %v459_v20  ;;  %1489 = vmatpush1.msra.mxu1 %v461_v21  ;;  %v464_v20 = vld [vmem:[%s7385_s1 + $0xdc8] sm:$0xff]  ;;  %v466_v21 = vld [vmem:[%s7385_s1 + $0xdd8] sm:$0xff] }
  0xb1   :  { %1419 = vmatprep.subr.mxu0 %v428_v22  ;;  %1490 = vmatprep.subr.mxu1 %v430_v23  ;;  %v463_v22 = vld [vmem:[%s7385_s1 + $0xdc0] sm:$0xff]  ;;  %v465_v23 = vld [vmem:[%s7385_s1 + $0xdd0] sm:$0xff] }
  0xb2   :  { %1420 = vmatpush1.msra.mxu0 %v427_v24  ;;  %1491 = vmatpush1.msra.mxu1 %v429_v25  ;;  %v432_v24 = vld [vmem:[%s7385_s1 + $0xcc8] sm:$0xff]  ;;  %v434_v25 = vld [vmem:[%s7385_s1 + $0xcd8] sm:$0xff] }
  0xb3   :  { %1421 = vmatprep.subr.mxu0 %v396_v26  ;;  %1492 = vmatprep.subr.mxu1 %v398_v27  ;;  %v431_v26 = vld [vmem:[%s7385_s1 + $0xcc0] sm:$0xff]  ;;  %v433_v27 = vld [vmem:[%s7385_s1 + $0xcd0] sm:$0xff] }
  0xb4   :  { %1422 = vmatpush1.msra.mxu0 %v395_v28  ;;  %1493 = vmatpush1.msra.mxu1 %v397_v29  ;;  %v400_v28 = vld [vmem:[%s7385_s1 + $0xbc8] sm:$0xff]  ;;  %v402_v29 = vld [vmem:[%s7385_s1 + $0xbd8] sm:$0xff] }
  0xb5   :  { %1423 = vmatprep.subr.mxu0 %v364_v30  ;;  %1494 = vmatprep.subr.mxu1 %v366_v31  ;;  %v399_v30 = vld [vmem:[%s7385_s1 + $0xbc0] sm:$0xff]  ;;  %v401_v31 = vld [vmem:[%s7385_s1 + $0xbd0] sm:$0xff] }
  0xb6   :  { %1424 = vmatpush1.msra.mxu0 %v363_v32  ;;  %1495 = vmatpush1.msra.mxu1 %v365_v33  ;;  %v368_v32 = vld [vmem:[%s7385_s1 + $0xac8] sm:$0xff]  ;;  %v370_v33 = vld [vmem:[%s7385_s1 + $0xad8] sm:$0xff] }
  0xb7   :  { %1425 = vmatprep.subr.mxu0 %v332_v34  ;;  %1496 = vmatprep.subr.mxu1 %v334_v35  ;;  %v367_v34 = vld [vmem:[%s7385_s1 + $0xac0] sm:$0xff]  ;;  %v369_v35 = vld [vmem:[%s7385_s1 + $0xad0] sm:$0xff] }
  0xb8   :  { %1426 = vmatpush1.msra.mxu0 %v331_v36  ;;  %1497 = vmatpush1.msra.mxu1 %v333_v37  ;;  %v336_v36 = vld [vmem:[%s7385_s1 + $0x9c8] sm:$0xff]  ;;  %v338_v37 = vld [vmem:[%s7385_s1 + $0x9d8] sm:$0xff] }
  0xb9   :  { %1427 = vmatprep.subr.mxu0 %v300_v38  ;;  %1498 = vmatprep.subr.mxu1 %v302_v39  ;;  %v335_v38 = vld [vmem:[%s7385_s1 + $0x9c0] sm:$0xff]  ;;  %v337_v39 = vld [vmem:[%s7385_s1 + $0x9d0] sm:$0xff] }
  0xba   :  { %1428 = vmatpush1.msra.mxu0 %v299_v40  ;;  %1499 = vmatpush1.msra.mxu1 %v301_v41  ;;  %v304_v40 = vld [vmem:[%s7385_s1 + $0x8c8] sm:$0xff]  ;;  %v306_v41 = vld [vmem:[%s7385_s1 + $0x8d8] sm:$0xff] }
  0xbb   :  { %1429 = vmatprep.subr.mxu0 %v268_v42  ;;  %1500 = vmatprep.subr.mxu1 %v270_v43  ;;  %v303_v42 = vld [vmem:[%s7385_s1 + $0x8c0] sm:$0xff]  ;;  %v305_v43 = vld [vmem:[%s7385_s1 + $0x8d0] sm:$0xff] }
  0xbc   :  { %1430 = vmatpush1.msra.mxu0 %v267_v44  ;;  %1501 = vmatpush1.msra.mxu1 %v269_v45  ;;  %v272_v44 = vld [vmem:[%s7385_s1 + $0x7c8] sm:$0xff]  ;;  %v274_v45 = vld [vmem:[%s7385_s1 + $0x7d8] sm:$0xff] }
  0xbd   :  { %1431 = vmatprep.subr.mxu0 %v236_v46  ;;  %1502 = vmatprep.subr.mxu1 %v238_v47  ;;  %v271_v46 = vld [vmem:[%s7385_s1 + $0x7c0] sm:$0xff]  ;;  %v273_v47 = vld [vmem:[%s7385_s1 + $0x7d0] sm:$0xff] }
  0xbe   :  { %1432 = vmatpush1.msra.mxu0 %v235_v48  ;;  %1503 = vmatpush1.msra.mxu1 %v237_v49  ;;  %v240_v48 = vld [vmem:[%s7385_s1 + $0x6c8] sm:$0xff]  ;;  %v242_v49 = vld [vmem:[%s7385_s1 + $0x6d8] sm:$0xff] }
  0xbf   :  { %1433 = vmatprep.subr.mxu0 %v204_v50  ;;  %1504 = vmatprep.subr.mxu1 %v206_v51  ;;  %v239_v50 = vld [vmem:[%s7385_s1 + $0x6c0] sm:$0xff]  ;;  %v241_v51 = vld [vmem:[%s7385_s1 + $0x6d0] sm:$0xff] }
  0xc0   :  { %1434 = vmatpush1.msra.mxu0 %v203_v52  ;;  %1505 = vmatpush1.msra.mxu1 %v205_v53  ;;  %v208_v52 = vld [vmem:[%s7385_s1 + $0x5c8] sm:$0xff]  ;;  %v210_v53 = vld [vmem:[%s7385_s1 + $0x5d8] sm:$0xff] }
  0xc1   :  { %1435 = vmatprep.subr.mxu0 %v172_v54  ;;  %1506 = vmatprep.subr.mxu1 %v174_v55  ;;  %v207_v54 = vld [vmem:[%s7385_s1 + $0x5c0] sm:$0xff]  ;;  %v209_v55 = vld [vmem:[%s7385_s1 + $0x5d0] sm:$0xff] }
  0xc2   :  { %1436 = vmatpush1.msra.mxu0 %v171_v56  ;;  %1507 = vmatpush1.msra.mxu1 %v173_v57  ;;  %v176_v56 = vld [vmem:[%s7385_s1 + $0x4c8] sm:$0xff]  ;;  %v178_v57 = vld [vmem:[%s7385_s1 + $0x4d8] sm:$0xff] }
  0xc3   :  { %1437 = vmatprep.subr.mxu0 %v140_v58  ;;  %1508 = vmatprep.subr.mxu1 %v142_v59  ;;  %v175_v58 = vld [vmem:[%s7385_s1 + $0x4c0] sm:$0xff]  ;;  %v177_v59 = vld [vmem:[%s7385_s1 + $0x4d0] sm:$0xff] }
  0xc4   :  { %1438 = vmatpush1.msra.mxu0 %v139_v60  ;;  %1509 = vmatpush1.msra.mxu1 %v141_v61  ;;  %v144_v60 = vld [vmem:[%s7385_s1 + $0x3c8] sm:$0xff]  ;;  %v146_v61 = vld [vmem:[%s7385_s1 + $0x3d8] sm:$0xff] }
  0xc5   :  { %1439 = vmatprep.subr.mxu0 %v108_v62  ;;  %1510 = vmatprep.subr.mxu1 %v110_v63  ;;  %v143_v62 = vld [vmem:[%s7385_s1 + $0x3c0] sm:$0xff]  ;;  %v145_v63 = vld [vmem:[%s7385_s1 + $0x3d0] sm:$0xff] }
  0xc6   :  { %1440 = vmatpush1.msra.mxu0 %v107_v0  ;;  %1511 = vmatpush1.msra.mxu1 %v109_v2  ;;  %v112_v0 = vld [vmem:[%s7385_s1 + $0x2c8] sm:$0xff]  ;;  %v114_v2 = vld [vmem:[%s7385_s1 + $0x2d8] sm:$0xff] }
  0xc7   :  { %1441 = vmatprep.subr.mxu0 %v76_v4  ;;  %1512 = vmatprep.subr.mxu1 %v78_v5  ;;  %v111_v4 = vld [vmem:[%s7385_s1 + $0x2c0] sm:$0xff]  ;;  %v113_v5 = vld [vmem:[%s7385_s1 + $0x2d0] sm:$0xff] }
  0xc8   :  { %1442 = vmatpush1.msra.mxu0 %v75_v6  ;;  %1513 = vmatpush1.msra.mxu1 %v77_v7  ;;  %v80_v6 = vld [vmem:[%s7385_s1 + $0x1c8] sm:$0xff]  ;;  %v82_v7 = vld [vmem:[%s7385_s1 + $0x1d8] sm:$0xff] }
  0xc9   :  { %1443 = vmatprep.subr.mxu0 %v44_v8  ;;  %1514 = vmatprep.subr.mxu1 %v46_v9  ;;  %v79_v8 = vld [vmem:[%s7385_s1 + $0x1c0] sm:$0xff]  ;;  %v81_v9 = vld [vmem:[%s7385_s1 + $0x1d0] sm:$0xff] }
  0xca   :  { %1444 = vmatpush1.msra.mxu0 %v43_v10  ;;  %1477 = vmatprep.mubr.f32.mxu0 %v4076_v3  ;;  %v48_v10 = vld [vmem:[%s7385_s1 + $0xc8] sm:$0xff] }
  0xcb   :  { %1515 = vmatpush1.msra.mxu1 %v45_v11  ;;  %1478 = vmatmul.mubr.f32.vlgmr.msra.gmra.mxu0 %v5098_v12  ;;  %v50_v11 = vld [vmem:[%s7385_s1 + $0xd8] sm:$0xff] }
  0xcc   :  { %1548 = vmatprep.mubr.f32.mxu1 %v4076_v3  ;;  %1555 = vmatprep.subr.mxu0 %v528_v13  ;;  %v47_v13 = vld [vmem:[%s7385_s1 + $0xc0] sm:$0xff] }
  0xcd   :  { %1626 = vmatprep.subr.mxu1 %v530_v14  ;;  %1549 = vmatmul.mubr.f32.vlgmr.msra.gmra.mxu1 %v5098_v12  ;;  %v49_v14 = vld [vmem:[%s7385_s1 + $0xd0] sm:$0xff] }
  0xce   :  { %1556 = vmatpush1.msra.mxu0 %v527_v15  ;;  %1627 = vmatpush1.msra.mxu1 %v529_v16  ;;  %v532_v15 = vld [vmem:[%s7385_s1 + $0xfe8] sm:$0xff]  ;;  %v534_v16 = vld [vmem:[%s7385_s1 + $0xff8] sm:$0xff] }
  0xcf   :  { %1557 = vmatprep.subr.mxu0 %v496_v17  ;;  %1628 = vmatprep.subr.mxu1 %v498_v18  ;;  %v531_v17 = vld [vmem:[%s7385_s1 + $0xfe0] sm:$0xff]  ;;  %v533_v18 = vld [vmem:[%s7385_s1 + $0xff0] sm:$0xff] }
  0xd0   :  { %1558 = vmatpush1.msra.mxu0 %v495_v1  ;;  %1629 = vmatpush1.msra.mxu1 %v497_v19  ;;  %v500_v1 = vld [vmem:[%s7385_s1 + $0xee8] sm:$0xff]  ;;  %v502_v19 = vld [vmem:[%s7385_s1 + $0xef8] sm:$0xff] }
  0xd1   :  { %1559 = vmatprep.subr.mxu0 %v464_v20  ;;  %1630 = vmatprep.subr.mxu1 %v466_v21  ;;  %v499_v20 = vld [vmem:[%s7385_s1 + $0xee0] sm:$0xff]  ;;  %v501_v21 = vld [vmem:[%s7385_s1 + $0xef0] sm:$0xff] }
  0xd2   :  { %1560 = vmatpush1.msra.mxu0 %v463_v22  ;;  %1631 = vmatpush1.msra.mxu1 %v465_v23  ;;  %v468_v22 = vld [vmem:[%s7385_s1 + $0xde8] sm:$0xff]  ;;  %v470_v23 = vld [vmem:[%s7385_s1 + $0xdf8] sm:$0xff] }
  0xd3   :  { %1561 = vmatprep.subr.mxu0 %v432_v24  ;;  %1632 = vmatprep.subr.mxu1 %v434_v25  ;;  %v467_v24 = vld [vmem:[%s7385_s1 + $0xde0] sm:$0xff]  ;;  %v469_v25 = vld [vmem:[%s7385_s1 + $0xdf0] sm:$0xff] }
  0xd4   :  { %1562 = vmatpush1.msra.mxu0 %v431_v26  ;;  %1633 = vmatpush1.msra.mxu1 %v433_v27  ;;  %v436_v26 = vld [vmem:[%s7385_s1 + $0xce8] sm:$0xff]  ;;  %v438_v27 = vld [vmem:[%s7385_s1 + $0xcf8] sm:$0xff] }
  0xd5   :  { %1563 = vmatprep.subr.mxu0 %v400_v28  ;;  %1634 = vmatprep.subr.mxu1 %v402_v29  ;;  %v435_v28 = vld [vmem:[%s7385_s1 + $0xce0] sm:$0xff]  ;;  %v437_v29 = vld [vmem:[%s7385_s1 + $0xcf0] sm:$0xff] }
  0xd6   :  { %1564 = vmatpush1.msra.mxu0 %v399_v30  ;;  %1635 = vmatpush1.msra.mxu1 %v401_v31  ;;  %v404_v30 = vld [vmem:[%s7385_s1 + $0xbe8] sm:$0xff]  ;;  %v406_v31 = vld [vmem:[%s7385_s1 + $0xbf8] sm:$0xff] }
  0xd7   :  { %1565 = vmatprep.subr.mxu0 %v368_v32  ;;  %1636 = vmatprep.subr.mxu1 %v370_v33  ;;  %v403_v32 = vld [vmem:[%s7385_s1 + $0xbe0] sm:$0xff]  ;;  %v405_v33 = vld [vmem:[%s7385_s1 + $0xbf0] sm:$0xff] }
  0xd8   :  { %1566 = vmatpush1.msra.mxu0 %v367_v34  ;;  %1637 = vmatpush1.msra.mxu1 %v369_v35  ;;  %v372_v34 = vld [vmem:[%s7385_s1 + $0xae8] sm:$0xff]  ;;  %v374_v35 = vld [vmem:[%s7385_s1 + $0xaf8] sm:$0xff] }
  0xd9   :  { %1567 = vmatprep.subr.mxu0 %v336_v36  ;;  %1638 = vmatprep.subr.mxu1 %v338_v37  ;;  %v371_v36 = vld [vmem:[%s7385_s1 + $0xae0] sm:$0xff]  ;;  %v373_v37 = vld [vmem:[%s7385_s1 + $0xaf0] sm:$0xff] }
  0xda   :  { %1568 = vmatpush1.msra.mxu0 %v335_v38  ;;  %1639 = vmatpush1.msra.mxu1 %v337_v39  ;;  %v340_v38 = vld [vmem:[%s7385_s1 + $0x9e8] sm:$0xff]  ;;  %v342_v39 = vld [vmem:[%s7385_s1 + $0x9f8] sm:$0xff] }
  0xdb   :  { %1569 = vmatprep.subr.mxu0 %v304_v40  ;;  %1640 = vmatprep.subr.mxu1 %v306_v41  ;;  %v339_v40 = vld [vmem:[%s7385_s1 + $0x9e0] sm:$0xff]  ;;  %v341_v41 = vld [vmem:[%s7385_s1 + $0x9f0] sm:$0xff] }
  0xdc   :  { %1570 = vmatpush1.msra.mxu0 %v303_v42  ;;  %1641 = vmatpush1.msra.mxu1 %v305_v43  ;;  %v308_v42 = vld [vmem:[%s7385_s1 + $0x8e8] sm:$0xff]  ;;  %v310_v43 = vld [vmem:[%s7385_s1 + $0x8f8] sm:$0xff] }
  0xdd   :  { %1571 = vmatprep.subr.mxu0 %v272_v44  ;;  %1642 = vmatprep.subr.mxu1 %v274_v45  ;;  %v307_v44 = vld [vmem:[%s7385_s1 + $0x8e0] sm:$0xff]  ;;  %v309_v45 = vld [vmem:[%s7385_s1 + $0x8f0] sm:$0xff] }
  0xde   :  { %1572 = vmatpush1.msra.mxu0 %v271_v46  ;;  %1643 = vmatpush1.msra.mxu1 %v273_v47  ;;  %v543_v46 = vlaneseq  ;;  %v276_v47 = vld [vmem:[%s7385_s1 + $0x7e8] sm:$0xff] }
  0xdf   :  { %1573 = vmatprep.subr.mxu0 %v240_v48  ;;  %1644 = vmatprep.subr.mxu1 %v242_v49  ;;  %v278_v48 = vld [vmem:[%s7385_s1 + $0x7f8] sm:$0xff]  ;;  %v275_v49 = vld [vmem:[%s7385_s1 + $0x7e0] sm:$0xff] }
  0xe0   :  { %1574 = vmatpush1.msra.mxu0 %v239_v50  ;;  %1645 = vmatpush1.msra.mxu1 %v241_v51  ;;  %v277_v50 = vld [vmem:[%s7385_s1 + $0x7f0] sm:$0xff]  ;;  %v244_v51 = vld [vmem:[%s7385_s1 + $0x6e8] sm:$0xff] }
  0xe1   :  { %1575 = vmatprep.subr.mxu0 %v208_v52  ;;  %1646 = vmatprep.subr.mxu1 %v210_v53  ;;  %v246_v52 = vld [vmem:[%s7385_s1 + $0x6f8] sm:$0xff]  ;;  %v243_v53 = vld [vmem:[%s7385_s1 + $0x6e0] sm:$0xff] }
  0xe2   :  { %1576 = vmatpush1.msra.mxu0 %v207_v54  ;;  %1647 = vmatpush1.msra.mxu1 %v209_v55  ;;  %v245_v54 = vld [vmem:[%s7385_s1 + $0x6f0] sm:$0xff]  ;;  %v5609_v55 = vshrl.u32 %v543_v46, 7  ;;  %v1930_v46 = vld [vmem:[%s7388_s3 + $0x1d8] sm:$0xff] }
  0xe3   :  { %1577 = vmatprep.subr.mxu0 %v176_v56  ;;  %1648 = vmatprep.subr.mxu1 %v178_v57  ;;  %v212_v56 = vld [vmem:[%s7385_s1 + $0x5e8] sm:$0xff]  ;;  %v214_v57 = vld [vmem:[%s7385_s1 + $0x5f8] sm:$0xff] }
  0xe4   :  { %1578 = vmatpush1.msra.mxu0 %v175_v58  ;;  %1649 = vmatpush1.msra.mxu1 %v177_v59  ;;  %v211_v58 = vld [vmem:[%s7385_s1 + $0x5e0] sm:$0xff]  ;;  %v213_v59 = vld [vmem:[%s7385_s1 + $0x5f0] sm:$0xff] }
  0xe5   :  { %1579 = vmatprep.subr.mxu0 %v144_v60  ;;  %1650 = vmatprep.subr.mxu1 %v146_v61  ;;  %v180_v60 = vld [vmem:[%s7385_s1 + $0x4e8] sm:$0xff]  ;;  %v182_v61 = vld [vmem:[%s7385_s1 + $0x4f8] sm:$0xff] }
  0xe6   :  { %1580 = vmatpush1.msra.mxu0 %v143_v62  ;;  %1651 = vmatpush1.msra.mxu1 %v145_v63  ;;  %v179_v62 = vld [vmem:[%s7385_s1 + $0x4e0] sm:$0xff]  ;;  %v181_v63 = vld [vmem:[%s7385_s1 + $0x4f0] sm:$0xff] }
  0xe7   :  { %1581 = vmatprep.subr.mxu0 %v112_v0  ;;  %1652 = vmatprep.subr.mxu1 %v114_v2  ;;  %v5636_v0 = vsub.s32 1, %v5609_v55  ;;  %v148_v2 = vld [vmem:[%s7385_s1 + $0x3e8] sm:$0xff] }
  0xe8   :  { %1582 = vmatpush1.msra.mxu0 %v111_v4  ;;  %1653 = vmatpush1.msra.mxu1 %v113_v5  ;;  %v150_v4 = vld [vmem:[%s7385_s1 + $0x3f8] sm:$0xff]  ;;  %v5647_v5 = vld [vmem:[%s7387_s2] sm:$0xff] }
  0xe9   :  { %1583 = vmatprep.subr.mxu0 %v80_v6  ;;  %1654 = vmatprep.subr.mxu1 %v82_v7  ;;  %v5649_v6 = vpop.f32.mrf.mxu0  ;;  %v5652_v7 = vsub.s32 3, %v5609_v55 }
  0xea   :  { %1584 = vmatpush1.msra.mxu0 %v79_v8  ;;  %1655 = vmatpush1.msra.mxu1 %v81_v9  ;;  %v147_v8 = vld [vmem:[%s7385_s1 + $0x3e0] sm:$0xff]  ;;  %v149_v9 = vld [vmem:[%s7385_s1 + $0x3f0] sm:$0xff] }
  0xeb   :  { %1585 = vmatprep.subr.mxu0 %v48_v10  ;;  %1656 = vmatprep.subr.mxu1 %v50_v11  ;;  %v5660_v10 = vpop.f32.mrf.mxu1  ;;  %v116_v11 = vld [vmem:[%s7385_s1 + $0x2e8] sm:$0xff] }
  0xec   :  { %1586 = vmatpush1.msra.mxu0 %v47_v13  ;;  %1619 = vmatprep.mubr.f32.mxu0 %v4076_v3  ;;  %v118_v13 = vld [vmem:[%s7385_s1 + $0x2f8] sm:$0xff] }
  0xed   :  { %1657 = vmatpush1.msra.mxu1 %v49_v14  ;;  %1620 = vmatmul.mubr.f32.vlgmr.msra.gmra.mxu0 %v5098_v12  ;;  %v115_v14 = vld [vmem:[%s7385_s1 + $0x2e0] sm:$0xff] }
  0xee   :  { %1690 = vmatprep.mubr.f32.mxu1 %v4076_v3  ;;  %1697 = vmatprep.subr.mxu0 %v532_v15  ;;  %v117_v15 = vld [vmem:[%s7385_s1 + $0x2f0] sm:$0xff] }
  0xef   :  { %1768 = vmatprep.subr.mxu1 %v534_v16  ;;  %1691 = vmatmul.mubr.f32.vlgmr.msra.gmra.mxu1 %v5098_v12  ;;  %v550_v16 = vrot.slane %v5647_v5, %v5636_v0 }
  0xf0   :  { %1698 = vmatpush1.msra.mxu0 %v531_v17  ;;  %1769 = vmatpush1.msra.mxu1 %v533_v18  ;;  %v84_v17 = vld [vmem:[%s7385_s1 + $0x1e8] sm:$0xff]  ;;  %v86_v18 = vld [vmem:[%s7385_s1 + $0x1f8] sm:$0xff] }
  0xf1   :  { %1699 = vmatprep.subr.mxu0 %v500_v1  ;;  %1770 = vmatprep.subr.mxu1 %v502_v19  ;;  %v771_v1 = vpop.f32.mrf.mxu0  ;;  %v558_v19 = vrot.slane %v5647_v5, %v5652_v7 }
  0xf2   :  { %1700 = vmatpush1.msra.mxu0 %v499_v20  ;;  %1771 = vmatpush1.msra.mxu1 %v501_v21  ;;  %v83_v20 = vld [vmem:[%s7385_s1 + $0x1e0] sm:$0xff]  ;;  %v85_v21 = vld [vmem:[%s7385_s1 + $0x1f0] sm:$0xff] }
  0xf3   :  { %1701 = vmatprep.subr.mxu0 %v468_v22  ;;  %1772 = vmatprep.subr.mxu1 %v470_v23  ;;  %v842_v22 = vpop.f32.mrf.mxu1  ;;  %v52_v23 = vld [vmem:[%s7385_s1 + $0xe8] sm:$0xff] }
  0xf4   :  { %1702 = vmatpush1.msra.mxu0 %v467_v24  ;;  %1773 = vmatpush1.msra.mxu1 %v469_v25  ;;  %v54_v24 = vld [vmem:[%s7385_s1 + $0xf8] sm:$0xff]  ;;  %v51_v25 = vld [vmem:[%s7385_s1 + $0xe0] sm:$0xff] }
  0xf5   :  { %1703 = vmatprep.subr.mxu0 %v436_v26  ;;  %1774 = vmatprep.subr.mxu1 %v438_v27  ;;  %v772_v26 = vadd.f32 %v771_v1, %v550_v16  ;;  %v53_v27 = vld [vmem:[%s7385_s1 + $0xf0] sm:$0xff]  ;;  %v5833_v16 = vsub.s32 0, %v5609_v55  ;;  %v1908_v1 = vld [vmem:[%s7388_s3 + $0x128] sm:$0xff] }
  0xf6   :  { %1704 = vmatpush1.msra.mxu0 %v435_v28  ;;  %1775 = vmatpush1.msra.mxu1 %v437_v29  ;;  %v843_v28 = vadd.f32 %v842_v22, %v558_v19  ;;  %v1902_v29 = vld [vmem:[%s7388_s3 + $0xf8] sm:$0xff]  ;;  %v1891_v19 = vld [vmem:[%s7388_s3 + $0xa0] sm:$0xff] }
  0xf7   :  { %1705 = vmatprep.subr.mxu0 %v404_v30  ;;  %1776 = vmatprep.subr.mxu1 %v406_v31  ;;  %v1934_v30 = vld [vmem:[%s7388_s3 + $0x1f8] sm:$0xff]  ;;  %v1875_v22 = vld [vmem:[%s7388_s3 + $0x20] sm:$0xff] }
  0xf8   :  { %1706 = vmatpush1.msra.mxu0 %v403_v32  ;;  %1777 = vmatpush1.msra.mxu1 %v405_v33  ;;  %v1886_v31 = vld [vmem:[%s7388_s3 + $0x78] sm:$0xff]  ;;  %v1840_v32 = vmax.f32 %v772_v26, 0.0 }
  0xf9   :  { %1707 = vmatprep.subr.mxu0 %v372_v34  ;;  %1778 = vmatprep.subr.mxu1 %v374_v35  ;;  %v1918_v33 = vld [vmem:[%s7388_s3 + $0x178] sm:$0xff]  ;;  %v1842_v34 = vmax.f32 %v843_v28, 0.0  ;;  %v1933_v35 = vld [vmem:[%s7388_s3 + $0x1f0] sm:$0xff]  ;;  %v546_v28 = vrot.slane %v5647_v5, %v5833_v16 }
  0xfa   :  { %1708 = vmatpush1.msra.mxu0 %v371_v36  ;;  %1779 = vmatpush1.msra.mxu1 %v373_v37  ;;  %v1917_v36 = vld [vmem:[%s7388_s3 + $0x170] sm:$0xff]  ;;  %v1900_v37 = vld [vmem:[%s7388_s3 + $0xe8] sm:$0xff]  ;;  %v1890_v26 = vld [vmem:[%s7388_s3 + $0x98] sm:$0xff] }
  0xfb   :  { %1709 = vmatprep.subr.mxu0 %v340_v38  ;;  %1780 = vmatprep.subr.mxu1 %v342_v39  ;;  %v1932_v38 = vld [vmem:[%s7388_s3 + $0x1e8] sm:$0xff] }
  0xfc   :  { %1710 = vmatpush1.msra.mxu0 %v339_v40  ;;  %1781 = vmatpush1.msra.mxu1 %v341_v41  ;;  %v1884_v39 = vld [vmem:[%s7388_s3 + $0x68] sm:$0xff]  ;;  %v1899_v41 = vld [vmem:[%s7388_s3 + $0xe0] sm:$0xff] }
  0xfd   :  { %1711 = vmatprep.subr.mxu0 %v308_v42  ;;  %1782 = vmatprep.subr.mxu1 %v310_v43  ;;  %v1916_v40 = vld [vmem:[%s7388_s3 + $0x168] sm:$0xff]  ;;  %v1931_v42 = vld [vmem:[%s7388_s3 + $0x1e0] sm:$0xff] }
  0xfe   :  { %1712 = vmatpush1.msra.mxu0 %v307_v44  ;;  %1783 = vmatpush1.msra.mxu1 %v309_v45  ;;  %v1883_v43 = vld [vmem:[%s7388_s3 + $0x60] sm:$0xff]  ;;  %v1898_v45 = vld [vmem:[%s7388_s3 + $0xd8] sm:$0xff] }
  0xff   :  { %1713 = vmatprep.subr.mxu0 %v276_v47  ;;  %1784 = vmatprep.subr.mxu1 %v278_v48  ;;  %v1915_v44 = vld [vmem:[%s7388_s3 + $0x160] sm:$0xff]  ;;  %v1882_v47 = vld [vmem:[%s7388_s3 + $0x58] sm:$0xff] }
 0x100   :  { %1714 = vmatpush1.msra.mxu0 %v275_v49  ;;  %1785 = vmatpush1.msra.mxu1 %v277_v50  ;;  %v1914_v48 = vld [vmem:[%s7388_s3 + $0x158] sm:$0xff]  ;;  %v1897_v49 = vld [vmem:[%s7388_s3 + $0xd0] sm:$0xff] }
 0x101   :  { %1715 = vmatprep.subr.mxu0 %v244_v51  ;;  %1786 = vmatprep.subr.mxu1 %v246_v52  ;;  %v1929_v50 = vld [vmem:[%s7388_s3 + $0x1d0] sm:$0xff] }
 0x102   :  { %1716 = vmatpush1.msra.mxu0 %v243_v53  ;;  %1787 = vmatpush1.msra.mxu1 %v245_v54  ;;  %v1881_v51 = vld [vmem:[%s7388_s3 + $0x50] sm:$0xff]  ;;  %v1896_v53 = vld [vmem:[%s7388_s3 + $0xc8] sm:$0xff] }
 0x103   :  { %1717 = vmatprep.subr.mxu0 %v212_v56  ;;  %1788 = vmatprep.subr.mxu1 %v214_v57  ;;  %v1913_v52 = vld [vmem:[%s7388_s3 + $0x150] sm:$0xff]  ;;  %v1928_v54 = vld [vmem:[%s7388_s3 + $0x1c8] sm:$0xff] }
 0x104   :  { %1718 = vmatpush1.msra.mxu0 %v211_v58  ;;  %1789 = vmatpush1.msra.mxu1 %v213_v59  ;;  %v1880_v56 = vld [vmem:[%s7388_s3 + $0x48] sm:$0xff]  ;;  %v1895_v58 = vld [vmem:[%s7388_s3 + $0xc0] sm:$0xff] }
 0x105   :  { %1719 = vmatprep.subr.mxu0 %v180_v60  ;;  %1790 = vmatprep.subr.mxu1 %v182_v61  ;;  %v1912_v57 = vld [vmem:[%s7388_s3 + $0x148] sm:$0xff]  ;;  %v1927_v59 = vld [vmem:[%s7388_s3 + $0x1c0] sm:$0xff] }
 0x106   :  { %1720 = vmatpush1.msra.mxu0 %v179_v62  ;;  %1791 = vmatpush1.msra.mxu1 %v181_v63  ;;  %v1879_v60 = vld [vmem:[%s7388_s3 + $0x40] sm:$0xff]  ;;  %v1894_v62 = vld [vmem:[%s7388_s3 + $0xb8] sm:$0xff] }
 0x107   :  { %1721 = vmatprep.subr.mxu0 %v148_v2  ;;  %1792 = vmatprep.subr.mxu1 %v150_v4  ;;  %v1911_v61 = vld [vmem:[%s7388_s3 + $0x140] sm:$0xff]  ;;  %v1926_v63 = vld [vmem:[%s7388_s3 + $0x1b8] sm:$0xff] }
 0x108   :  { %1722 = vmatpush1.msra.mxu0 %v147_v8  ;;  %1793 = vmatpush1.msra.mxu1 %v149_v9  ;;  %v1878_v2 = vld [vmem:[%s7388_s3 + $0x38] sm:$0xff]  ;;  %v1893_v8 = vld [vmem:[%s7388_s3 + $0xb0] sm:$0xff] }
 0x109   :  { %1723 = vmatprep.subr.mxu0 %v116_v11  ;;  %1794 = vmatprep.subr.mxu1 %v118_v13  ;;  %v1910_v4 = vld [vmem:[%s7388_s3 + $0x138] sm:$0xff]  ;;  %v1925_v9 = vld [vmem:[%s7388_s3 + $0x1b0] sm:$0xff] }
 0x10a   :  { %1724 = vmatpush1.msra.mxu0 %v115_v14  ;;  %1795 = vmatpush1.msra.mxu1 %v117_v15  ;;  %v1877_v11 = vld [vmem:[%s7388_s3 + $0x30] sm:$0xff]  ;;  %v1892_v14 = vld [vmem:[%s7388_s3 + $0xa8] sm:$0xff] }
 0x10b   :  { %1725 = vmatprep.subr.mxu0 %v84_v17  ;;  %1796 = vmatprep.subr.mxu1 %v86_v18  ;;  %v1909_v13 = vld [vmem:[%s7388_s3 + $0x130] sm:$0xff]  ;;  %v1924_v15 = vld [vmem:[%s7388_s3 + $0x1a8] sm:$0xff]  ;;  %v5836_v17 = vsub.s32 2, %v5609_v55 }
 0x10c   :  { %1726 = vmatpush1.msra.mxu0 %v83_v20  ;;  %1797 = vmatpush1.msra.mxu1 %v85_v21  ;;  %v1876_v18 = vld [vmem:[%s7388_s3 + $0x28] sm:$0xff]  ;;  %v1923_v20 = vld [vmem:[%s7388_s3 + $0x1a0] sm:$0xff]  ;;  %v5851_v21 = vsub.s32 5, %v5609_v55 }
 0x10d   :  { %1727 = vmatprep.subr.mxu0 %v52_v23  ;;  %1798 = vmatprep.subr.mxu1 %v54_v24  ;;  %v1907_v23 = vld [vmem:[%s7388_s3 + $0x120] sm:$0xff]  ;;  %v5859_v24 = vpop.f32.mrf.mxu0 }
 0x10e   :  { %1728 = vmatpush1.msra.mxu0 %v51_v25  ;;  %1761 = vmatprep.mubr.f32.mxu0 %v4076_v3  ;;  %v5862_v25 = vsub.s32 7, %v5609_v55 }
 0x10f   :  { %1799 = vmatpush1.msra.mxu1 %v53_v27  ;;  %1832 = vmatprep.mubr.f32.mxu1 %v4076_v3  ;;  %v1901_v3 = vld [vmem:[%s7388_s3 + $0xf0] sm:$0xff]  ;;  %v1922_v27 = vld [vmem:[%s7388_s3 + $0x198] sm:$0xff] }
 0x110   :  { %1762 = vmatmul.mubr.f32.vlgmr.msra.gmra.mxu0 %v5098_v12  ;;  %1833 = vmatmul.mubr.f32.vlgmr.msra.gmra.mxu1 %v5098_v12  ;;  %v1885_v12 = vld [vmem:[%s7388_s3 + $0x70] sm:$0xff] }
 0x111   :  { %3512 = vmatprep.subr.mxu0 %v1902_v29  ;;  %3547 = vmatprep.subr.mxu1 %v1934_v30  ;;  %v554_v29 = vrot.slane %v5647_v5, %v5836_v17  ;;  %v5874_v30 = vpop.f32.mrf.mxu1 }
 0x112   :  { %3513 = vmatpush3.msra.mxu0 %v1886_v31  ;;  %2450 = vmatprep.mubr.f32.mxu0 %v1840_v32  ;;  %v1874_v31 = vld [vmem:[%s7388_s3 + $0x18] sm:$0xff] }
 0x113   :  { %3548 = vmatpush3.msra.mxu1 %v1918_v33  ;;  %2520 = vmatprep.mubr.f32.mxu1 %v1842_v34  ;;  %v1906_v32 = vld [vmem:[%s7388_s3 + $0x118] sm:$0xff]  ;;  %v1889_v33 = vld [vmem:[%s7388_s3 + $0x90] sm:$0xff] }
 0x114   :  { %3514 = vmatprep.subr.mxu0 %v1901_v3  ;;  %3549 = vmatprep.subr.mxu1 %v1933_v35  ;;  %v1921_v34 = vld [vmem:[%s7388_s3 + $0x190] sm:$0xff]  ;;  %v566_v3 = vrot.slane %v5647_v5, %v5851_v21 }
 0x115   :  { %3515 = vmatpush3.msra.mxu0 %v1885_v12  ;;  %3550 = vmatpush3.msra.mxu1 %v1917_v36  ;;  %v1873_v35 = vld [vmem:[%s7388_s3 + $0x10] sm:$0xff]  ;;  %v913_v36 = vpop.f32.mrf.mxu0 }
 0x116   :  { %3516 = vmatprep.subr.mxu0 %v1900_v37  ;;  %3551 = vmatprep.subr.mxu1 %v1932_v38  ;;  %v1905_v12 = vld [vmem:[%s7388_s3 + $0x110] sm:$0xff]  ;;  %v574_v37 = vrot.slane %v5647_v5, %v5862_v25  ;;  %v1888_v38 = vld [vmem:[%s7388_s3 + $0x88] sm:$0xff] }
 0x117   :  { %3517 = vmatpush3.msra.mxu0 %v1884_v39  ;;  %3552 = vmatpush3.msra.mxu1 %v1916_v40  ;;  %v1920_v39 = vld [vmem:[%s7388_s3 + $0x188] sm:$0xff]  ;;  %v770_v40 = vadd.f32 %v5649_v6, %v546_v28  ;;  %v1919_v6 = vld [vmem:[%s7388_s3 + $0x180] sm:$0xff] }
 0x118   :  { %3518 = vmatprep.subr.mxu0 %v1899_v41  ;;  %3553 = vmatprep.subr.mxu1 %v1931_v42  ;;  %v841_v41 = vadd.f32 %v5660_v10, %v554_v29  ;;  %v984_v42 = vpop.f32.mrf.mxu1  ;;  %v914_v10 = vadd.f32 %v913_v36, %v566_v3  ;;  %v1944_v28 = vld [vmem:[%s7388_s3 + $0x248] sm:$0xff]  ;;  %v1958_v3 = vld [vmem:[%s7388_s3 + $0x2b8] sm:$0xff] }
 0x119   :  { %3519 = vmatpush3.msra.mxu0 %v1883_v43  ;;  %3554 = vmatpush3.msra.mxu1 %v1915_v44  ;;  %v1872_v43 = vld [vmem:[%s7388_s3 + $0x8] sm:$0xff]  ;;  %v1974_v36 = vld [vmem:[%s7388_s3 + $0x338] sm:$0xff] }
 0x11a   :  { %3520 = vmatprep.subr.mxu0 %v1898_v45  ;;  %3555 = vmatprep.subr.mxu1 %v1930_v46  ;;  %v1904_v44 = vld [vmem:[%s7388_s3 + $0x108] sm:$0xff]  ;;  %v1887_v45 = vld [vmem:[%s7388_s3 + $0x80] sm:$0xff] }
 0x11b   :  { %3521 = vmatpush3.msra.mxu0 %v1882_v47  ;;  %3556 = vmatpush3.msra.mxu1 %v1914_v48  ;;  %v1871_v46 = vld [vmem:[%s7388_s3] sm:$0xff]  ;;  %v985_v48 = vadd.f32 %v984_v42, %v574_v37  ;;  %v1976_v29 = vld [vmem:[%s7388_s3 + $0x348] sm:$0xff]  ;;  %v1957_v37 = vld [vmem:[%s7388_s3 + $0x2b0] sm:$0xff] }
 0x11c   :  { %3522 = vmatprep.subr.mxu0 %v1897_v49  ;;  %3557 = vmatprep.subr.mxu1 %v1929_v50  ;;  %v1903_v47 = vld [vmem:[%s7388_s3 + $0x100] sm:$0xff]  ;;  %v1839_v49 = vmax.f32 %v770_v40, 0.0  ;;  %v1841_v50 = vmax.f32 %v841_v41, 0.0  ;;  %v1973_v40 = vld [vmem:[%s7388_s3 + $0x330] sm:$0xff]  ;;  %v1956_v41 = vld [vmem:[%s7388_s3 + $0x2a8] sm:$0xff] }
 0x11d   :  { %3523 = vmatpush3.msra.mxu0 %v1881_v51  ;;  %3558 = vmatpush3.msra.mxu1 %v1913_v52  ;;  %v1966_v51 = vld [vmem:[%s7388_s3 + $0x2f8] sm:$0xff]  ;;  %v1988_v42 = vld [vmem:[%s7388_s3 + $0x3a8] sm:$0xff] }
 0x11e   :  { %3524 = vmatprep.subr.mxu0 %v1896_v53  ;;  %3559 = vmatprep.subr.mxu1 %v1928_v54  ;;  %v1998_v52 = vld [vmem:[%s7388_s3 + $0x3f8] sm:$0xff]  ;;  %v1844_v54 = vmax.f32 %v914_v10, 0.0  ;;  %v1972_v10 = vld [vmem:[%s7388_s3 + $0x328] sm:$0xff] }
 0x11f   :  { %3525 = vmatpush3.msra.mxu0 %v1880_v56  ;;  %3560 = vmatpush3.msra.mxu1 %v1912_v57  ;;  %v1950_v53 = vld [vmem:[%s7388_s3 + $0x278] sm:$0xff]  ;;  %v1846_v57 = vmax.f32 %v985_v48, 0.0  ;;  %v1971_v48 = vld [vmem:[%s7388_s3 + $0x320] sm:$0xff] }
 0x120   :  { %3526 = vmatprep.subr.mxu0 %v1895_v58  ;;  %3561 = vmatprep.subr.mxu1 %v1927_v59  ;;  %v1982_v56 = vld [vmem:[%s7388_s3 + $0x378] sm:$0xff]  ;;  %v1965_v58 = vld [vmem:[%s7388_s3 + $0x2f0] sm:$0xff] }
 0x121   :  { %3527 = vmatpush3.msra.mxu0 %v1879_v60  ;;  %3562 = vmatpush3.msra.mxu1 %v1911_v61  ;;  %v1997_v59 = vld [vmem:[%s7388_s3 + $0x3f0] sm:$0xff] }
 0x122   :  { %3528 = vmatprep.subr.mxu0 %v1894_v62  ;;  %3563 = vmatprep.subr.mxu1 %v1926_v63  ;;  %v1949_v60 = vld [vmem:[%s7388_s3 + $0x270] sm:$0xff]  ;;  %v1964_v62 = vld [vmem:[%s7388_s3 + $0x2e8] sm:$0xff] }
 0x123   :  { %3529 = vmatpush3.msra.mxu0 %v1878_v2  ;;  %3564 = vmatpush3.msra.mxu1 %v1910_v4  ;;  %v1981_v61 = vld [vmem:[%s7388_s3 + $0x370] sm:$0xff]  ;;  %v1996_v63 = vld [vmem:[%s7388_s3 + $0x3e8] sm:$0xff] }
 0x124   :  { %3530 = vmatprep.subr.mxu0 %v1893_v8  ;;  %3565 = vmatprep.subr.mxu1 %v1925_v9  ;;  %v1948_v2 = vld [vmem:[%s7388_s3 + $0x268] sm:$0xff]  ;;  %v1963_v8 = vld [vmem:[%s7388_s3 + $0x2e0] sm:$0xff] }
 0x125   :  { %3531 = vmatpush3.msra.mxu0 %v1877_v11  ;;  %3566 = vmatpush3.msra.mxu1 %v1909_v13  ;;  %v1980_v4 = vld [vmem:[%s7388_s3 + $0x368] sm:$0xff]  ;;  %v1995_v9 = vld [vmem:[%s7388_s3 + $0x3e0] sm:$0xff] }
 0x126   :  { %3532 = vmatprep.subr.mxu0 %v1892_v14  ;;  %3567 = vmatprep.subr.mxu1 %v1924_v15  ;;  %v1947_v11 = vld [vmem:[%s7388_s3 + $0x260] sm:$0xff]  ;;  %v1962_v14 = vld [vmem:[%s7388_s3 + $0x2d8] sm:$0xff] }
 0x127   :  { %3533 = vmatpush3.msra.mxu0 %v1876_v18  ;;  %3568 = vmatpush3.msra.mxu1 %v1908_v1  ;;  %v1979_v13 = vld [vmem:[%s7388_s3 + $0x360] sm:$0xff]  ;;  %v1994_v15 = vld [vmem:[%s7388_s3 + $0x3d8] sm:$0xff] }
 0x128   :  { %3534 = vmatprep.subr.mxu0 %v1891_v19  ;;  %3569 = vmatprep.subr.mxu1 %v1923_v20  ;;  %v1946_v18 = vld [vmem:[%s7388_s3 + $0x258] sm:$0xff]  ;;  %v1961_v19 = vld [vmem:[%s7388_s3 + $0x2d0] sm:$0xff] }
 0x129   :  { %3535 = vmatpush3.msra.mxu0 %v1875_v22  ;;  %3570 = vmatpush3.msra.mxu1 %v1907_v23  ;;  %v1978_v1 = vld [vmem:[%s7388_s3 + $0x358] sm:$0xff]  ;;  %v1993_v20 = vld [vmem:[%s7388_s3 + $0x3d0] sm:$0xff] }
 0x12a   :  { %3536 = vmatprep.subr.mxu0 %v1890_v26  ;;  %3571 = vmatprep.subr.mxu1 %v1922_v27  ;;  %v1945_v22 = vld [vmem:[%s7388_s3 + $0x250] sm:$0xff]  ;;  %v1960_v26 = vld [vmem:[%s7388_s3 + $0x2c8] sm:$0xff] }
 0x12b   :  { %3537 = vmatpush3.msra.mxu0 %v1874_v31  ;;  %3572 = vmatpush3.msra.mxu1 %v1906_v32  ;;  %v1977_v23 = vld [vmem:[%s7388_s3 + $0x350] sm:$0xff]  ;;  %v1992_v27 = vld [vmem:[%s7388_s3 + $0x3c8] sm:$0xff]  ;;  %v1959_v31 = vld [vmem:[%s7388_s3 + $0x2c0] sm:$0xff] }
 0x12c   :  { %3538 = vmatprep.subr.mxu0 %v1889_v33  ;;  %3573 = vmatprep.subr.mxu1 %v1921_v34  ;;  %v1991_v32 = vld [vmem:[%s7388_s3 + $0x3c0] sm:$0xff] }
 0x12d   :  { %3539 = vmatpush3.msra.mxu0 %v1873_v35  ;;  %3574 = vmatpush3.msra.mxu1 %v1905_v12  ;;  %v1943_v33 = vld [vmem:[%s7388_s3 + $0x240] sm:$0xff]  ;;  %v1990_v35 = vld [vmem:[%s7388_s3 + $0x3b8] sm:$0xff] }
 0x12e   :  { %3540 = vmatprep.subr.mxu0 %v1888_v38  ;;  %3575 = vmatprep.subr.mxu1 %v1920_v39  ;;  %v1975_v34 = vld [vmem:[%s7388_s3 + $0x340] sm:$0xff]  ;;  %v1942_v12 = vld [vmem:[%s7388_s3 + $0x238] sm:$0xff]  ;;  %v1989_v38 = vld [vmem:[%s7388_s3 + $0x3b0] sm:$0xff] }
 0x12f   :  { %3541 = vmatpush3.msra.mxu0 %v1872_v43  ;;  %3576 = vmatpush3.msra.mxu1 %v1904_v44  ;;  %v1941_v39 = vld [vmem:[%s7388_s3 + $0x230] sm:$0xff]  ;;  %v10_v43 = vstv %s7389_s4  ;;  %v6054_v44 = vsub.s32 4, %v5609_v55 }
 0x130   :  { %3542 = vmatprep.subr.mxu0 %v1887_v45  ;;  %3577 = vmatprep.subr.mxu1 %v1919_v6  ;;  %v6057_v45 = vsub.s32 6, %v5609_v55  ;;  %v1940_v6 = vld [vmem:[%s7388_s3 + $0x228] sm:$0xff]  ;;  %11 = vst [vmem:[#allocation2] sm:$0x1] %v10_v43  ;;  %v1987_v55 = vld [vmem:[%s7388_s3 + $0x3a0] sm:$0xff] }
 0x131   :  { %3543 = vmatpush3.msra.mxu0 %v1871_v46  ;;  %3578 = vmatpush3.msra.mxu1 %v1903_v47  ;;  %v1955_v46 = vld [vmem:[%s7388_s3 + $0x2a0] sm:$0xff] }
 0x132   :  { %2451 = vmatmul.mubr.f32.vlgmr.msra.gmra.mxu0 %v1839_v49  ;;  %2521 = vmatmul.mubr.f32.vlgmr.msra.gmra.mxu1 %v1841_v50  ;;  %v1939_v47 = vld [vmem:[%s7388_s3 + $0x220] sm:$0xff]  ;;  %v6080_v49 = vld [vmem:[%s7387_s2 + $0x8] sm:$0xff]  ;;  %v6082_v50 = vpop.f32.mrf.mxu0 }
 0x133   :  { %3582 = vmatprep.subr.mxu0 %v1966_v51  ;;  %3617 = vmatprep.subr.mxu1 %v1998_v52  ;;  %v1954_v51 = vld [vmem:[%s7388_s3 + $0x298] sm:$0xff]  ;;  %v2043_v43 = vld [vmem:[%s7388_s3 + $0x560] sm:$0xff] }
 0x134   :  { %3583 = vmatpush3.msra.mxu0 %v1950_v53  ;;  %2590 = vmatprep.mubr.f32.mxu0 %v1844_v54  ;;  %v1986_v52 = vld [vmem:[%s7388_s3 + $0x398] sm:$0xff]  ;;  %v562_v53 = vrot.slane %v5647_v5, %v6054_v44  ;;  %v570_v54 = vrot.slane %v5647_v5, %v6057_v45  ;;  %v1985_v5 = vld [vmem:[%s7388_s3 + $0x390] sm:$0xff] }
 0x135   :  { %3618 = vmatpush3.msra.mxu1 %v1982_v56  ;;  %2660 = vmatprep.mubr.f32.mxu1 %v1846_v57  ;;  %v6094_v56 = vpop.f32.mrf.mxu1  ;;  %v1938_v57 = vld [vmem:[%s7388_s3 + $0x218] sm:$0xff] }
 0x136   :  { %3584 = vmatprep.subr.mxu0 %v1965_v58  ;;  %3619 = vmatprep.subr.mxu1 %v1997_v59  ;;  %v1970_v58 = vld [vmem:[%s7388_s3 + $0x318] sm:$0xff]  ;;  %v1953_v59 = vld [vmem:[%s7388_s3 + $0x290] sm:$0xff] }
 0x137   :  { %3585 = vmatpush3.msra.mxu0 %v1949_v60  ;;  %3620 = vmatpush3.msra.mxu1 %v1981_v61  ;;  %v582_v60 = vrot.slane %v6080_v49, %v5636_v0  ;;  %v1937_v61 = vld [vmem:[%s7388_s3 + $0x210] sm:$0xff] }
 0x138   :  { %3586 = vmatprep.subr.mxu0 %v1964_v62  ;;  %3621 = vmatprep.subr.mxu1 %v1996_v63  ;;  %v1969_v62 = vld [vmem:[%s7388_s3 + $0x310] sm:$0xff]  ;;  %v1055_v63 = vpop.f32.mrf.mxu0 }
 0x139   :  { %3587 = vmatpush3.msra.mxu0 %v1948_v2  ;;  %3622 = vmatpush3.msra.mxu1 %v1980_v4  ;;  %v590_v2 = vrot.slane %v6080_v49, %v5652_v7  ;;  %v1952_v4 = vld [vmem:[%s7388_s3 + $0x288] sm:$0xff] }
 0x13a   :  { %3588 = vmatprep.subr.mxu0 %v1963_v8  ;;  %3623 = vmatprep.subr.mxu1 %v1995_v9  ;;  %v1984_v8 = vld [vmem:[%s7388_s3 + $0x388] sm:$0xff]  ;;  %v2383_v9 = vld [vmem:[#allocation2] sm:$0x1] }
 0x13b   :  { %3589 = vmatpush3.msra.mxu0 %v1947_v11  ;;  %3624 = vmatpush3.msra.mxu1 %v1979_v13  ;;  %v912_v11 = vadd.f32 %v5859_v24, %v562_v53  ;;  %v983_v13 = vadd.f32 %v5874_v30, %v570_v54  ;;  %4072 = vpush %v2383_v9  ;;  %v1951_v24 = vld [vmem:[%s7388_s3 + $0x280] sm:$0xff]  ;;  %v2024_v53 = vld [vmem:[%s7388_s3 + $0x4c8] sm:$0xff]  ;;  %v2053_v9 = vld [vmem:[%s7388_s3 + $0x5b0] sm:$0xff] }
 0x13c   :  { %3590 = vmatprep.subr.mxu0 %v1962_v14  ;;  %3625 = vmatprep.subr.mxu1 %v1994_v15  ;;  %v1126_v14 = vpop.f32.mrf.mxu1  ;;  %v1936_v15 = vld [vmem:[%s7388_s3 + $0x208] sm:$0xff]  ;;  %v1983_v30 = vld [vmem:[%s7388_s3 + $0x380] sm:$0xff] }
 0x13d   :  { %3591 = vmatpush3.msra.mxu0 %v1946_v18  ;;  %3626 = vmatpush3.msra.mxu1 %v1978_v1  ;;  %v1968_v18 = vld [vmem:[%s7388_s3 + $0x308] sm:$0xff]  ;;  %v1056_v1 = vadd.f32 %v1055_v63, %v582_v60  ;;  %v2007_v60 = vld [vmem:[%s7388_s3 + $0x440] sm:$0xff]  ;;  %v2054_v63 = vld [vmem:[%s7388_s3 + $0x5b8] sm:$0xff] }
 0x13e   :  { %3592 = vmatprep.subr.mxu0 %v1961_v19  ;;  %3627 = vmatprep.subr.mxu1 %v1993_v20  ;;  %v1935_v19 = vld [vmem:[%s7388_s3 + $0x200] sm:$0xff]  ;;  %v2056_v54 = vld [vmem:[%s7388_s3 + $0x5c8] sm:$0xff] }
 0x13f   :  { %3593 = vmatpush3.msra.mxu0 %v1945_v22  ;;  %3628 = vmatpush3.msra.mxu1 %v1977_v23  ;;  %v1967_v20 = vld [vmem:[%s7388_s3 + $0x300] sm:$0xff]  ;;  %v1127_v22 = vadd.f32 %v1126_v14, %v590_v2  ;;  %v1843_v23 = vmax.f32 %v912_v11, 0.0  ;;  %v2006_v2 = vld [vmem:[%s7388_s3 + $0x438] sm:$0xff]  ;;  %v2005_v11 = vld [vmem:[%s7388_s3 + $0x430] sm:$0xff] }
 0x140   :  { %3594 = vmatprep.subr.mxu0 %v1960_v26  ;;  %3629 = vmatprep.subr.mxu1 %v1992_v27  ;;  %v1845_v26 = vmax.f32 %v983_v13, 0.0  ;;  %v2030_v27 = vld [vmem:[%s7388_s3 + $0x4f8] sm:$0xff]  ;;  %v2037_v13 = vld [vmem:[%s7388_s3 + $0x530] sm:$0xff]  ;;  %v2020_v14 = vld [vmem:[%s7388_s3 + $0x4a8] sm:$0xff] }
 0x141   :  { %3595 = vmatpush3.msra.mxu0 %v1944_v28  ;;  %3630 = vmatpush3.msra.mxu1 %v1976_v29  ;;  %v2062_v28 = vld [vmem:[%s7388_s3 + $0x5f8] sm:$0xff] }
 0x142   :  { %3596 = vmatprep.subr.mxu0 %v1959_v31  ;;  %3631 = vmatprep.subr.mxu1 %v1991_v32  ;;  %v2014_v29 = vld [vmem:[%s7388_s3 + $0x478] sm:$0xff]  ;;  %v1848_v31 = vmax.f32 %v1056_v1, 0.0  ;;  %v2051_v1 = vld [vmem:[%s7388_s3 + $0x5a0] sm:$0xff] }
 0x143   :  { %3597 = vmatpush3.msra.mxu0 %v1943_v33  ;;  %3632 = vmatpush3.msra.mxu1 %v1975_v34  ;;  %v2046_v32 = vld [vmem:[%s7388_s3 + $0x578] sm:$0xff]  ;;  %v1850_v33 = vmax.f32 %v1127_v22, 0.0  ;;  %v2029_v34 = vld [vmem:[%s7388_s3 + $0x4f0] sm:$0xff] }
 0x144   :  { %3598 = vmatprep.subr.mxu0 %v1958_v3  ;;  %3633 = vmatprep.subr.mxu1 %v1990_v35  ;;  %v2061_v3 = vld [vmem:[%s7388_s3 + $0x5f0] sm:$0xff] }
 0x145   :  { %3599 = vmatpush3.msra.mxu0 %v1942_v12  ;;  %3634 = vmatpush3.msra.mxu1 %v1974_v36  ;;  %v2013_v35 = vld [vmem:[%s7388_s3 + $0x470] sm:$0xff]  ;;  %v2028_v36 = vld [vmem:[%s7388_s3 + $0x4e8] sm:$0xff] }
 0x146   :  { %3600 = vmatprep.subr.mxu0 %v1957_v37  ;;  %3635 = vmatprep.subr.mxu1 %v1989_v38  ;;  %v2045_v12 = vld [vmem:[%s7388_s3 + $0x570] sm:$0xff]  ;;  %v2060_v37 = vld [vmem:[%s7388_s3 + $0x5e8] sm:$0xff] }
 0x147   :  { %3601 = vmatpush3.msra.mxu0 %v1941_v39  ;;  %3636 = vmatpush3.msra.mxu1 %v1973_v40  ;;  %v2012_v38 = vld [vmem:[%s7388_s3 + $0x468] sm:$0xff]  ;;  %v2027_v40 = vld [vmem:[%s7388_s3 + $0x4e0] sm:$0xff]  ;;  %v6288_v22 = vpop.f32.mrf.mxu0 }
 0x148   :  { %3602 = vmatprep.subr.mxu0 %v1956_v41  ;;  %3637 = vmatprep.subr.mxu1 %v1988_v42  ;;  %v2044_v39 = vld [vmem:[%s7388_s3 + $0x568] sm:$0xff]  ;;  %v2059_v41 = vld [vmem:[%s7388_s3 + $0x5e0] sm:$0xff] }
 0x149   :  { %3603 = vmatpush3.msra.mxu0 %v1940_v6  ;;  %3638 = vmatpush3.msra.mxu1 %v1972_v10  ;;  %v2011_v42 = vld [vmem:[%s7388_s3 + $0x460] sm:$0xff]  ;;  %v2026_v6 = vld [vmem:[%s7388_s3 + $0x4d8] sm:$0xff] }
 0x14a   :  { %3604 = vmatprep.subr.mxu0 %v1955_v46  ;;  %3639 = vmatprep.subr.mxu1 %v1987_v55  ;;  %v2058_v10 = vld [vmem:[%s7388_s3 + $0x5d8] sm:$0xff] }
 0x14b   :  { %3605 = vmatpush3.msra.mxu0 %v1939_v47  ;;  %3640 = vmatpush3.msra.mxu1 %v1971_v48  ;;  %v2010_v46 = vld [vmem:[%s7388_s3 + $0x458] sm:$0xff]  ;;  %v2025_v47 = vld [vmem:[%s7388_s3 + $0x4d0] sm:$0xff] }
 0x14c   :  { %3606 = vmatprep.subr.mxu0 %v1954_v51  ;;  %3641 = vmatprep.subr.mxu1 %v1986_v52  ;;  %v2042_v55 = vld [vmem:[%s7388_s3 + $0x558] sm:$0xff]  ;;  %v2057_v48 = vld [vmem:[%s7388_s3 + $0x5d0] sm:$0xff] }
 0x14d   :  { %3607 = vmatpush3.msra.mxu0 %v1938_v57  ;;  %3642 = vmatpush3.msra.mxu1 %v1970_v58  ;;  %v2009_v51 = vld [vmem:[%s7388_s3 + $0x450] sm:$0xff]  ;;  %v2008_v57 = vld [vmem:[%s7388_s3 + $0x448] sm:$0xff] }
 0x14e   :  { %3608 = vmatprep.subr.mxu0 %v1953_v59  ;;  %3643 = vmatprep.subr.mxu1 %v1985_v5  ;;  %v2041_v52 = vld [vmem:[%s7388_s3 + $0x550] sm:$0xff]  ;;  %v2040_v58 = vld [vmem:[%s7388_s3 + $0x548] sm:$0xff]  ;;  %v2023_v59 = vld [vmem:[%s7388_s3 + $0x4c0] sm:$0xff] }
 0x14f   :  { %3609 = vmatpush3.msra.mxu0 %v1937_v61  ;;  %3644 = vmatpush3.msra.mxu1 %v1969_v62  ;;  %v2055_v5 = vld [vmem:[%s7388_s3 + $0x5c0] sm:$0xff]  ;;  %v2022_v62 = vld [vmem:[%s7388_s3 + $0x4b8] sm:$0xff] }
 0x150   :  { %3610 = vmatprep.subr.mxu0 %v1952_v4  ;;  %3645 = vmatprep.subr.mxu1 %v1984_v8  ;;  %v2039_v61 = vld [vmem:[%s7388_s3 + $0x540] sm:$0xff]  ;;  %v2038_v4 = vld [vmem:[%s7388_s3 + $0x538] sm:$0xff]  ;;  %v2021_v8 = vld [vmem:[%s7388_s3 + $0x4b0] sm:$0xff] }
 0x151   :  { %3611 = vmatpush3.msra.mxu0 %v1936_v15  ;;  %3646 = vmatpush3.msra.mxu1 %v1968_v18  ;;  %v2052_v15 = vld [vmem:[%s7388_s3 + $0x5a8] sm:$0xff] }
 0x152   :  { %3612 = vmatprep.subr.mxu0 %v1951_v24  ;;  %3647 = vmatprep.subr.mxu1 %v1983_v30  ;;  %v2004_v18 = vld [vmem:[%s7388_s3 + $0x428] sm:$0xff]  ;;  %v2019_v30 = vld [vmem:[%s7388_s3 + $0x4a0] sm:$0xff] }
 0x153   :  { %3613 = vmatpush3.msra.mxu0 %v1935_v19  ;;  %3648 = vmatpush3.msra.mxu1 %v1967_v20  ;;  %v2036_v24 = vld [vmem:[%s7388_s3 + $0x528] sm:$0xff]  ;;  %v2003_v19 = vld [vmem:[%s7388_s3 + $0x420] sm:$0xff] }
 0x154   :  { %2591 = vmatmul.mubr.f32.vlgmr.msra.gmra.mxu0 %v1843_v23  ;;  %2661 = vmatmul.mubr.f32.vlgmr.msra.gmra.mxu1 %v1845_v26  ;;  %v2035_v20 = vld [vmem:[%s7388_s3 + $0x520] sm:$0xff]  ;;  %v2018_v23 = vld [vmem:[%s7388_s3 + $0x498] sm:$0xff] }
 0x155   :  { %3652 = vmatprep.subr.mxu0 %v2030_v27  ;;  %3687 = vmatprep.subr.mxu1 %v2062_v28  ;;  %v2050_v26 = vld [vmem:[%s7388_s3 + $0x598] sm:$0xff]  ;;  %v578_v27 = vrot.slane %v6080_v49, %v5833_v16  ;;  %v586_v28 = vrot.slane %v6080_v49, %v5836_v17 }
 0x156   :  { %3653 = vmatpush3.msra.mxu0 %v2014_v29  ;;  %2730 = vmatprep.mubr.f32.mxu0 %v1848_v31  ;;  %v6300_v29 = vpop.f32.mrf.mxu1  ;;  %v2002_v31 = vld [vmem:[%s7388_s3 + $0x418] sm:$0xff] }
 0x157   :  { %3688 = vmatpush3.msra.mxu1 %v2046_v32  ;;  %2800 = vmatprep.mubr.f32.mxu1 %v1850_v33  ;;  %v2034_v32 = vld [vmem:[%s7388_s3 + $0x518] sm:$0xff]  ;;  %v2017_v33 = vld [vmem:[%s7388_s3 + $0x490] sm:$0xff] }
 0x158   :  { %3654 = vmatprep.subr.mxu0 %v2029_v34  ;;  %3689 = vmatprep.subr.mxu1 %v2061_v3  ;;  %v2049_v34 = vld [vmem:[%s7388_s3 + $0x590] sm:$0xff]  ;;  %v598_v3 = vrot.slane %v6080_v49, %v5851_v21 }
 0x159   :  { %3655 = vmatpush3.msra.mxu0 %v2013_v35  ;;  %3690 = vmatpush3.msra.mxu1 %v2045_v12  ;;  %v2001_v35 = vld [vmem:[%s7388_s3 + $0x410] sm:$0xff] }
 0x15a   :  { %3656 = vmatprep.subr.mxu0 %v2028_v36  ;;  %3691 = vmatprep.subr.mxu1 %v2060_v37  ;;  %v2033_v12 = vld [vmem:[%s7388_s3 + $0x510] sm:$0xff]  ;;  %v1197_v36 = vpop.f32.mrf.mxu0  ;;  %v606_v37 = vrot.slane %v6080_v49, %v5862_v25 }
 0x15b   :  { %3657 = vmatpush3.msra.mxu0 %v2012_v38  ;;  %3692 = vmatpush3.msra.mxu1 %v2044_v39  ;;  %v2016_v38 = vld [vmem:[%s7388_s3 + $0x488] sm:$0xff] }
 0x15c   :  { %3658 = vmatprep.subr.mxu0 %v2027_v40  ;;  %3693 = vmatprep.subr.mxu1 %v2059_v41  ;;  %v2048_v39 = vld [vmem:[%s7388_s3 + $0x588] sm:$0xff]  ;;  %v1054_v40 = vadd.f32 %v6082_v50, %v578_v27  ;;  %v1125_v41 = vadd.f32 %v6094_v56, %v586_v28  ;;  %v2047_v50 = vld [vmem:[%s7388_s3 + $0x580] sm:$0xff]  ;;  %v1198_v56 = vadd.f32 %v1197_v36, %v598_v3  ;;  %v2070_v36 = vld [vmem:[%s7388_s3 + $0x638] sm:$0xff] }
 0x15d   :  { %3659 = vmatpush3.msra.mxu0 %v2011_v42  ;;  %3694 = vmatpush3.msra.mxu1 %v2043_v43  ;;  %v1268_v42 = vpop.f32.mrf.mxu1  ;;  %v2000_v43 = vld [vmem:[%s7388_s3 + $0x408] sm:$0xff]  ;;  %v2103_v3 = vld [vmem:[%s7388_s3 + $0x740] sm:$0xff] }
 0x15e   :  { %3660 = vmatprep.subr.mxu0 %v2026_v6  ;;  %3695 = vmatprep.subr.mxu1 %v2058_v10  ;;  %v2032_v6 = vld [vmem:[%s7388_s3 + $0x508] sm:$0xff]  ;;  %v2015_v10 = vld [vmem:[%s7388_s3 + $0x480] sm:$0xff] }
 0x15f   :  { %3661 = vmatpush3.msra.mxu0 %v2010_v46  ;;  %3696 = vmatpush3.msra.mxu1 %v2042_v55  ;;  %v1999_v46 = vld [vmem:[%s7388_s3 + $0x400] sm:$0xff]  ;;  %v2120_v27 = vld [vmem:[%s7388_s3 + $0x7c8] sm:$0xff] }
 0x160   :  { %3662 = vmatprep.subr.mxu0 %v2025_v47  ;;  %3697 = vmatprep.subr.mxu1 %v2057_v48  ;;  %v2031_v55 = vld [vmem:[%s7388_s3 + $0x500] sm:$0xff]  ;;  %v1269_v47 = vadd.f32 %v1268_v42, %v606_v37  ;;  %v1847_v48 = vmax.f32 %v1054_v40, 0.0  ;;  %v2072_v28 = vld [vmem:[%s7388_s3 + $0x648] sm:$0xff]  ;;  %v2102_v37 = vld [vmem:[%s7388_s3 + $0x738] sm:$0xff] }
 0x161   :  { %3663 = vmatpush3.msra.mxu0 %v2009_v51  ;;  %3698 = vmatpush3.msra.mxu1 %v2041_v52  ;;  %v1849_v51 = vmax.f32 %v1125_v41, 0.0  ;;  %v2094_v52 = vld [vmem:[%s7388_s3 + $0x6f8] sm:$0xff]  ;;  %v2069_v40 = vld [vmem:[%s7388_s3 + $0x630] sm:$0xff]  ;;  %v2084_v42 = vld [vmem:[%s7388_s3 + $0x6a8] sm:$0xff] }
 0x162   :  { %3664 = vmatprep.subr.mxu0 %v2024_v53  ;;  %3699 = vmatprep.subr.mxu1 %v2056_v54  ;;  %v2126_v53 = vld [vmem:[%s7388_s3 + $0x7f8] sm:$0xff]  ;;  %v2101_v41 = vld [vmem:[%s7388_s3 + $0x730] sm:$0xff] }
 0x163   :  { %3665 = vmatpush3.msra.mxu0 %v2008_v57  ;;  %3700 = vmatpush3.msra.mxu1 %v2040_v58  ;;  %v2078_v54 = vld [vmem:[%s7388_s3 + $0x678] sm:$0xff]  ;;  %v1852_v57 = vmax.f32 %v1198_v56, 0.0  ;;  %v2115_v56 = vld [vmem:[%s7388_s3 + $0x7a0] sm:$0xff] }
 0x164   :  { %3666 = vmatprep.subr.mxu0 %v2023_v59  ;;  %3701 = vmatprep.subr.mxu1 %v2055_v5  ;;  %v2110_v58 = vld [vmem:[%s7388_s3 + $0x778] sm:$0xff]  ;;  %v1854_v59 = vmax.f32 %v1269_v47, 0.0  ;;  %v2093_v5 = vld [vmem:[%s7388_s3 + $0x6f0] sm:$0xff] }
 0x165   :  { %3667 = vmatpush3.msra.mxu0 %v2007_v60  ;;  %3702 = vmatpush3.msra.mxu1 %v2039_v61  ;;  %v2125_v60 = vld [vmem:[%s7388_s3 + $0x7f0] sm:$0xff] }
 0x166   :  { %3668 = vmatprep.subr.mxu0 %v2022_v62  ;;  %3703 = vmatprep.subr.mxu1 %v2054_v63  ;;  %v2077_v61 = vld [vmem:[%s7388_s3 + $0x670] sm:$0xff]  ;;  %v2092_v63 = vld [vmem:[%s7388_s3 + $0x6e8] sm:$0xff] }
 0x167   :  { %3669 = vmatpush3.msra.mxu0 %v2006_v2  ;;  %3704 = vmatpush3.msra.mxu1 %v2038_v4  ;;  %v2109_v62 = vld [vmem:[%s7388_s3 + $0x770] sm:$0xff]  ;;  %v2124_v2 = vld [vmem:[%s7388_s3 + $0x7e8] sm:$0xff] }
 0x168   :  { %3670 = vmatprep.subr.mxu0 %v2021_v8  ;;  %3705 = vmatprep.subr.mxu1 %v2053_v9  ;;  %v2076_v4 = vld [vmem:[%s7388_s3 + $0x668] sm:$0xff]  ;;  %v2091_v9 = vld [vmem:[%s7388_s3 + $0x6e0] sm:$0xff]  ;;  %v6497_v47 = vld [vmem:[%s7387_s2 + $0x10] sm:$0xff] }
 0x169   :  { %3671 = vmatpush3.msra.mxu0 %v2005_v11  ;;  %3706 = vmatpush3.msra.mxu1 %v2037_v13  ;;  %v2108_v8 = vld [vmem:[%s7388_s3 + $0x768] sm:$0xff]  ;;  %v2123_v11 = vld [vmem:[%s7388_s3 + $0x7e0] sm:$0xff] }
 0x16a   :  { %3672 = vmatprep.subr.mxu0 %v2020_v14  ;;  %3707 = vmatprep.subr.mxu1 %v2052_v15  ;;  %v2075_v13 = vld [vmem:[%s7388_s3 + $0x660] sm:$0xff]  ;;  %v2090_v15 = vld [vmem:[%s7388_s3 + $0x6d8] sm:$0xff] }
 0x16b   :  { %3673 = vmatpush3.msra.mxu0 %v2004_v18  ;;  %3708 = vmatpush3.msra.mxu1 %v2036_v24  ;;  %v2107_v14 = vld [vmem:[%s7388_s3 + $0x760] sm:$0xff]  ;;  %v2122_v18 = vld [vmem:[%s7388_s3 + $0x7d8] sm:$0xff] }
 0x16c   :  { %3674 = vmatprep.subr.mxu0 %v2019_v30  ;;  %3709 = vmatprep.subr.mxu1 %v2051_v1  ;;  %v2074_v24 = vld [vmem:[%s7388_s3 + $0x658] sm:$0xff]  ;;  %v2089_v1 = vld [vmem:[%s7388_s3 + $0x6d0] sm:$0xff]  ;;  %s4073_s27 = spop %4072 }
 0x16d   :  { %3675 = vmatpush3.msra.mxu0 %v2003_v19  ;;  %3710 = vmatpush3.msra.mxu1 %v2035_v20  ;;  %v2106_v30 = vld [vmem:[%s7388_s3 + $0x758] sm:$0xff]  ;;  %v2121_v19 = vld [vmem:[%s7388_s3 + $0x7d0] sm:$0xff] }
 0x16e   :  { %3676 = vmatprep.subr.mxu0 %v2018_v23  ;;  %3711 = vmatprep.subr.mxu1 %v2050_v26  ;;  %v2073_v20 = vld [vmem:[%s7388_s3 + $0x650] sm:$0xff]  ;;  %v2088_v26 = vld [vmem:[%s7388_s3 + $0x6c8] sm:$0xff] }
 0x16f   :  { %3677 = vmatpush3.msra.mxu0 %v2002_v31  ;;  %3712 = vmatpush3.msra.mxu1 %v2034_v32  ;;  %v2105_v23 = vld [vmem:[%s7388_s3 + $0x750] sm:$0xff]  ;;  %v2104_v31 = vld [vmem:[%s7388_s3 + $0x748] sm:$0xff]  ;;  %v2087_v32 = vld [vmem:[%s7388_s3 + $0x6c0] sm:$0xff] }
 0x170   :  { %3678 = vmatprep.subr.mxu0 %v2017_v33  ;;  %3713 = vmatprep.subr.mxu1 %v2049_v34  ;;  %v2119_v33 = vld [vmem:[%s7388_s3 + $0x7c0] sm:$0xff] }
 0x171   :  { %3679 = vmatpush3.msra.mxu0 %v2001_v35  ;;  %3714 = vmatpush3.msra.mxu1 %v2033_v12  ;;  %v2071_v34 = vld [vmem:[%s7388_s3 + $0x640] sm:$0xff]  ;;  %v2086_v35 = vld [vmem:[%s7388_s3 + $0x6b8] sm:$0xff] }
 0x172   :  { %3680 = vmatprep.subr.mxu0 %v2016_v38  ;;  %3715 = vmatprep.subr.mxu1 %v2048_v39  ;;  %v2118_v12 = vld [vmem:[%s7388_s3 + $0x7b8] sm:$0xff]  ;;  %v2085_v38 = vld [vmem:[%s7388_s3 + $0x6b0] sm:$0xff] }
 0x173   :  { %3681 = vmatpush3.msra.mxu0 %v2000_v43  ;;  %3716 = vmatpush3.msra.mxu1 %v2032_v6  ;;  %v2117_v39 = vld [vmem:[%s7388_s3 + $0x7b0] sm:$0xff]  ;;  %v2116_v43 = vld [vmem:[%s7388_s3 + $0x7a8] sm:$0xff] }
 0x174   :  { %3682 = vmatprep.subr.mxu0 %v2015_v10  ;;  %3717 = vmatprep.subr.mxu1 %v2047_v50  ;;  %v2068_v6 = vld [vmem:[%s7388_s3 + $0x628] sm:$0xff]  ;;  %v2083_v50 = vld [vmem:[%s7388_s3 + $0x6a0] sm:$0xff] }
 0x175   :  { %3683 = vmatpush3.msra.mxu0 %v1999_v46  ;;  %3718 = vmatpush3.msra.mxu1 %v2031_v55  ;;  %v2100_v10 = vld [vmem:[%s7388_s3 + $0x728] sm:$0xff]  ;;  %v2067_v46 = vld [vmem:[%s7388_s3 + $0x620] sm:$0xff] }
 0x176   :  { %2731 = vmatmul.mubr.f32.vlgmr.msra.gmra.mxu0 %v1847_v48  ;;  %2801 = vmatmul.mubr.f32.vlgmr.msra.gmra.mxu1 %v1849_v51  ;;  %v2099_v55 = vld [vmem:[%s7388_s3 + $0x720] sm:$0xff]  ;;  %v6499_v48 = vpop.f32.mrf.mxu0  ;;  %v2082_v51 = vld [vmem:[%s7388_s3 + $0x698] sm:$0xff] }
 0x177   :  { %3722 = vmatprep.subr.mxu0 %v2094_v52  ;;  %3757 = vmatprep.subr.mxu1 %v2126_v53  ;;  %v2114_v52 = vld [vmem:[%s7388_s3 + $0x798] sm:$0xff]  ;;  %v594_v53 = vrot.slane %v6080_v49, %v6054_v44 }
 0x178   :  { %3723 = vmatpush3.msra.mxu0 %v2078_v54  ;;  %2870 = vmatprep.mubr.f32.mxu0 %v1852_v57  ;;  %v602_v54 = vrot.slane %v6080_v49, %v6057_v45  ;;  %v6511_v57 = vpop.f32.mrf.mxu1  ;;  %v2113_v49 = vld [vmem:[%s7388_s3 + $0x790] sm:$0xff] }
 0x179   :  { %3758 = vmatpush3.msra.mxu1 %v2110_v58  ;;  %2940 = vmatprep.mubr.f32.mxu1 %v1854_v59  ;;  %v2066_v58 = vld [vmem:[%s7388_s3 + $0x618] sm:$0xff] }
 0x17a   :  { %3724 = vmatprep.subr.mxu0 %v2093_v5  ;;  %3759 = vmatprep.subr.mxu1 %v2125_v60  ;;  %v2098_v59 = vld [vmem:[%s7388_s3 + $0x718] sm:$0xff]  ;;  %v2081_v5 = vld [vmem:[%s7388_s3 + $0x690] sm:$0xff]  ;;  %v614_v60 = vrot.slane %v6497_v47, %v5636_v0 }
 0x17b   :  { %3725 = vmatpush3.msra.mxu0 %v2077_v61  ;;  %3760 = vmatpush3.msra.mxu1 %v2109_v62  ;;  %v2065_v61 = vld [vmem:[%s7388_s3 + $0x610] sm:$0xff] }
 0x17c   :  { %3726 = vmatprep.subr.mxu0 %v2092_v63  ;;  %3761 = vmatprep.subr.mxu1 %v2124_v2  ;;  %v2097_v62 = vld [vmem:[%s7388_s3 + $0x710] sm:$0xff]  ;;  %v1339_v63 = vpop.f32.mrf.mxu0  ;;  %v622_v2 = vrot.slane %v6497_v47, %v5652_v7 }
 0x17d   :  { %3727 = vmatpush3.msra.mxu0 %v2076_v4  ;;  %3762 = vmatpush3.msra.mxu1 %v2108_v8  ;;  %v2080_v4 = vld [vmem:[%s7388_s3 + $0x688] sm:$0xff] }
 0x17e   :  { %3728 = vmatprep.subr.mxu0 %v2091_v9  ;;  %3763 = vmatprep.subr.mxu1 %v2123_v11  ;;  %v2112_v8 = vld [vmem:[%s7388_s3 + $0x788] sm:$0xff]  ;;  %v1196_v9 = vadd.f32 %v6288_v22, %v594_v53  ;;  %v1267_v11 = vadd.f32 %v6300_v29, %v602_v54  ;;  %v2111_v22 = vld [vmem:[%s7388_s3 + $0x780] sm:$0xff]  ;;  %v1340_v29 = vadd.f32 %v1339_v63, %v614_v60  ;;  %v2134_v63 = vld [vmem:[%s7388_s3 + $0x838] sm:$0xff] }
 0x17f   :  { %3729 = vmatpush3.msra.mxu0 %v2075_v13  ;;  %3764 = vmatpush3.msra.mxu1 %v2107_v14  ;;  %v1410_v13 = vpop.f32.mrf.mxu1  ;;  %v2064_v14 = vld [vmem:[%s7388_s3 + $0x608] sm:$0xff]  ;;  %v2167_v60 = vld [vmem:[%s7388_s3 + $0x940] sm:$0xff] }
 0x180   :  { %3730 = vmatprep.subr.mxu0 %v2090_v15  ;;  %3765 = vmatprep.subr.mxu1 %v2122_v18  ;;  %v2096_v15 = vld [vmem:[%s7388_s3 + $0x708] sm:$0xff]  ;;  %v2079_v18 = vld [vmem:[%s7388_s3 + $0x680] sm:$0xff] }
 0x181   :  { %3731 = vmatpush3.msra.mxu0 %v2074_v24  ;;  %3766 = vmatpush3.msra.mxu1 %v2106_v30  ;;  %v2063_v24 = vld [vmem:[%s7388_s3 + $0x600] sm:$0xff]  ;;  %v2184_v53 = vld [vmem:[%s7388_s3 + $0x9c8] sm:$0xff] }
 0x182   :  { %3732 = vmatprep.subr.mxu0 %v2089_v1  ;;  %3767 = vmatprep.subr.mxu1 %v2121_v19  ;;  %v2095_v30 = vld [vmem:[%s7388_s3 + $0x700] sm:$0xff]  ;;  %v1411_v1 = vadd.f32 %v1410_v13, %v622_v2  ;;  %v1851_v19 = vmax.f32 %v1196_v9, 0.0  ;;  %v2136_v54 = vld [vmem:[%s7388_s3 + $0x848] sm:$0xff]  ;;  %v2166_v2 = vld [vmem:[%s7388_s3 + $0x938] sm:$0xff] }
 0x183   :  { %3733 = vmatpush3.msra.mxu0 %v2073_v20  ;;  %3768 = vmatpush3.msra.mxu1 %v2105_v23  ;;  %v1853_v20 = vmax.f32 %v1267_v11, 0.0  ;;  %v2158_v23 = vld [vmem:[%s7388_s3 + $0x8f8] sm:$0xff]  ;;  %v2133_v9 = vld [vmem:[%s7388_s3 + $0x830] sm:$0xff]  ;;  %v2148_v13 = vld [vmem:[%s7388_s3 + $0x8a8] sm:$0xff] }
 0x184   :  { %3734 = vmatprep.subr.mxu0 %v2088_v26  ;;  %3769 = vmatprep.subr.mxu1 %v2120_v27  ;;  %v2190_v26 = vld [vmem:[%s7388_s3 + $0x9f8] sm:$0xff]  ;;  %v2165_v11 = vld [vmem:[%s7388_s3 + $0x930] sm:$0xff] }
 0x185   :  { %3735 = vmatpush3.msra.mxu0 %v2072_v28  ;;  %3770 = vmatpush3.msra.mxu1 %v2104_v31  ;;  %v2142_v27 = vld [vmem:[%s7388_s3 + $0x878] sm:$0xff]  ;;  %v1856_v28 = vmax.f32 %v1340_v29, 0.0  ;;  %v2179_v29 = vld [vmem:[%s7388_s3 + $0x9a0] sm:$0xff] }
 0x186   :  { %3736 = vmatprep.subr.mxu0 %v2087_v32  ;;  %3771 = vmatprep.subr.mxu1 %v2119_v33  ;;  %v2174_v31 = vld [vmem:[%s7388_s3 + $0x978] sm:$0xff]  ;;  %v1858_v32 = vmax.f32 %v1411_v1, 0.0  ;;  %v2157_v33 = vld [vmem:[%s7388_s3 + $0x8f0] sm:$0xff] }
 0x187   :  { %3737 = vmatpush3.msra.mxu0 %v2071_v34  ;;  %3772 = vmatpush3.msra.mxu1 %v2103_v3  ;;  %v2189_v34 = vld [vmem:[%s7388_s3 + $0x9f0] sm:$0xff] }
 0x188   :  { %3738 = vmatprep.subr.mxu0 %v2086_v35  ;;  %3773 = vmatprep.subr.mxu1 %v2118_v12  ;;  %v2141_v3 = vld [vmem:[%s7388_s3 + $0x870] sm:$0xff]  ;;  %v2156_v12 = vld [vmem:[%s7388_s3 + $0x8e8] sm:$0xff] }
 0x189   :  { %3739 = vmatpush3.msra.mxu0 %v2070_v36  ;;  %3774 = vmatpush3.msra.mxu1 %v2102_v37  ;;  %v2173_v35 = vld [vmem:[%s7388_s3 + $0x970] sm:$0xff]  ;;  %v2188_v36 = vld [vmem:[%s7388_s3 + $0x9e8] sm:$0xff] }
 0x18a   :  { %3740 = vmatprep.subr.mxu0 %v2085_v38  ;;  %3775 = vmatprep.subr.mxu1 %v2117_v39  ;;  %v2140_v37 = vld [vmem:[%s7388_s3 + $0x868] sm:$0xff]  ;;  %v2155_v39 = vld [vmem:[%s7388_s3 + $0x8e0] sm:$0xff] }
 0x18b   :  { %3741 = vmatpush3.msra.mxu0 %v2069_v40  ;;  %3776 = vmatpush3.msra.mxu1 %v2101_v41  ;;  %v2172_v38 = vld [vmem:[%s7388_s3 + $0x968] sm:$0xff]  ;;  %v2187_v40 = vld [vmem:[%s7388_s3 + $0x9e0] sm:$0xff]  ;;  %v6705_v1 = vpop.f32.mrf.mxu0 }
 0x18c   :  { %3742 = vmatprep.subr.mxu0 %v2084_v42  ;;  %3777 = vmatprep.subr.mxu1 %v2116_v43  ;;  %v2139_v41 = vld [vmem:[%s7388_s3 + $0x860] sm:$0xff]  ;;  %v2154_v43 = vld [vmem:[%s7388_s3 + $0x8d8] sm:$0xff] }
 0x18d   :  { %3743 = vmatpush3.msra.mxu0 %v2068_v6  ;;  %3778 = vmatpush3.msra.mxu1 %v2100_v10  ;;  %v2171_v42 = vld [vmem:[%s7388_s3 + $0x960] sm:$0xff]  ;;  %v2186_v6 = vld [vmem:[%s7388_s3 + $0x9d8] sm:$0xff] }
 0x18e   :  { %3744 = vmatprep.subr.mxu0 %v2083_v50  ;;  %3779 = vmatprep.subr.mxu1 %v2115_v56  ;;  %v2138_v10 = vld [vmem:[%s7388_s3 + $0x858] sm:$0xff]  ;;  %v2153_v56 = vld [vmem:[%s7388_s3 + $0x8d0] sm:$0xff] }
 0x18f   :  { %3745 = vmatpush3.msra.mxu0 %v2067_v46  ;;  %3780 = vmatpush3.msra.mxu1 %v2099_v55  ;;  %v2170_v50 = vld [vmem:[%s7388_s3 + $0x958] sm:$0xff]  ;;  %v2185_v46 = vld [vmem:[%s7388_s3 + $0x9d0] sm:$0xff] }
 0x190   :  { %3746 = vmatprep.subr.mxu0 %v2082_v51  ;;  %3781 = vmatprep.subr.mxu1 %v2114_v52  ;;  %v2137_v55 = vld [vmem:[%s7388_s3 + $0x850] sm:$0xff]  ;;  %v2152_v52 = vld [vmem:[%s7388_s3 + $0x8c8] sm:$0xff] }
 0x191   :  { %3747 = vmatpush3.msra.mxu0 %v2066_v58  ;;  %3782 = vmatpush3.msra.mxu1 %v2098_v59  ;;  %v2169_v51 = vld [vmem:[%s7388_s3 + $0x950] sm:$0xff]  ;;  %v2168_v58 = vld [vmem:[%s7388_s3 + $0x948] sm:$0xff]  ;;  %v2151_v59 = vld [vmem:[%s7388_s3 + $0x8c0] sm:$0xff] }
 0x192   :  { %3748 = vmatprep.subr.mxu0 %v2081_v5  ;;  %3783 = vmatprep.subr.mxu1 %v2113_v49  ;;  %v2183_v5 = vld [vmem:[%s7388_s3 + $0x9c0] sm:$0xff] }
 0x193   :  { %3749 = vmatpush3.msra.mxu0 %v2065_v61  ;;  %3784 = vmatpush3.msra.mxu1 %v2097_v62  ;;  %v2135_v49 = vld [vmem:[%s7388_s3 + $0x840] sm:$0xff]  ;;  %v2150_v61 = vld [vmem:[%s7388_s3 + $0x8b8] sm:$0xff] }
 0x194   :  { %3750 = vmatprep.subr.mxu0 %v2080_v4  ;;  %3785 = vmatprep.subr.mxu1 %v2112_v8  ;;  %v2182_v62 = vld [vmem:[%s7388_s3 + $0x9b8] sm:$0xff]  ;;  %v2149_v4 = vld [vmem:[%s7388_s3 + $0x8b0] sm:$0xff] }
 0x195   :  { %3751 = vmatpush3.msra.mxu0 %v2064_v14  ;;  %3786 = vmatpush3.msra.mxu1 %v2096_v15  ;;  %v2181_v8 = vld [vmem:[%s7388_s3 + $0x9b0] sm:$0xff]  ;;  %v2180_v14 = vld [vmem:[%s7388_s3 + $0x9a8] sm:$0xff] }
 0x196   :  { %3752 = vmatprep.subr.mxu0 %v2079_v18  ;;  %3787 = vmatprep.subr.mxu1 %v2111_v22  ;;  %v2132_v15 = vld [vmem:[%s7388_s3 + $0x828] sm:$0xff]  ;;  %v2147_v22 = vld [vmem:[%s7388_s3 + $0x8a0] sm:$0xff] }
 0x197   :  { %3753 = vmatpush3.msra.mxu0 %v2063_v24  ;;  %3788 = vmatpush3.msra.mxu1 %v2095_v30  ;;  %v2164_v18 = vld [vmem:[%s7388_s3 + $0x928] sm:$0xff]  ;;  %v2131_v24 = vld [vmem:[%s7388_s3 + $0x820] sm:$0xff] }
 0x198   :  { %2871 = vmatmul.mubr.f32.vlgmr.msra.gmra.mxu0 %v1851_v19  ;;  %2941 = vmatmul.mubr.f32.vlgmr.msra.gmra.mxu1 %v1853_v20  ;;  %v2163_v30 = vld [vmem:[%s7388_s3 + $0x920] sm:$0xff]  ;;  %v2146_v19 = vld [vmem:[%s7388_s3 + $0x898] sm:$0xff] }
 0x199   :  { %3792 = vmatprep.subr.mxu0 %v2158_v23  ;;  %3827 = vmatprep.subr.mxu1 %v2190_v26  ;;  %v2178_v20 = vld [vmem:[%s7388_s3 + $0x998] sm:$0xff]  ;;  %v610_v23 = vrot.slane %v6497_v47, %v5833_v16  ;;  %v618_v26 = vrot.slane %v6497_v47, %v5836_v17 }
 0x19a   :  { %3793 = vmatpush3.msra.mxu0 %v2142_v27  ;;  %3010 = vmatprep.mubr.f32.mxu0 %v1856_v28  ;;  %v6717_v27 = vpop.f32.mrf.mxu1  ;;  %v2130_v28 = vld [vmem:[%s7388_s3 + $0x818] sm:$0xff] }
 0x19b   :  { %3828 = vmatpush3.msra.mxu1 %v2174_v31  ;;  %3080 = vmatprep.mubr.f32.mxu1 %v1858_v32  ;;  %v2162_v31 = vld [vmem:[%s7388_s3 + $0x918] sm:$0xff]  ;;  %v2145_v32 = vld [vmem:[%s7388_s3 + $0x890] sm:$0xff] }
 0x19c   :  { %3794 = vmatprep.subr.mxu0 %v2157_v33  ;;  %3829 = vmatprep.subr.mxu1 %v2189_v34  ;;  %v2177_v33 = vld [vmem:[%s7388_s3 + $0x990] sm:$0xff]  ;;  %v630_v34 = vrot.slane %v6497_v47, %v5851_v21 }
 0x19d   :  { %3795 = vmatpush3.msra.mxu0 %v2141_v3  ;;  %3830 = vmatpush3.msra.mxu1 %v2173_v35  ;;  %v2129_v3 = vld [vmem:[%s7388_s3 + $0x810] sm:$0xff] }
 0x19e   :  { %3796 = vmatprep.subr.mxu0 %v2156_v12  ;;  %3831 = vmatprep.subr.mxu1 %v2188_v36  ;;  %v2161_v35 = vld [vmem:[%s7388_s3 + $0x910] sm:$0xff]  ;;  %v1481_v12 = vpop.f32.mrf.mxu0  ;;  %v638_v36 = vrot.slane %v6497_v47, %v5862_v25 }
 0x19f   :  { %3797 = vmatpush3.msra.mxu0 %v2140_v37  ;;  %3832 = vmatpush3.msra.mxu1 %v2172_v38  ;;  %v2144_v37 = vld [vmem:[%s7388_s3 + $0x888] sm:$0xff] }
 0x1a0   :  { %3798 = vmatprep.subr.mxu0 %v2155_v39  ;;  %3833 = vmatprep.subr.mxu1 %v2187_v40  ;;  %v2176_v38 = vld [vmem:[%s7388_s3 + $0x988] sm:$0xff]  ;;  %v1338_v39 = vadd.f32 %v6499_v48, %v610_v23  ;;  %v1409_v40 = vadd.f32 %v6511_v57, %v618_v26  ;;  %v2175_v48 = vld [vmem:[%s7388_s3 + $0x980] sm:$0xff]  ;;  %v1482_v57 = vadd.f32 %v1481_v12, %v630_v34  ;;  %v2198_v12 = vld [vmem:[%s7388_s3 + $0xa38] sm:$0xff] }
 0x1a1   :  { %3799 = vmatpush3.msra.mxu0 %v2139_v41  ;;  %3834 = vmatpush3.msra.mxu1 %v2171_v42  ;;  %v1552_v41 = vpop.f32.mrf.mxu1  ;;  %v2128_v42 = vld [vmem:[%s7388_s3 + $0x808] sm:$0xff]  ;;  %v2231_v34 = vld [vmem:[%s7388_s3 + $0xb40] sm:$0xff] }
 0x1a2   :  { %3800 = vmatprep.subr.mxu0 %v2154_v43  ;;  %3835 = vmatprep.subr.mxu1 %v2186_v6  ;;  %v2160_v43 = vld [vmem:[%s7388_s3 + $0x908] sm:$0xff]  ;;  %v2143_v6 = vld [vmem:[%s7388_s3 + $0x880] sm:$0xff] }
 0x1a3   :  { %3801 = vmatpush3.msra.mxu0 %v2138_v10  ;;  %3836 = vmatpush3.msra.mxu1 %v2170_v50  ;;  %v2127_v10 = vld [vmem:[%s7388_s3 + $0x800] sm:$0xff]  ;;  %v2248_v23 = vld [vmem:[%s7388_s3 + $0xbc8] sm:$0xff] }
 0x1a4   :  { %3802 = vmatprep.subr.mxu0 %v2153_v56  ;;  %3837 = vmatprep.subr.mxu1 %v2185_v46  ;;  %v2159_v50 = vld [vmem:[%s7388_s3 + $0x900] sm:$0xff]  ;;  %v1553_v56 = vadd.f32 %v1552_v41, %v638_v36  ;;  %v1855_v46 = vmax.f32 %v1338_v39, 0.0  ;;  %v2200_v26 = vld [vmem:[%s7388_s3 + $0xa48] sm:$0xff]  ;;  %v2230_v36 = vld [vmem:[%s7388_s3 + $0xb38] sm:$0xff] }
 0x1a5   :  { %3803 = vmatpush3.msra.mxu0 %v2137_v55  ;;  %3838 = vmatpush3.msra.mxu1 %v2169_v51  ;;  %v1857_v55 = vmax.f32 %v1409_v40, 0.0  ;;  %v2222_v51 = vld [vmem:[%s7388_s3 + $0xaf8] sm:$0xff]  ;;  %v2197_v39 = vld [vmem:[%s7388_s3 + $0xa30] sm:$0xff]  ;;  %v2212_v41 = vld [vmem:[%s7388_s3 + $0xaa8] sm:$0xff] }
 0x1a6   :  { %3804 = vmatprep.subr.mxu0 %v2152_v52  ;;  %3839 = vmatprep.subr.mxu1 %v2184_v53  ;;  %v2254_v52 = vld [vmem:[%s7388_s3 + $0xbf8] sm:$0xff]  ;;  %v2229_v40 = vld [vmem:[%s7388_s3 + $0xb30] sm:$0xff] }
 0x1a7   :  { %3805 = vmatpush3.msra.mxu0 %v2136_v54  ;;  %3840 = vmatpush3.msra.mxu1 %v2168_v58  ;;  %v2206_v53 = vld [vmem:[%s7388_s3 + $0xa78] sm:$0xff]  ;;  %v1860_v54 = vmax.f32 %v1482_v57, 0.0  ;;  %v2243_v57 = vld [vmem:[%s7388_s3 + $0xba0] sm:$0xff] }
 0x1a8   :  { %3806 = vmatprep.subr.mxu0 %v2151_v59  ;;  %3841 = vmatprep.subr.mxu1 %v2183_v5  ;;  %v2238_v58 = vld [vmem:[%s7388_s3 + $0xb78] sm:$0xff]  ;;  %v1862_v59 = vmax.f32 %v1553_v56, 0.0  ;;  %v2221_v5 = vld [vmem:[%s7388_s3 + $0xaf0] sm:$0xff] }
 0x1a9   :  { %3807 = vmatpush3.msra.mxu0 %v2135_v49  ;;  %3842 = vmatpush3.msra.mxu1 %v2167_v60  ;;  %v2253_v49 = vld [vmem:[%s7388_s3 + $0xbf0] sm:$0xff]  ;;  %v6914_v56 = vld [vmem:[%s7387_s2 + $0x18] sm:$0xff] }
 0x1aa   :  { %3808 = vmatprep.subr.mxu0 %v2150_v61  ;;  %3843 = vmatprep.subr.mxu1 %v2182_v62  ;;  %v2205_v60 = vld [vmem:[%s7388_s3 + $0xa70] sm:$0xff]  ;;  %v2220_v62 = vld [vmem:[%s7388_s3 + $0xae8] sm:$0xff] }
 0x1ab   :  { %3809 = vmatpush3.msra.mxu0 %v2134_v63  ;;  %3844 = vmatpush3.msra.mxu1 %v2166_v2  ;;  %v2237_v61 = vld [vmem:[%s7388_s3 + $0xb70] sm:$0xff]  ;;  %v2252_v63 = vld [vmem:[%s7388_s3 + $0xbe8] sm:$0xff] }
 0x1ac   :  { %3810 = vmatprep.subr.mxu0 %v2149_v4  ;;  %3845 = vmatprep.subr.mxu1 %v2181_v8  ;;  %v2204_v2 = vld [vmem:[%s7388_s3 + $0xa68] sm:$0xff]  ;;  %v2219_v8 = vld [vmem:[%s7388_s3 + $0xae0] sm:$0xff] }
 0x1ad   :  { %3811 = vmatpush3.msra.mxu0 %v2133_v9  ;;  %3846 = vmatpush3.msra.mxu1 %v2165_v11  ;;  %v2236_v4 = vld [vmem:[%s7388_s3 + $0xb68] sm:$0xff]  ;;  %v2251_v9 = vld [vmem:[%s7388_s3 + $0xbe0] sm:$0xff] }
 0x1ae   :  { %3812 = vmatprep.subr.mxu0 %v2148_v13  ;;  %3847 = vmatprep.subr.mxu1 %v2180_v14  ;;  %v2203_v11 = vld [vmem:[%s7388_s3 + $0xa60] sm:$0xff]  ;;  %v2218_v14 = vld [vmem:[%s7388_s3 + $0xad8] sm:$0xff] }
 0x1af   :  { %3813 = vmatpush3.msra.mxu0 %v2132_v15  ;;  %3848 = vmatpush3.msra.mxu1 %v2164_v18  ;;  %v2235_v13 = vld [vmem:[%s7388_s3 + $0xb60] sm:$0xff]  ;;  %v2250_v15 = vld [vmem:[%s7388_s3 + $0xbd8] sm:$0xff] }
 0x1b0   :  { %3814 = vmatprep.subr.mxu0 %v2147_v22  ;;  %3849 = vmatprep.subr.mxu1 %v2179_v29  ;;  %v2202_v18 = vld [vmem:[%s7388_s3 + $0xa58] sm:$0xff]  ;;  %v2217_v29 = vld [vmem:[%s7388_s3 + $0xad0] sm:$0xff] }
 0x1b1   :  { %3815 = vmatpush3.msra.mxu0 %v2131_v24  ;;  %3850 = vmatpush3.msra.mxu1 %v2163_v30  ;;  %v2234_v22 = vld [vmem:[%s7388_s3 + $0xb58] sm:$0xff]  ;;  %v2249_v24 = vld [vmem:[%s7388_s3 + $0xbd0] sm:$0xff] }
 0x1b2   :  { %3816 = vmatprep.subr.mxu0 %v2146_v19  ;;  %3851 = vmatprep.subr.mxu1 %v2178_v20  ;;  %v2201_v30 = vld [vmem:[%s7388_s3 + $0xa50] sm:$0xff]  ;;  %v2216_v20 = vld [vmem:[%s7388_s3 + $0xac8] sm:$0xff] }
 0x1b3   :  { %3817 = vmatpush3.msra.mxu0 %v2130_v28  ;;  %3852 = vmatpush3.msra.mxu1 %v2162_v31  ;;  %v2233_v19 = vld [vmem:[%s7388_s3 + $0xb50] sm:$0xff]  ;;  %v2232_v28 = vld [vmem:[%s7388_s3 + $0xb48] sm:$0xff]  ;;  %v2215_v31 = vld [vmem:[%s7388_s3 + $0xac0] sm:$0xff] }
 0x1b4   :  { %3818 = vmatprep.subr.mxu0 %v2145_v32  ;;  %3853 = vmatprep.subr.mxu1 %v2177_v33  ;;  %v2247_v32 = vld [vmem:[%s7388_s3 + $0xbc0] sm:$0xff] }
 0x1b5   :  { %3819 = vmatpush3.msra.mxu0 %v2129_v3  ;;  %3854 = vmatpush3.msra.mxu1 %v2161_v35  ;;  %v2199_v33 = vld [vmem:[%s7388_s3 + $0xa40] sm:$0xff]  ;;  %v2214_v3 = vld [vmem:[%s7388_s3 + $0xab8] sm:$0xff] }
 0x1b6   :  { %3820 = vmatprep.subr.mxu0 %v2144_v37  ;;  %3855 = vmatprep.subr.mxu1 %v2176_v38  ;;  %v2246_v35 = vld [vmem:[%s7388_s3 + $0xbb8] sm:$0xff]  ;;  %v2213_v37 = vld [vmem:[%s7388_s3 + $0xab0] sm:$0xff] }
 0x1b7   :  { %3821 = vmatpush3.msra.mxu0 %v2128_v42  ;;  %3856 = vmatpush3.msra.mxu1 %v2160_v43  ;;  %v2245_v38 = vld [vmem:[%s7388_s3 + $0xbb0] sm:$0xff]  ;;  %v2244_v42 = vld [vmem:[%s7388_s3 + $0xba8] sm:$0xff] }
 0x1b8   :  { %3822 = vmatprep.subr.mxu0 %v2143_v6  ;;  %3857 = vmatprep.subr.mxu1 %v2175_v48  ;;  %v2196_v43 = vld [vmem:[%s7388_s3 + $0xa28] sm:$0xff]  ;;  %v2211_v48 = vld [vmem:[%s7388_s3 + $0xaa0] sm:$0xff] }
 0x1b9   :  { %3823 = vmatpush3.msra.mxu0 %v2127_v10  ;;  %3858 = vmatpush3.msra.mxu1 %v2159_v50  ;;  %v2228_v6 = vld [vmem:[%s7388_s3 + $0xb28] sm:$0xff]  ;;  %v2195_v10 = vld [vmem:[%s7388_s3 + $0xa20] sm:$0xff] }
 0x1ba   :  { %3011 = vmatmul.mubr.f32.vlgmr.msra.gmra.mxu0 %v1855_v46  ;;  %3081 = vmatmul.mubr.f32.vlgmr.msra.gmra.mxu1 %v1857_v55  ;;  %v2227_v50 = vld [vmem:[%s7388_s3 + $0xb20] sm:$0xff]  ;;  %v6916_v46 = vpop.f32.mrf.mxu0  ;;  %v2210_v55 = vld [vmem:[%s7388_s3 + $0xa98] sm:$0xff] }
 0x1bb   :  { %3862 = vmatprep.subr.mxu0 %v2222_v51  ;;  %3897 = vmatprep.subr.mxu1 %v2254_v52  ;;  %v2242_v51 = vld [vmem:[%s7388_s3 + $0xb98] sm:$0xff]  ;;  %v626_v52 = vrot.slane %v6497_v47, %v6054_v44 }
 0x1bc   :  { %3863 = vmatpush3.msra.mxu0 %v2206_v53  ;;  %3150 = vmatprep.mubr.f32.mxu0 %v1860_v54  ;;  %v634_v53 = vrot.slane %v6497_v47, %v6057_v45  ;;  %v6928_v54 = vpop.f32.mrf.mxu1  ;;  %v2241_v47 = vld [vmem:[%s7388_s3 + $0xb90] sm:$0xff] }
 0x1bd   :  { %3898 = vmatpush3.msra.mxu1 %v2238_v58  ;;  %3220 = vmatprep.mubr.f32.mxu1 %v1862_v59  ;;  %v2194_v58 = vld [vmem:[%s7388_s3 + $0xa18] sm:$0xff] }
 0x1be   :  { %3864 = vmatprep.subr.mxu0 %v2221_v5  ;;  %3899 = vmatprep.subr.mxu1 %v2253_v49  ;;  %v2226_v59 = vld [vmem:[%s7388_s3 + $0xb18] sm:$0xff]  ;;  %v2209_v5 = vld [vmem:[%s7388_s3 + $0xa90] sm:$0xff]  ;;  %v646_v49 = vrot.slane %v6914_v56, %v5636_v0  ;;  %v2208_v0 = vld [vmem:[%s7388_s3 + $0xa88] sm:$0xff] }
 0x1bf   :  { %3865 = vmatpush3.msra.mxu0 %v2205_v60  ;;  %3900 = vmatpush3.msra.mxu1 %v2237_v61  ;;  %v2193_v60 = vld [vmem:[%s7388_s3 + $0xa10] sm:$0xff] }
 0x1c0   :  { %3866 = vmatprep.subr.mxu0 %v2220_v62  ;;  %3901 = vmatprep.subr.mxu1 %v2252_v63  ;;  %v2225_v61 = vld [vmem:[%s7388_s3 + $0xb10] sm:$0xff]  ;;  %v1623_v62 = vpop.f32.mrf.mxu0  ;;  %v654_v63 = vrot.slane %v6914_v56, %v5652_v7  ;;  %v2192_v7 = vld [vmem:[%s7388_s3 + $0xa08] sm:$0xff] }
 0x1c1   :  { %3867 = vmatpush3.msra.mxu0 %v2204_v2  ;;  %3902 = vmatpush3.msra.mxu1 %v2236_v4  ;;  %v2240_v2 = vld [vmem:[%s7388_s3 + $0xb88] sm:$0xff]  ;;  %v1480_v4 = vadd.f32 %v6705_v1, %v626_v52  ;;  %v2239_v1 = vld [vmem:[%s7388_s3 + $0xb80] sm:$0xff] }
 0x1c2   :  { %3868 = vmatprep.subr.mxu0 %v2219_v8  ;;  %3903 = vmatprep.subr.mxu1 %v2251_v9  ;;  %v1551_v8 = vadd.f32 %v6717_v27, %v634_v53  ;;  %v1694_v9 = vpop.f32.mrf.mxu1  ;;  %v1624_v27 = vadd.f32 %v1623_v62, %v646_v49  ;;  %v2296_v52 = vld [vmem:[%s7388_s3 + $0xd48] sm:$0xff]  ;;  %v2279_v53 = vld [vmem:[%s7388_s3 + $0xcc0] sm:$0xff]  ;;  %v2310_v49 = vld [vmem:[%s7388_s3 + $0xdb8] sm:$0xff] }
 0x1c3   :  { %3869 = vmatpush3.msra.mxu0 %v2203_v11  ;;  %3904 = vmatpush3.msra.mxu1 %v2235_v13  ;;  %v2224_v11 = vld [vmem:[%s7388_s3 + $0xb08] sm:$0xff]  ;;  %v2207_v13 = vld [vmem:[%s7388_s3 + $0xa80] sm:$0xff]  ;;  %v2277_v62 = vld [vmem:[%s7388_s3 + $0xcb0] sm:$0xff] }
 0x1c4   :  { %3870 = vmatprep.subr.mxu0 %v2218_v14  ;;  %3905 = vmatprep.subr.mxu1 %v2250_v15  ;;  %v2191_v14 = vld [vmem:[%s7388_s3 + $0xa00] sm:$0xff] }
 0x1c5   :  { %3871 = vmatpush3.msra.mxu0 %v2202_v18  ;;  %3906 = vmatpush3.msra.mxu1 %v2234_v22  ;;  %v2223_v15 = vld [vmem:[%s7388_s3 + $0xb00] sm:$0xff]  ;;  %v1695_v18 = vadd.f32 %v1694_v9, %v654_v63  ;;  %v1859_v22 = vmax.f32 %v1480_v4, 0.0  ;;  %v2309_v63 = vld [vmem:[%s7388_s3 + $0xdb0] sm:$0xff]  ;;  %v2276_v4 = vld [vmem:[%s7388_s3 + $0xca8] sm:$0xff] }
 0x1c6   :  { %3872 = vmatprep.subr.mxu0 %v2217_v29  ;;  %3907 = vmatprep.subr.mxu1 %v2249_v24  ;;  %v1861_v29 = vmax.f32 %v1551_v8, 0.0  ;;  %v2286_v24 = vld [vmem:[%s7388_s3 + $0xcf8] sm:$0xff]  ;;  %v2308_v8 = vld [vmem:[%s7388_s3 + $0xda8] sm:$0xff] }
 0x1c7   :  { %3873 = vmatpush3.msra.mxu0 %v2201_v30  ;;  %3908 = vmatpush3.msra.mxu1 %v2233_v19  ;;  %v2318_v30 = vld [vmem:[%s7388_s3 + $0xdf8] sm:$0xff]  ;;  %v2260_v9 = vld [vmem:[%s7388_s3 + $0xc28] sm:$0xff] }
 0x1c8   :  { %3874 = vmatprep.subr.mxu0 %v2216_v20  ;;  %3909 = vmatprep.subr.mxu1 %v2248_v23  ;;  %v2270_v19 = vld [vmem:[%s7388_s3 + $0xc78] sm:$0xff]  ;;  %v1864_v20 = vmax.f32 %v1624_v27, 0.0  ;;  %v2291_v27 = vld [vmem:[%s7388_s3 + $0xd20] sm:$0xff] }
 0x1c9   :  { %3875 = vmatpush3.msra.mxu0 %v2200_v26  ;;  %3910 = vmatpush3.msra.mxu1 %v2232_v28  ;;  %v2302_v23 = vld [vmem:[%s7388_s3 + $0xd78] sm:$0xff]  ;;  %v1866_v26 = vmax.f32 %v1695_v18, 0.0  ;;  %v2285_v28 = vld [vmem:[%s7388_s3 + $0xcf0] sm:$0xff] }
 0x1ca   :  { %3876 = vmatprep.subr.mxu0 %v2215_v31  ;;  %3911 = vmatprep.subr.mxu1 %v2247_v32  ;;  %v2317_v31 = vld [vmem:[%s7388_s3 + $0xdf0] sm:$0xff]  ;;  %v2306_v18 = vld [vmem:[%s7388_s3 + $0xd98] sm:$0xff] }
 0x1cb   :  { %3877 = vmatpush3.msra.mxu0 %v2199_v33  ;;  %3912 = vmatpush3.msra.mxu1 %v2231_v34  ;;  %v2269_v32 = vld [vmem:[%s7388_s3 + $0xc70] sm:$0xff]  ;;  %v2284_v34 = vld [vmem:[%s7388_s3 + $0xce8] sm:$0xff] }
 0x1cc   :  { %3878 = vmatprep.subr.mxu0 %v2214_v3  ;;  %3913 = vmatprep.subr.mxu1 %v2246_v35  ;;  %v2301_v33 = vld [vmem:[%s7388_s3 + $0xd70] sm:$0xff]  ;;  %v2316_v3 = vld [vmem:[%s7388_s3 + $0xde8] sm:$0xff] }
 0x1cd   :  { %3879 = vmatpush3.msra.mxu0 %v2198_v12  ;;  %3914 = vmatpush3.msra.mxu1 %v2230_v36  ;;  %v2268_v35 = vld [vmem:[%s7388_s3 + $0xc68] sm:$0xff]  ;;  %v2283_v36 = vld [vmem:[%s7388_s3 + $0xce0] sm:$0xff] }
 0x1ce   :  { %3880 = vmatprep.subr.mxu0 %v2213_v37  ;;  %3915 = vmatprep.subr.mxu1 %v2245_v38  ;;  %v2300_v12 = vld [vmem:[%s7388_s3 + $0xd68] sm:$0xff]  ;;  %v2315_v37 = vld [vmem:[%s7388_s3 + $0xde0] sm:$0xff] }
 0x1cf   :  { %3881 = vmatpush3.msra.mxu0 %v2197_v39  ;;  %3916 = vmatpush3.msra.mxu1 %v2229_v40  ;;  %v2267_v38 = vld [vmem:[%s7388_s3 + $0xc60] sm:$0xff]  ;;  %v2282_v40 = vld [vmem:[%s7388_s3 + $0xcd8] sm:$0xff] }
 0x1d0   :  { %3882 = vmatprep.subr.mxu0 %v2212_v41  ;;  %3917 = vmatprep.subr.mxu1 %v2244_v42  ;;  %v2299_v39 = vld [vmem:[%s7388_s3 + $0xd60] sm:$0xff]  ;;  %v2314_v41 = vld [vmem:[%s7388_s3 + $0xdd8] sm:$0xff] }
 0x1d1   :  { %3883 = vmatpush3.msra.mxu0 %v2196_v43  ;;  %3918 = vmatpush3.msra.mxu1 %v2228_v6  ;;  %v2266_v42 = vld [vmem:[%s7388_s3 + $0xc58] sm:$0xff]  ;;  %v2281_v6 = vld [vmem:[%s7388_s3 + $0xcd0] sm:$0xff] }
 0x1d2   :  { %3884 = vmatprep.subr.mxu0 %v2211_v48  ;;  %3919 = vmatprep.subr.mxu1 %v2243_v57  ;;  %v2298_v43 = vld [vmem:[%s7388_s3 + $0xd58] sm:$0xff]  ;;  %v2313_v48 = vld [vmem:[%s7388_s3 + $0xdd0] sm:$0xff] }
 0x1d3   :  { %3885 = vmatpush3.msra.mxu0 %v2195_v10  ;;  %3920 = vmatpush3.msra.mxu1 %v2227_v50  ;;  %v2265_v57 = vld [vmem:[%s7388_s3 + $0xc50] sm:$0xff]  ;;  %v2280_v50 = vld [vmem:[%s7388_s3 + $0xcc8] sm:$0xff] }
 0x1d4   :  { %3886 = vmatprep.subr.mxu0 %v2210_v55  ;;  %3921 = vmatprep.subr.mxu1 %v2242_v51  ;;  %v2297_v10 = vld [vmem:[%s7388_s3 + $0xd50] sm:$0xff]  ;;  %v2312_v55 = vld [vmem:[%s7388_s3 + $0xdc8] sm:$0xff] }
 0x1d5   :  { %3887 = vmatpush3.msra.mxu0 %v2194_v58  ;;  %3922 = vmatpush3.msra.mxu1 %v2226_v59  ;;  %v2264_v51 = vld [vmem:[%s7388_s3 + $0xc48] sm:$0xff]  ;;  %v2311_v58 = vld [vmem:[%s7388_s3 + $0xdc0] sm:$0xff] }
 0x1d6   :  { %3888 = vmatprep.subr.mxu0 %v2209_v5  ;;  %3923 = vmatprep.subr.mxu1 %v2241_v47  ;;  %v2263_v59 = vld [vmem:[%s7388_s3 + $0xc40] sm:$0xff]  ;;  %v2278_v47 = vld [vmem:[%s7388_s3 + $0xcb8] sm:$0xff] }
 0x1d7   :  { %3889 = vmatpush3.msra.mxu0 %v2193_v60  ;;  %3924 = vmatpush3.msra.mxu1 %v2225_v61  ;;  %v2295_v5 = vld [vmem:[%s7388_s3 + $0xd40] sm:$0xff]  ;;  %v2262_v60 = vld [vmem:[%s7388_s3 + $0xc38] sm:$0xff] }
 0x1d8   :  { %3890 = vmatprep.subr.mxu0 %v2208_v0  ;;  %3925 = vmatprep.subr.mxu1 %v2240_v2  ;;  %v2294_v61 = vld [vmem:[%s7388_s3 + $0xd38] sm:$0xff]  ;;  %v2261_v0 = vld [vmem:[%s7388_s3 + $0xc30] sm:$0xff] }
 0x1d9   :  { %3891 = vmatpush3.msra.mxu0 %v2192_v7  ;;  %3926 = vmatpush3.msra.mxu1 %v2224_v11  ;;  %v2293_v2 = vld [vmem:[%s7388_s3 + $0xd30] sm:$0xff]  ;;  %v2292_v7 = vld [vmem:[%s7388_s3 + $0xd28] sm:$0xff]  ;;  %v2275_v11 = vld [vmem:[%s7388_s3 + $0xca0] sm:$0xff] }
 0x1da   :  { %3892 = vmatprep.subr.mxu0 %v2207_v13  ;;  %3927 = vmatprep.subr.mxu1 %v2239_v1  ;;  %v2307_v13 = vld [vmem:[%s7388_s3 + $0xda0] sm:$0xff] }
 0x1db   :  { %3893 = vmatpush3.msra.mxu0 %v2191_v14  ;;  %3928 = vmatpush3.msra.mxu1 %v2223_v15  ;;  %v2259_v1 = vld [vmem:[%s7388_s3 + $0xc20] sm:$0xff]  ;;  %v7122_v14 = vpop.f32.mrf.mxu0  ;;  %v2274_v15 = vld [vmem:[%s7388_s3 + $0xc98] sm:$0xff] }
 0x1dc   :  { %3151 = vmatmul.mubr.f32.vlgmr.msra.gmra.mxu0 %v1859_v22  ;;  %3221 = vmatmul.mubr.f32.vlgmr.msra.gmra.mxu1 %v1861_v29  ;;  %v642_v22 = vrot.slane %v6914_v56, %v5833_v16  ;;  %v650_v29 = vrot.slane %v6914_v56, %v5836_v17  ;;  %v2273_v16 = vld [vmem:[%s7388_s3 + $0xc90] sm:$0xff] }
 0x1dd   :  { %3932 = vmatprep.subr.mxu0 %v2286_v24  ;;  %3967 = vmatprep.subr.mxu1 %v2318_v30  ;;  %v7134_v24 = vpop.f32.mrf.mxu1  ;;  %v2258_v30 = vld [vmem:[%s7388_s3 + $0xc18] sm:$0xff]  ;;  %v2305_v17 = vld [vmem:[%s7388_s3 + $0xd90] sm:$0xff] }
 0x1de   :  { %3933 = vmatpush3.msra.mxu0 %v2270_v19  ;;  %3290 = vmatprep.mubr.f32.mxu0 %v1864_v20  ;;  %v2290_v19 = vld [vmem:[%s7388_s3 + $0xd18] sm:$0xff]  ;;  %v662_v20 = vrot.slane %v6914_v56, %v5851_v21  ;;  %v2272_v21 = vld [vmem:[%s7388_s3 + $0xc88] sm:$0xff] }
 0x1df   :  { %3968 = vmatpush3.msra.mxu1 %v2302_v23  ;;  %3360 = vmatprep.mubr.f32.mxu1 %v1866_v26  ;;  %v2257_v23 = vld [vmem:[%s7388_s3 + $0xc10] sm:$0xff] }
 0x1e0   :  { %3934 = vmatprep.subr.mxu0 %v2285_v28  ;;  %3969 = vmatprep.subr.mxu1 %v2317_v31  ;;  %v2289_v26 = vld [vmem:[%s7388_s3 + $0xd10] sm:$0xff]  ;;  %v1765_v28 = vpop.f32.mrf.mxu0  ;;  %v670_v31 = vrot.slane %v6914_v56, %v5862_v25  ;;  %v2256_v25 = vld [vmem:[%s7388_s3 + $0xc08] sm:$0xff] }
 0x1e1   :  { %3935 = vmatpush3.msra.mxu0 %v2269_v32  ;;  %3970 = vmatpush3.msra.mxu1 %v2301_v33  ;;  %v2304_v32 = vld [vmem:[%s7388_s3 + $0xd88] sm:$0xff]  ;;  %v1622_v33 = vadd.f32 %v6916_v46, %v642_v22  ;;  %v2303_v46 = vld [vmem:[%s7388_s3 + $0xd80] sm:$0xff] }
 0x1e2   :  { %3936 = vmatprep.subr.mxu0 %v2284_v34  ;;  %3971 = vmatprep.subr.mxu1 %v2316_v3  ;;  %v1693_v34 = vadd.f32 %v6928_v54, %v650_v29  ;;  %v1836_v3 = vpop.f32.mrf.mxu1  ;;  %v1766_v54 = vadd.f32 %v1765_v28, %v662_v20  ;;  %v2359_v22 = vld [vmem:[%s7388_s3 + $0xf40] sm:$0xff]  ;;  %v2342_v29 = vld [vmem:[%s7388_s3 + $0xeb8] sm:$0xff]  ;;  %v2373_v20 = vld [vmem:[%s7388_s3 + $0xfb0] sm:$0xff] }
 0x1e3   :  { %3937 = vmatpush3.msra.mxu0 %v2268_v35  ;;  %3972 = vmatpush3.msra.mxu1 %v2300_v12  ;;  %v2288_v35 = vld [vmem:[%s7388_s3 + $0xd08] sm:$0xff]  ;;  %v2271_v12 = vld [vmem:[%s7388_s3 + $0xc80] sm:$0xff] }
 0x1e4   :  { %3938 = vmatprep.subr.mxu0 %v2283_v36  ;;  %3973 = vmatprep.subr.mxu1 %v2315_v37  ;;  %v2255_v36 = vld [vmem:[%s7388_s3 + $0xc00] sm:$0xff]  ;;  %v2340_v28 = vld [vmem:[%s7388_s3 + $0xea8] sm:$0xff] }
 0x1e5   :  { %3939 = vmatpush3.msra.mxu0 %v2267_v38  ;;  %3974 = vmatpush3.msra.mxu1 %v2299_v39  ;;  %v2287_v37 = vld [vmem:[%s7388_s3 + $0xd00] sm:$0xff]  ;;  %v1837_v38 = vadd.f32 %v1836_v3, %v670_v31  ;;  %v1863_v39 = vmax.f32 %v1622_v33, 0.0  ;;  %v2372_v31 = vld [vmem:[%s7388_s3 + $0xfa8] sm:$0xff] }
 0x1e6   :  { %3940 = vmatprep.subr.mxu0 %v2282_v40  ;;  %3975 = vmatprep.subr.mxu1 %v2314_v41  ;;  %v1865_v40 = vmax.f32 %v1693_v34, 0.0  ;;  %v2350_v41 = vld [vmem:[%s7388_s3 + $0xef8] sm:$0xff]  ;;  %v2339_v33 = vld [vmem:[%s7388_s3 + $0xea0] sm:$0xff] }
 0x1e7   :  { %3941 = vmatpush3.msra.mxu0 %v2266_v42  ;;  %3976 = vmatpush3.msra.mxu1 %v2298_v43  ;;  %v2382_v42 = vld [vmem:[%s7388_s3 + $0xff8] sm:$0xff]  ;;  %v2371_v34 = vld [vmem:[%s7388_s3 + $0xfa0] sm:$0xff] }
 0x1e8   :  { %3942 = vmatprep.subr.mxu0 %v2281_v6  ;;  %3977 = vmatprep.subr.mxu1 %v2313_v48  ;;  %v2334_v43 = vld [vmem:[%s7388_s3 + $0xe78] sm:$0xff]  ;;  %v1868_v6 = vmax.f32 %v1766_v54, 0.0  ;;  %v2323_v3 = vld [vmem:[%s7388_s3 + $0xe20] sm:$0xff]  ;;  %v666_v54 = vrot.slane %v6914_v56, %v6057_v45  ;;  %v2321_v45 = vld [vmem:[%s7388_s3 + $0xe10] sm:$0xff] }
 0x1e9   :  { %3943 = vmatpush3.msra.mxu0 %v2265_v57  ;;  %3978 = vmatpush3.msra.mxu1 %v2297_v10  ;;  %v2366_v48 = vld [vmem:[%s7388_s3 + $0xf78] sm:$0xff]  ;;  %v1870_v57 = vmax.f32 %v1837_v38, 0.0  ;;  %v2349_v10 = vld [vmem:[%s7388_s3 + $0xef0] sm:$0xff] }
 0x1ea   :  { %3944 = vmatprep.subr.mxu0 %v2280_v50  ;;  %3979 = vmatprep.subr.mxu1 %v2312_v55  ;;  %v2381_v50 = vld [vmem:[%s7388_s3 + $0xff0] sm:$0xff] }
 0x1eb   :  { %3945 = vmatpush3.msra.mxu0 %v2264_v51  ;;  %3980 = vmatpush3.msra.mxu1 %v2296_v52  ;;  %v2333_v55 = vld [vmem:[%s7388_s3 + $0xe70] sm:$0xff]  ;;  %v2348_v52 = vld [vmem:[%s7388_s3 + $0xee8] sm:$0xff] }
 0x1ec   :  { %3946 = vmatprep.subr.mxu0 %v2279_v53  ;;  %3981 = vmatprep.subr.mxu1 %v2311_v58  ;;  %v2365_v51 = vld [vmem:[%s7388_s3 + $0xf70] sm:$0xff]  ;;  %v2380_v53 = vld [vmem:[%s7388_s3 + $0xfe8] sm:$0xff] }
 0x1ed   :  { %3947 = vmatpush3.msra.mxu0 %v2263_v59  ;;  %3982 = vmatpush3.msra.mxu1 %v2295_v5  ;;  %v2332_v58 = vld [vmem:[%s7388_s3 + $0xe68] sm:$0xff]  ;;  %v2347_v5 = vld [vmem:[%s7388_s3 + $0xee0] sm:$0xff]  ;;  %v2337_v38 = vld [vmem:[%s7388_s3 + $0xe90] sm:$0xff] }
 0x1ee   :  { %3948 = vmatprep.subr.mxu0 %v2278_v47  ;;  %3983 = vmatprep.subr.mxu1 %v2310_v49  ;;  %v2364_v59 = vld [vmem:[%s7388_s3 + $0xf68] sm:$0xff]  ;;  %v2379_v47 = vld [vmem:[%s7388_s3 + $0xfe0] sm:$0xff] }
 0x1ef   :  { %3949 = vmatpush3.msra.mxu0 %v2262_v60  ;;  %3984 = vmatpush3.msra.mxu1 %v2294_v61  ;;  %v2331_v49 = vld [vmem:[%s7388_s3 + $0xe60] sm:$0xff]  ;;  %v2346_v61 = vld [vmem:[%s7388_s3 + $0xed8] sm:$0xff] }
 0x1f0   :  { %3950 = vmatprep.subr.mxu0 %v2277_v62  ;;  %3985 = vmatprep.subr.mxu1 %v2309_v63  ;;  %v2363_v60 = vld [vmem:[%s7388_s3 + $0xf60] sm:$0xff]  ;;  %v2378_v62 = vld [vmem:[%s7388_s3 + $0xfd8] sm:$0xff] }
 0x1f1   :  { %3951 = vmatpush3.msra.mxu0 %v2261_v0  ;;  %3986 = vmatpush3.msra.mxu1 %v2293_v2  ;;  %v2330_v63 = vld [vmem:[%s7388_s3 + $0xe58] sm:$0xff]  ;;  %v2345_v2 = vld [vmem:[%s7388_s3 + $0xed0] sm:$0xff] }
 0x1f2   :  { %3952 = vmatprep.subr.mxu0 %v2276_v4  ;;  %3987 = vmatprep.subr.mxu1 %v2308_v8  ;;  %v2362_v0 = vld [vmem:[%s7388_s3 + $0xf58] sm:$0xff]  ;;  %v2377_v4 = vld [vmem:[%s7388_s3 + $0xfd0] sm:$0xff] }
 0x1f3   :  { %3953 = vmatpush3.msra.mxu0 %v2260_v9  ;;  %3988 = vmatpush3.msra.mxu1 %v2292_v7  ;;  %v2329_v8 = vld [vmem:[%s7388_s3 + $0xe50] sm:$0xff]  ;;  %v2344_v7 = vld [vmem:[%s7388_s3 + $0xec8] sm:$0xff] }
 0x1f4   :  { %3954 = vmatprep.subr.mxu0 %v2275_v11  ;;  %3989 = vmatprep.subr.mxu1 %v2307_v13  ;;  %v2361_v9 = vld [vmem:[%s7388_s3 + $0xf50] sm:$0xff]  ;;  %v2376_v11 = vld [vmem:[%s7388_s3 + $0xfc8] sm:$0xff] }
 0x1f5   :  { %3955 = vmatpush3.msra.mxu0 %v2259_v1  ;;  %3990 = vmatpush3.msra.mxu1 %v2291_v27  ;;  %v2328_v13 = vld [vmem:[%s7388_s3 + $0xe48] sm:$0xff]  ;;  %v2343_v27 = vld [vmem:[%s7388_s3 + $0xec0] sm:$0xff] }
 0x1f6   :  { %3956 = vmatprep.subr.mxu0 %v2274_v15  ;;  %3991 = vmatprep.subr.mxu1 %v2306_v18  ;;  %v2360_v1 = vld [vmem:[%s7388_s3 + $0xf48] sm:$0xff]  ;;  %v2375_v15 = vld [vmem:[%s7388_s3 + $0xfc0] sm:$0xff] }
 0x1f7   :  { %3957 = vmatpush3.msra.mxu0 %v2258_v30  ;;  %3992 = vmatpush3.msra.mxu1 %v2290_v19  ;;  %v2327_v18 = vld [vmem:[%s7388_s3 + $0xe40] sm:$0xff]  ;;  %v2374_v30 = vld [vmem:[%s7388_s3 + $0xfb8] sm:$0xff] }
 0x1f8   :  { %3958 = vmatprep.subr.mxu0 %v2273_v16  ;;  %3993 = vmatprep.subr.mxu1 %v2305_v17  ;;  %v2326_v19 = vld [vmem:[%s7388_s3 + $0xe38] sm:$0xff]  ;;  %v2341_v17 = vld [vmem:[%s7388_s3 + $0xeb0] sm:$0xff] }
 0x1f9   :  { %3959 = vmatpush3.msra.mxu0 %v2257_v23  ;;  %3994 = vmatpush3.msra.mxu1 %v2289_v26  ;;  %v2358_v16 = vld [vmem:[%s7388_s3 + $0xf38] sm:$0xff]  ;;  %v2325_v23 = vld [vmem:[%s7388_s3 + $0xe30] sm:$0xff] }
 0x1fa   :  { %3960 = vmatprep.subr.mxu0 %v2272_v21  ;;  %3995 = vmatprep.subr.mxu1 %v2304_v32  ;;  %v2357_v26 = vld [vmem:[%s7388_s3 + $0xf30] sm:$0xff]  ;;  %v2324_v21 = vld [vmem:[%s7388_s3 + $0xe28] sm:$0xff] }
 0x1fb   :  { %3961 = vmatpush3.msra.mxu0 %v2256_v25  ;;  %3996 = vmatpush3.msra.mxu1 %v2288_v35  ;;  %v2356_v32 = vld [vmem:[%s7388_s3 + $0xf28] sm:$0xff]  ;;  %v2355_v25 = vld [vmem:[%s7388_s3 + $0xf20] sm:$0xff]  ;;  %v2338_v35 = vld [vmem:[%s7388_s3 + $0xe98] sm:$0xff] }
 0x1fc   :  { %3962 = vmatprep.subr.mxu0 %v2271_v12  ;;  %3997 = vmatprep.subr.mxu1 %v2303_v46  ;;  %v2370_v12 = vld [vmem:[%s7388_s3 + $0xf98] sm:$0xff]  ;;  %v658_v46 = vrot.slane %v6914_v56, %v6054_v44  ;;  %v2369_v44 = vld [vmem:[%s7388_s3 + $0xf90] sm:$0xff] }
 0x1fd   :  { %3963 = vmatpush3.msra.mxu0 %v2255_v36  ;;  %3998 = vmatpush3.msra.mxu1 %v2287_v37  ;;  %v2322_v36 = vld [vmem:[%s7388_s3 + $0xe18] sm:$0xff]  ;;  %v2353_v56 = vld [vmem:[%s7388_s3 + $0xf10] sm:$0xff] }
 0x1fe   :  { %3291 = vmatmul.mubr.f32.vlgmr.msra.gmra.mxu0 %v1863_v39  ;;  %3361 = vmatmul.mubr.f32.vlgmr.msra.gmra.mxu1 %v1865_v40  ;;  %v2354_v37 = vld [vmem:[%s7388_s3 + $0xf18] sm:$0xff]  ;;  %v2336_v39 = vld [vmem:[%s7388_s3 + $0xe88] sm:$0xff] }
 0x1ff   :  { %4002 = vmatprep.subr.mxu0 %v2350_v41  ;;  %4037 = vmatprep.subr.mxu1 %v2382_v42  ;;  %v2368_v40 = vld [vmem:[%s7388_s3 + $0xf88] sm:$0xff]  ;;  %v1764_v41 = vadd.f32 %v7122_v14, %v658_v46  ;;  %v1835_v42 = vadd.f32 %v7134_v24, %v666_v54  ;;  %v2367_v14 = vld [vmem:[%s7388_s3 + $0xf80] sm:$0xff] }
 0x200   :  { %4003 = vmatpush3.msra.mxu0 %v2334_v43  ;;  %3430 = vmatprep.mubr.f32.mxu0 %v1868_v6  ;;  %v2320_v43 = vld [vmem:[%s7388_s3 + $0xe08] sm:$0xff]  ;;  %v2319_v24 = vld [vmem:[%s7388_s3 + $0xe00] sm:$0xff] }
 0x201   :  { %4038 = vmatpush3.msra.mxu1 %v2366_v48  ;;  %3500 = vmatprep.mubr.f32.mxu1 %v1870_v57  ;;  %v2352_v6 = vld [vmem:[%s7388_s3 + $0xf08] sm:$0xff]  ;;  %v2335_v48 = vld [vmem:[%s7388_s3 + $0xe80] sm:$0xff] }
 0x202   :  { %4004 = vmatprep.subr.mxu0 %v2349_v10  ;;  %4039 = vmatprep.subr.mxu1 %v2381_v50  ;;  %v2351_v57 = vld [vmem:[%s7388_s3 + $0xf00] sm:$0xff]  ;;  %v1867_v10 = vmax.f32 %v1764_v41, 0.0  ;;  %v1869_v50 = vmax.f32 %v1835_v42, 0.0 }
 0x203   :  { %4005 = vmatpush3.msra.mxu0 %v2333_v55  ;;  %4040 = vmatpush3.msra.mxu1 %v2365_v51  ;;  %v3544_v55 = vpop.f32.mrf.mxu0 }
 0x204   :  { %4006 = vmatprep.subr.mxu0 %v2348_v52  ;;  %4041 = vmatprep.subr.mxu1 %v2380_v53  ;;  %v3579_v52 = vpop.f32.mrf.mxu1 }
 0x205   :  { %4007 = vmatpush3.msra.mxu0 %v2332_v58  ;;  %4042 = vmatpush3.msra.mxu1 %v2364_v59  ;;  %v3545_v51 = vpop.f32.mrf.mxu0  ;;  %v2385_v59 = vstv %s4073_s27 }
 0x206   :  { %4008 = vmatprep.subr.mxu0 %v2347_v5  ;;  %4043 = vmatprep.subr.mxu1 %v2379_v47  ;;  %v3546_v58 = vadd.f32 %v3545_v51, %v3544_v55  ;;  %v3580_v5 = vpop.f32.mrf.mxu1 }
 0x207   :  { %4009 = vmatpush3.msra.mxu0 %v2331_v49  ;;  %4044 = vmatpush3.msra.mxu1 %v2363_v60 }
 0x208   :  { %4010 = vmatprep.subr.mxu0 %v2346_v61  ;;  %4045 = vmatprep.subr.mxu1 %v2378_v62  ;;  %v2453_v49 = vadd.f32 %v3546_v58, %v2385_v59  ;;  %v3581_v62 = vadd.f32 %v3580_v5, %v3579_v52 }
 0x209   :  { %4011 = vmatpush3.msra.mxu0 %v2330_v63  ;;  %4046 = vmatpush3.msra.mxu1 %v2362_v0 }
 0x20a   :  { %4012 = vmatprep.subr.mxu0 %v2345_v2  ;;  %4047 = vmatprep.subr.mxu1 %v2377_v4  ;;  %v2523_v0 = vadd.f32 %v3581_v62, %v2453_v49 }
 0x20b   :  { %4013 = vmatpush3.msra.mxu0 %v2329_v8  ;;  %4048 = vmatpush3.msra.mxu1 %v2361_v9 }
 0x20c   :  { %4014 = vmatprep.subr.mxu0 %v2344_v7  ;;  %4049 = vmatprep.subr.mxu1 %v2376_v11 }
 0x20d   :  { %4015 = vmatpush3.msra.mxu0 %v2328_v13  ;;  %4050 = vmatpush3.msra.mxu1 %v2360_v1 }
 0x20e   :  { %4016 = vmatprep.subr.mxu0 %v2343_v27  ;;  %4051 = vmatprep.subr.mxu1 %v2375_v15 }
 0x20f   :  { %4017 = vmatpush3.msra.mxu0 %v2327_v18  ;;  %4052 = vmatpush3.msra.mxu1 %v2359_v22 }
 0x210   :  { %4018 = vmatprep.subr.mxu0 %v2342_v29  ;;  %4053 = vmatprep.subr.mxu1 %v2374_v30 }
 0x211   :  { %4019 = vmatpush3.msra.mxu0 %v2326_v19  ;;  %4054 = vmatpush3.msra.mxu1 %v2358_v16 }
 0x212   :  { %4020 = vmatprep.subr.mxu0 %v2341_v17  ;;  %4055 = vmatprep.subr.mxu1 %v2373_v20 }
 0x213   :  { %4021 = vmatpush3.msra.mxu0 %v2325_v23  ;;  %4056 = vmatpush3.msra.mxu1 %v2357_v26 }
 0x214   :  { %4022 = vmatprep.subr.mxu0 %v2340_v28  ;;  %4057 = vmatprep.subr.mxu1 %v2372_v31  ;;  %v3614_v53 = vpop.f32.mrf.mxu0  ;;  %v3649_v60 = vpop.f32.mrf.mxu1 }
 0x215   :  { %4023 = vmatpush3.msra.mxu0 %v2324_v21  ;;  %4058 = vmatpush3.msra.mxu1 %v2356_v32 }
 0x216   :  { %4024 = vmatprep.subr.mxu0 %v2339_v33  ;;  %4059 = vmatprep.subr.mxu1 %v2371_v34  ;;  %v3615_v47 = vpop.f32.mrf.mxu0  ;;  %v3650_v2 = vpop.f32.mrf.mxu1 }
 0x217   :  { %4025 = vmatpush3.msra.mxu0 %v2323_v3  ;;  %4060 = vmatpush3.msra.mxu1 %v2355_v25  ;;  %v3616_v63 = vadd.f32 %v3615_v47, %v3614_v53  ;;  %v3651_v11 = vadd.f32 %v3650_v2, %v3649_v60 }
 0x218   :  { %4026 = vmatprep.subr.mxu0 %v2338_v35  ;;  %4061 = vmatprep.subr.mxu1 %v2370_v12 }
 0x219   :  { %4027 = vmatpush3.msra.mxu0 %v2322_v36  ;;  %4062 = vmatpush3.msra.mxu1 %v2354_v37  ;;  %v2593_v8 = vadd.f32 %v3616_v63, %v2523_v0 }
 0x21a   :  { %4028 = vmatprep.subr.mxu0 %v2337_v38  ;;  %4063 = vmatprep.subr.mxu1 %v2369_v44 }
 0x21b   :  { %4029 = vmatpush3.msra.mxu0 %v2321_v45  ;;  %4064 = vmatpush3.msra.mxu1 %v2353_v56  ;;  %v2663_v1 = vadd.f32 %v3651_v11, %v2593_v8 }
 0x21c   :  { %4030 = vmatprep.subr.mxu0 %v2336_v39  ;;  %4065 = vmatprep.subr.mxu1 %v2368_v40 }
 0x21d   :  { %4031 = vmatpush3.msra.mxu0 %v2320_v43  ;;  %4066 = vmatpush3.msra.mxu1 %v2352_v6 }
 0x21e   :  { %4032 = vmatprep.subr.mxu0 %v2335_v48  ;;  %4067 = vmatprep.subr.mxu1 %v2367_v14 }
 0x21f   :  { %4033 = vmatpush3.msra.mxu0 %v2319_v24  ;;  %4068 = vmatpush3.msra.mxu1 %v2351_v57 }
 0x220   :  { %3431 = vmatmul.mubr.f32.vlgmr.msra.gmra.mxu0 %v1867_v10  ;;  %3501 = vmatmul.mubr.f32.vlgmr.msra.gmra.mxu1 %v1869_v50 }
 0x236   :  { %v3684_v61 = vpop.f32.mrf.mxu0  ;;  %v3719_v9 = vpop.f32.mrf.mxu1 }
 0x238   :  { %v3685_v4 = vpop.f32.mrf.mxu0  ;;  %v3720_v27 = vpop.f32.mrf.mxu1 }
 0x239   :  { %v3686_v13 = vadd.f32 %v3685_v4, %v3684_v61  ;;  %v3721_v30 = vadd.f32 %v3720_v27, %v3719_v9 }
 0x23b   :  { %v2733_v18 = vadd.f32 %v3686_v13, %v2663_v1 }
 0x23d   :  { %v2803_v16 = vadd.f32 %v3721_v30, %v2733_v18 }
 0x258   :  { %v3754_v7 = vpop.f32.mrf.mxu0  ;;  %v3789_v22 = vpop.f32.mrf.mxu1 }
 0x25a   :  { %v3755_v15 = vpop.f32.mrf.mxu0  ;;  %v3790_v17 = vpop.f32.mrf.mxu1 }
 0x25b   :  { %v3756_v19 = vadd.f32 %v3755_v15, %v3754_v7  ;;  %v3791_v31 = vadd.f32 %v3790_v17, %v3789_v22 }
 0x25d   :  { %v2873_v23 = vadd.f32 %v3756_v19, %v2803_v16 }
 0x25f   :  { %v2943_v32 = vadd.f32 %v3791_v31, %v2873_v23 }
 0x27a   :  { %v3824_v29 = vpop.f32.mrf.mxu0  ;;  %v3859_v26 = vpop.f32.mrf.mxu1 }
 0x27c   :  { %v3825_v20 = vpop.f32.mrf.mxu0  ;;  %v3860_v33 = vpop.f32.mrf.mxu1 }
 0x27d   :  { %v3826_v21 = vadd.f32 %v3825_v20, %v3824_v29  ;;  %v3861_v12 = vadd.f32 %v3860_v33, %v3859_v26 }
 0x27f   :  { %v3013_v3 = vadd.f32 %v3826_v21, %v2943_v32 }
 0x281   :  { %v3083_v54 = vadd.f32 %v3861_v12, %v3013_v3 }
 0x29c   :  { %v3894_v28 = vpop.f32.mrf.mxu0  ;;  %v3929_v25 = vpop.f32.mrf.mxu1 }
 0x29e   :  { %v3895_v34 = vpop.f32.mrf.mxu0  ;;  %v3930_v36 = vpop.f32.mrf.mxu1 }
 0x29f   :  { %v3896_v46 = vadd.f32 %v3895_v34, %v3894_v28  ;;  %v3931_v45 = vadd.f32 %v3930_v36, %v3929_v25 }
 0x2a1   :  { %v3153_v38 = vadd.f32 %v3896_v46, %v3083_v54 }
 0x2a3   :  { %v3223_v39 = vadd.f32 %v3931_v45, %v3153_v38 }
 0x2be   :  { %v3964_v35 = vpop.f32.mrf.mxu0  ;;  %v3999_v44 = vpop.f32.mrf.mxu1 }
 0x2c0   :  { %v3965_v37 = vpop.f32.mrf.mxu0  ;;  %v4000_v40 = vpop.f32.mrf.mxu1 }
 0x2c1   :  { %v3966_v56 = vadd.f32 %v3965_v37, %v3964_v35  ;;  %v4001_v6 = vadd.f32 %v4000_v40, %v3999_v44 }
 0x2c3   :  { %v3293_v41 = vadd.f32 %v3966_v56, %v3223_v39 }
 0x2c5   :  { %v3363_v24 = vadd.f32 %v4001_v6, %v3293_v41 }
 0x2e0   :  { %v4034_v42 = vpop.f32.mrf.mxu0  ;;  %v4069_v43 = vpop.f32.mrf.mxu1 }
 0x2e2   :  { %v4035_v48 = vpop.f32.mrf.mxu0  ;;  %v4070_v14 = vpop.f32.mrf.mxu1 }
 0x2e3   :  { %v4036_v57 = vadd.f32 %v4035_v48, %v4034_v42  ;;  %v4071_v50 = vadd.f32 %v4070_v14, %v4069_v43 }
 0x2e5   :  { %v3433_v10 = vadd.f32 %v4036_v57, %v3363_v24 }
 0x2e7   :  { %v3503_v55 = vadd.f32 %v4071_v50, %v3433_v10 }
 0x2e9   :  { %3507 = vst.msk [vmem:[%s7390_s5] sm:$0xff] %vm3506_vm0, %v3503_v55 }

</bundles_post_ra>
